<compile_context>
chip_gen: v5e
topology: v5e:2x2
jax: 0.10.0
libtpu: 0.0.40
codegen_flags: <defaults>
</compile_context>

<pallas_src>
import functools
import math

import numpy as np
import jax
import jax.numpy as jnp
from jax.experimental import pallas as pl
from jax.experimental.pallas import tpu as pltpu

WDTYPE = jnp.bfloat16   # weight / activation dtype (MXU-friendly); accumulation is f32


# ----------------------------- tiling helpers ------------------------------

def _row_tile(M, pref=256):
    """Row tile: multiple of 8 (16 preferred for bf16 sublane packing), divides M,
    and yields >=2 grid steps when M >= 16 so both v7x TensorCores get work."""
    divs = [t for t in range(8, min(pref, M) + 1, 8) if M % t == 0]
    if not divs:
        return M
    return max(divs, key=lambda t: ((M // t) >= 2, t % 16 == 0, t))


def _lane_tile(N, pref=512):
    """Lane tile: multiple of 128 dividing N (falls back to full N)."""
    divs = [t for t in range(128, min(pref, N) + 1, 128) if N % t == 0]
    return max(divs) if divs else N


# ------------------------------- linear (classifier) -------------------------

def _linear_kernel_nok(x_ref, w_ref, b_ref, o_ref):
    # Single K block: no scratch accumulator, no predication.
    o_ref[...] = (jnp.dot(x_ref[...], w_ref[...], preferred_element_type=jnp.float32)
                  + b_ref[...].astype(jnp.float32)).astype(o_ref.dtype)


def _linear_kernel_acc(x_ref, w_ref, b_ref, o_ref, acc_ref):
    @pl.when(pl.program_id(2) == 0)
    def _():
        acc_ref[...] = jnp.zeros_like(acc_ref)

    acc_ref[...] += jnp.dot(x_ref[...], w_ref[...], preferred_element_type=jnp.float32)

    @pl.when(pl.program_id(2) == pl.num_programs(2) - 1)
    def _():
        o_ref[...] = (acc_ref[...] + b_ref[...].astype(jnp.float32)).astype(o_ref.dtype)


def linear(x, w, b, out_dtype=None):
    """x: (M, K) @ w: (K, N) + b: (1, N) -> (M, N)."""
    M, K = x.shape
    K2, N = w.shape
    assert K == K2
    out_dtype = x.dtype if out_dtype is None else out_dtype
    tm = _row_tile(M)
    tn = _lane_tile(N)
    cost = pl.CostEstimate(
        flops=int(2 * M * N * K),
        transcendentals=0,
        bytes_accessed=int(x.size * x.dtype.itemsize + w.size * w.dtype.itemsize
                           + b.size * b.dtype.itemsize + M * N * np.dtype(out_dtype).itemsize))

    if K <= 512:   # whole contraction fits one block -> specialized kernel, no accumulator
        return pl.pallas_call(
            _linear_kernel_nok,
            out_shape=jax.ShapeDtypeStruct((M, N), out_dtype),
            grid=(M // tm, N // tn),
            in_specs=[
                pl.BlockSpec((tm, K), lambda i, j: (i, 0)),
                pl.BlockSpec((K, tn), lambda i, j: (0, j)),
                pl.BlockSpec((1, tn), lambda i, j: (0, j)),
            ],
            out_specs=pl.BlockSpec((tm, tn), lambda i, j: (i, j)),
            compiler_params=pltpu.CompilerParams(
                dimension_semantics=("parallel", "parallel")),
            cost_estimate=cost,
        )(x, w, b)

    tk = _lane_tile(K)
    return pl.pallas_call(
        _linear_kernel_acc,
        out_shape=jax.ShapeDtypeStruct((M, N), out_dtype),
        grid=(M // tm, N // tn, K // tk),
        in_specs=[
            pl.BlockSpec((tm, tk), lambda i, j, k: (i, k)),
            pl.BlockSpec((tk, tn), lambda i, j, k: (k, j)),
            pl.BlockSpec((1, tn), lambda i, j, k: (0, j)),
        ],
        out_specs=pl.BlockSpec((tm, tn), lambda i, j, k: (i, j)),
        scratch_shapes=[pltpu.VMEM((tm, tn), jnp.float32)],
        compiler_params=pltpu.CompilerParams(
            dimension_semantics=("parallel", "parallel", "arbitrary")),
        cost_estimate=cost,
    )(x, w, b)


# -------------------- fused feed-forward + residual + LayerNorm --------------

def _ffn_add_ln_kernel(x_ref, w1_ref, b1_ref, w2_ref, b2_ref, g_ref, bln_ref, o_ref, *, eps):
    x = x_ref[...]                                                       # (tm, D) bf16
    h = jnp.dot(x, w1_ref[...], preferred_element_type=jnp.float32)
    h = jnp.maximum(h + b1_ref[...].astype(jnp.float32), 0.0).astype(x.dtype)
    f = jnp.dot(h, w2_ref[...], preferred_element_type=jnp.float32)
    z = f + b2_ref[...].astype(jnp.float32) + x.astype(jnp.float32)      # + residual
    mu = jnp.mean(z, axis=-1, keepdims=True)
    var = jnp.mean(jnp.square(z - mu), axis=-1, keepdims=True)
    y = (z - mu) * jax.lax.rsqrt(var + eps)
    o_ref[...] = (y * g_ref[...].astype(jnp.float32)
                  + bln_ref[...].astype(jnp.float32)).astype(o_ref.dtype)


def ffn_add_ln(x, w1, b1, w2, b2, gamma, beta, eps=1e-5):
    """LayerNorm(x + relu(x @ w1 + b1) @ w2 + b2), tiled over rows; weights VMEM-resident."""
    M, D = x.shape
    H = w1.shape[1]
    tm = _row_tile(M)
    # TODO(synk): for production-size d_model/ffn gate the resident-weight pattern on
    #             VMEM budget (v7x has 64 MiB) and fall back to a K/N-tiled accumulator.
    cost = pl.CostEstimate(
        flops=int(4 * M * D * H),
        transcendentals=0,
        bytes_accessed=int(2 * M * D * x.dtype.itemsize + 2 * D * H * w1.dtype.itemsize
                           + (H + 3 * D) * 4))
    return pl.pallas_call(
        functools.partial(_ffn_add_ln_kernel, eps=eps),
        out_shape=jax.ShapeDtypeStruct((M, D), x.dtype),
        grid=(M // tm,),
        in_specs=[
            pl.BlockSpec((tm, D), lambda i: (i, 0)),
            pl.BlockSpec((D, H), lambda i: (0, 0)),
            pl.BlockSpec((1, H), lambda i: (0, 0)),
            pl.BlockSpec((H, D), lambda i: (0, 0)),
            pl.BlockSpec((1, D), lambda i: (0, 0)),
            pl.BlockSpec((1, D), lambda i: (0, 0)),
            pl.BlockSpec((1, D), lambda i: (0, 0)),
        ],
        out_specs=pl.BlockSpec((tm, D), lambda i: (i, 0)),
        compiler_params=pltpu.CompilerParams(dimension_semantics=("parallel",)),
        cost_estimate=cost,
    )(x, w1, b1, w2, b2, gamma, beta)


# --------- fused self-attention block: QKV -> attn -> out-proj -> +res -> LN ---------

def _mha_self_ln_kernel(x_ref, wqkv_ref, bqkv_ref, wo_ref, bo_ref, bias_ref,
                        g_ref, bln_ref, o_ref, *, n_head, scale, causal, eps):
    x = x_ref[0]                                                   # (S, D) bf16
    S, D = x.shape
    Dh = D // n_head

    # Fused QKV projection (wide N=3*D matmul, bf16 operands, f32 accumulation).
    qkv = jnp.dot(x, wqkv_ref[...], preferred_element_type=jnp.float32)
    qkv = (qkv + bqkv_ref[...].astype(jnp.float32)).astype(x.dtype)  # (S, 3D) bf16

    bias = bias_ref[0]                                             # (S, S) f32, per-batch
    if causal:
        qi = jax.lax.broadcasted_iota(jnp.int32, bias.shape, 0)
        ki = jax.lax.broadcasted_iota(jnp.int32, bias.shape, 1)
        bias = jnp.where(ki <= qi, bias, -1e9)

    acc = jnp.zeros((S, D), jnp.float32)
    for h in range(n_head):                       # static unroll over heads (in-kernel split)
        q_h = qkv[:, h * Dh:(h + 1) * Dh]
        k_h = qkv[:, D + h * Dh:D + (h + 1) * Dh]
        v_h = qkv[:, 2 * D + h * Dh:2 * D + (h + 1) * Dh]
        s = jnp.einsum("qd,kd->qk", q_h, k_h,
                       preferred_element_type=jnp.float32) * scale + bias
        mx = jnp.max(s, axis=-1, keepdims=True)
        p = jnp.exp(s - mx)
        l = jnp.sum(p, axis=-1, keepdims=True)
        p = (p * pl.reciprocal(l, approx=True)).astype(x.dtype)     # bf16 probs for MXU
        o_h = jnp.dot(p, v_h, preferred_element_type=jnp.float32).astype(x.dtype)
        # Fold the output projection per head: sum_h o_h @ wo[h*Dh:(h+1)*Dh, :]
        acc = acc + jnp.dot(o_h, wo_ref[pl.ds(h * Dh, Dh), :],
                            preferred_element_type=jnp.float32)

    z = acc + bo_ref[...].astype(jnp.float32) + x.astype(jnp.float32)   # + residual
    mu = jnp.mean(z, axis=-1, keepdims=True)
    var = jnp.mean(jnp.square(z - mu), axis=-1, keepdims=True)
    y = (z - mu) * jax.lax.rsqrt(var + eps)
    o_ref[0] = (y * g_ref[...].astype(jnp.float32)
                + bln_ref[...].astype(jnp.float32)).astype(o_ref.dtype)


def mha_self_add_ln(x, p, bias, gamma, beta, *, n_head, causal, eps=1e-5):
    """LayerNorm(x + out_proj(MHA_self(x))), one batch element per grid step."""
    B, S, D = x.shape
    Dh = D // n_head
    cost = pl.CostEstimate(
        flops=int(B * (2 * S * D * 3 * D + 4 * S * S * D + 2 * S * D * D)),
        transcendentals=int(B * n_head * S * S),
        bytes_accessed=int(2 * B * S * D * x.dtype.itemsize + 4 * D * D * 2
                           + B * S * S * 4 + 6 * D * 4))
    kern = functools.partial(_mha_self_ln_kernel, n_head=n_head,
                             scale=1.0 / math.sqrt(Dh), causal=causal, eps=eps)
    return pl.pallas_call(
        kern,
        out_shape=jax.ShapeDtypeStruct((B, S, D), x.dtype),
        grid=(B,),
        in_specs=[
            pl.BlockSpec((1, S, D), lambda b: (b, 0, 0)),
            pl.BlockSpec((D, 3 * D), lambda b: (0, 0)),
            pl.BlockSpec((1, 3 * D), lambda b: (0, 0)),
            pl.BlockSpec((D, D), lambda b: (0, 0)),
            pl.BlockSpec((1, D), lambda b: (0, 0)),
            pl.BlockSpec((1, S, S), lambda b: (b, 0, 0)),
            pl.BlockSpec((1, D), lambda b: (0, 0)),
            pl.BlockSpec((1, D), lambda b: (0, 0)),
        ],
        out_specs=pl.BlockSpec((1, S, D), lambda b: (b, 0, 0)),
        compiler_params=pltpu.CompilerParams(dimension_semantics=("parallel",)),
        cost_estimate=cost,
    )(x, p["w_qkv"], p["b_qkv"], p["wo"], p["bo"], bias, gamma, beta)


# --------- fused cross-attention block: Q/KV -> attn -> out-proj -> +res -> LN --------

def _mha_cross_ln_kernel(y_ref, mem_ref, wq_ref, bq_ref, wkv_ref, bkv_ref, wo_ref, bo_ref,
                         bias_ref, g_ref, bln_ref, o_ref, *, n_head, scale, eps):
    y = y_ref[0]                                                   # (T, D) bf16
    mem = mem_ref[0]                                               # (S, D) bf16
    T, D = y.shape
    Dh = D // n_head

    q_all = jnp.dot(y, wq_ref[...], preferred_element_type=jnp.float32)
    q_all = (q_all + bq_ref[...].astype(jnp.float32)).astype(y.dtype)    # (T, D)
    kv = jnp.dot(mem, wkv_ref[...], preferred_element_type=jnp.float32)  # fused K/V proj
    kv = (kv + bkv_ref[...].astype(jnp.float32)).astype(y.dtype)         # (S, 2D)

    bias = bias_ref[0]                                             # (T, S) f32
    acc = jnp.zeros((T, D), jnp.float32)
    for h in range(n_head):
        q_h = q_all[:, h * Dh:(h + 1) * Dh]
        k_h = kv[:, h * Dh:(h + 1) * Dh]
        v_h = kv[:, D + h * Dh:D + (h + 1) * Dh]
        s = jnp.einsum("qd,kd->qk", q_h, k_h,
                       preferred_element_type=jnp.float32) * scale + bias
        mx = jnp.max(s, axis=-1, keepdims=True)
        p = jnp.exp(s - mx)
        l = jnp.sum(p, axis=-1, keepdims=True)
        p = (p * pl.reciprocal(l, approx=True)).astype(y.dtype)
        o_h = jnp.dot(p, v_h, preferred_element_type=jnp.float32).astype(y.dtype)
        acc = acc + jnp.dot(o_h, wo_ref[pl.ds(h * Dh, Dh), :],
                            preferred_element_type=jnp.float32)

    z = acc + bo_ref[...].astype(jnp.float32) + y.astype(jnp.float32)    # + residual
    mu = jnp.mean(z, axis=-1, keepdims=True)
    var = jnp.mean(jnp.square(z - mu), axis=-1, keepdims=True)
    yn = (z - mu) * jax.lax.rsqrt(var + eps)
    o_ref[0] = (yn * g_ref[...].astype(jnp.float32)
                + bln_ref[...].astype(jnp.float32)).astype(o_ref.dtype)


def mha_cross_add_ln(y, memory, p, bias, gamma, beta, *, n_head, eps=1e-5):
    """LayerNorm(y + out_proj(MHA_cross(y, memory))), one batch element per grid step."""
    B, T, D = y.shape
    S = memory.shape[1]
    Dh = D // n_head
    cost = pl.CostEstimate(
        flops=int(B * (2 * T * D * D + 2 * S * D * 2 * D + 4 * T * S * D + 2 * T * D * D)),
        transcendentals=int(B * n_head * T * S),
        bytes_accessed=int(B * (2 * T * D + S * D) * y.dtype.itemsize + 4 * D * D * 2
                           + B * T * S * 4 + 6 * D * 4))
    kern = functools.partial(_mha_cross_ln_kernel, n_head=n_head,
                             scale=1.0 / math.sqrt(Dh), eps=eps)
    return pl.pallas_call(
        kern,
        out_shape=jax.ShapeDtypeStruct((B, T, D), y.dtype),
        grid=(B,),
        in_specs=[
            pl.BlockSpec((1, T, D), lambda b: (b, 0, 0)),
            pl.BlockSpec((1, S, D), lambda b: (b, 0, 0)),
            pl.BlockSpec((D, D), lambda b: (0, 0)),
            pl.BlockSpec((1, D), lambda b: (0, 0)),
            pl.BlockSpec((D, 2 * D), lambda b: (0, 0)),
            pl.BlockSpec((1, 2 * D), lambda b: (0, 0)),
            pl.BlockSpec((D, D), lambda b: (0, 0)),
            pl.BlockSpec((1, D), lambda b: (0, 0)),
            pl.BlockSpec((1, T, S), lambda b: (b, 0, 0)),
            pl.BlockSpec((1, D), lambda b: (0, 0)),
            pl.BlockSpec((1, D), lambda b: (0, 0)),
        ],
        out_specs=pl.BlockSpec((1, T, D), lambda b: (b, 0, 0)),
        compiler_params=pltpu.CompilerParams(dimension_semantics=("parallel",)),
        cost_estimate=cost,
    )(y, memory, p["wq"], p["bq"], p["w_kv"], p["b_kv"], p["wo"], p["bo"], bias, gamma, beta)


# ------------------------------ model pieces ---------------------------------

def make_attn_bias(B, Sq, Sk, key_padding_mask=None, attn_mask=None):
    """Additive float bias (B, Sq, Sk). Non-zero key_padding_mask => ignore that key."""
    bias = jnp.zeros((B, Sq, Sk), jnp.float32)
    if key_padding_mask is not None:
        kpm = (key_padding_mask != 0).astype(jnp.float32)          # (B, Sk)
        bias = bias + kpm[:, None, :] * (-1e9)
    if attn_mask is not None:
        bias = bias + attn_mask[None, :, :].astype(jnp.float32)    # (Sq, Sk)
    return bias


def encoder_layer(x, p, n_head, self_bias):
    B, S, D = x.shape
    x = mha_self_add_ln(x, p["attn"], self_bias, p["ln1_g"], p["ln1_b"],
                        n_head=n_head, causal=False)
    x2 = ffn_add_ln(x.reshape(B * S, D), p["w1"], p["b1"], p["w2"], p["b2"],
                    p["ln2_g"], p["ln2_b"])
    return x2.reshape(B, S, D)


def decoder_layer(y, memory, p, n_head, self_bias, cross_bias):
    B, T, D = y.shape
    y = mha_self_add_ln(y, p["self_attn"], self_bias, p["ln1_g"], p["ln1_b"],
                        n_head=n_head, causal=True)
    y = mha_cross_add_ln(y, memory, p["cross_attn"], cross_bias, p["ln2_g"], p["ln2_b"],
                         n_head=n_head)
    y2 = ffn_add_ln(y.reshape(B * T, D), p["w1"], p["b1"], p["w2"], p["b2"],
                    p["ln3_g"], p["ln3_b"])
    return y2.reshape(B, T, D)


def transformer_forward(params, X, Y, *, n_head, vocab_size,
                        X_key_padding_mask=None, Y_key_padding_mask=None,
                        memory_key_padding_mask=None, src_atten_mask=None):
    """X: (B, S_src) int32 tokens; Y: (B, S_tgt) int32 tokens -> logits (B, S_tgt, vocab)."""
    B, S_src = X.shape
    _, S_tgt = Y.shape

    # Embedding lookups (glue: gather)
    x = jnp.take(params["enc_emb"], X, axis=0)   # (B, S_src, D) bf16
    y = jnp.take(params["dec_emb"], Y, axis=0)   # (B, S_tgt, D) bf16

    # Encoder (bias shared across heads -> (B, Sq, Sk) only)
    enc_bias = make_attn_bias(B, S_src, S_src,
                              key_padding_mask=X_key_padding_mask,
                              attn_mask=src_atten_mask)
    for lp in params["encoder"]:
        x = encoder_layer(x, lp, n_head, enc_bias)
    memory = x

    # Decoder: causal mask generated INSIDE the fused self-attention kernel (causal=True)
    dec_self_bias = make_attn_bias(B, S_tgt, S_tgt, key_padding_mask=Y_key_padding_mask)
    dec_cross_bias = make_attn_bias(B, S_tgt, S_src, key_padding_mask=memory_key_padding_mask)
    for lp in params["decoder"]:
        y = decoder_layer(y, memory, lp, n_head, dec_self_bias, dec_cross_bias)

    # Classifier: lane-padded weights, f32 logits, slice back to vocab_size.
    # Softmax defined in the module but not applied in forward -> raw logits.
    D = y.shape[-1]
    logits = linear(y.reshape(B * S_tgt, D), params["cls_w"], params["cls_b"],
                    out_dtype=jnp.float32)
    logits = logits[:, :vocab_size]
    return logits.reshape(B, S_tgt, vocab_size)


# ------------------------------ parameter init -------------------------------

def _dense(key, fan_in, fan_out):
    kw, kb = jax.random.split(key)
    w = (jax.random.normal(kw, (fan_in, fan_out), jnp.float32) * 0.02).astype(WDTYPE)
    b = jax.random.normal(kb, (1, fan_out), jnp.float32) * 0.01
    return w, b


def _mha_self_params(key, d_model):
    k1, k2 = jax.random.split(key)
    w_qkv, b_qkv = _dense(k1, d_model, 3 * d_model)   # fused QKV projection
    wo, bo = _dense(k2, d_model, d_model)
    return dict(w_qkv=w_qkv, b_qkv=b_qkv, wo=wo, bo=bo)


def _mha_cross_params(key, d_model):
    k1, k2, k3 = jax.random.split(key, 3)
    wq, bq = _dense(k1, d_model, d_model)
    w_kv, b_kv = _dense(k2, d_model, 2 * d_model)     # fused K/V projection
    wo, bo = _dense(k3, d_model, d_model)
    return dict(wq=wq, bq=bq, w_kv=w_kv, b_kv=b_kv, wo=wo, bo=bo)


def _ln(d_model):
    return jnp.ones((1, d_model), jnp.float32), jnp.zeros((1, d_model), jnp.float32)


def init_params(key, d_model, n_layers, ffn_hidden, vocab_size, enc_num_emb, dec_num_emb):
    keys = jax.random.split(key, 5)
    enc_emb = (jax.random.normal(keys[0], (enc_num_emb, d_model), jnp.float32) * 0.02).astype(WDTYPE)
    dec_emb = (jax.random.normal(keys[1], (dec_num_emb, d_model), jnp.float32) * 0.02).astype(WDTYPE)

    encoder = []
    for lk in jax.random.split(keys[2], n_layers):
        k1, k2, k3 = jax.random.split(lk, 3)
        w1, b1 = _dense(k2, d_model, ffn_hidden)
        w2, b2 = _dense(k3, ffn_hidden, d_model)
        g1, be1 = _ln(d_model)
        g2, be2 = _ln(d_model)
        encoder.append(dict(attn=_mha_self_params(k1, d_model),
                            w1=w1, b1=b1, w2=w2, b2=b2,
                            ln1_g=g1, ln1_b=be1, ln2_g=g2, ln2_b=be2))

    decoder = []
    for lk in jax.random.split(keys[3], n_layers):
        k1, k2, k3, k4 = jax.random.split(lk, 4)
        w1, b1 = _dense(k3, d_model, ffn_hidden)
        w2, b2 = _dense(k4, ffn_hidden, d_model)
        g1, be1 = _ln(d_model)
        g2, be2 = _ln(d_model)
        g3, be3 = _ln(d_model)
        decoder.append(dict(self_attn=_mha_self_params(k1, d_model),
                            cross_attn=_mha_cross_params(k2, d_model),
                            w1=w1, b1=b1, w2=w2, b2=b2,
                            ln1_g=g1, ln1_b=be1, ln2_g=g2, ln2_b=be2, ln3_g=g3, ln3_b=be3))

    # Classifier: pad output lanes to a multiple of 128 (lane-dense stores), slice later.
    vocab_pad = ((vocab_size + 127) // 128) * 128
    cls_w_raw, cls_b_raw = _dense(keys[4], d_model, vocab_size)
    cls_w = jnp.zeros((d_model, vocab_pad), WDTYPE).at[:, :vocab_size].set(cls_w_raw)
    cls_b = jnp.zeros((1, vocab_pad), jnp.float32).at[:, :vocab_size].set(cls_b_raw)

    return dict(enc_emb=enc_emb, dec_emb=dec_emb, encoder=encoder, decoder=decoder,
                cls_w=cls_w, cls_b=cls_b)


# ---------------------------------- main --------------------------------------

if __name__ == "__main__":
    # Small, forward-consistent shapes (lane dims kept at multiples of 128)
    d_model = 128            # = embedding_dim
    n_head = 4               # head_dim = 32
    n_layers = 2
    ffn_hidden = 256
    vocab_size = 50
    enc_num_embeddings = 40
    dec_num_embeddings = 45
    B = 2
    src_len = 16
    target_sequence_length = 8   # decoder length; causal mask generated in-kernel

    root = jax.random.PRNGKey(0)
    kp, kx, ky = jax.random.split(root, 3)

    params = init_params(kp, d_model, n_layers, ffn_hidden, vocab_size,
                         enc_num_embeddings, dec_num_embeddings)

    X = jax.random.randint(kx, (B, src_len), 0, enc_num_embeddings, dtype=jnp.int32)
    Y = jax.random.randint(ky, (B, target_sequence_length), 0, dec_num_embeddings, dtype=jnp.int32)

    # padding masks: non-zero => ignore that key position
    X_key_padding_mask = jnp.zeros((B, src_len), jnp.int32).at[:, -1].set(1)
    Y_key_padding_mask = jnp.zeros((B, target_sequence_length), jnp.int32)
    memory_key_padding_mask = X_key_padding_mask

    fwd = jax.jit(transformer_forward, static_argnames=("n_head", "vocab_size"))
    logits = fwd(params, X, Y,
                 n_head=n_head, vocab_size=vocab_size,
                 X_key_padding_mask=X_key_padding_mask,
                 Y_key_padding_mask=Y_key_padding_mask,
                 memory_key_padding_mask=memory_key_padding_mask,
                 src_atten_mask=None)
    jax.block_until_ready(logits)

    assert logits.shape == (B, target_sequence_length, vocab_size), logits.shape
    assert bool(jnp.all(jnp.isfinite(logits)))
    print("KERNEL_OK")
</pallas_src>

<mosaic_0001>
module attributes {stable_mosaic.version = 11 : i64} {
  func.func @_ffn_add_ln_kernel(%arg0: i32, %arg1: memref<16x128xbf16, #tpu.memory_space<vmem>>, %arg2: memref<128x256xbf16, #tpu.memory_space<vmem>>, %arg3: memref<1x256xf32, #tpu.memory_space<vmem>>, %arg4: memref<256x128xbf16, #tpu.memory_space<vmem>>, %arg5: memref<1x128xf32, #tpu.memory_space<vmem>>, %arg6: memref<1x128xf32, #tpu.memory_space<vmem>>, %arg7: memref<1x128xf32, #tpu.memory_space<vmem>>, %arg8: memref<16x128xbf16, #tpu.memory_space<vmem>>) attributes {dimension_semantics = [#tpu.dimension_semantics<parallel>], iteration_bounds = array<i64: 2>, scalar_prefetch = 0 : i64, scratch_operands = 0 : i64, tpu.core_type = #tpu.core_type<tc>, window_params = [{transform_indices = @transform_0, window_bounds = array<i64: 16, 128>}, {pipeline_mode = #tpu.pipeline_mode<synchronous>, transform_indices = @transform_1, window_bounds = array<i64: 128, 256>}, {pipeline_mode = #tpu.pipeline_mode<synchronous>, transform_indices = @transform_2, window_bounds = array<i64: 1, 256>}, {pipeline_mode = #tpu.pipeline_mode<synchronous>, transform_indices = @transform_3, window_bounds = array<i64: 256, 128>}, {pipeline_mode = #tpu.pipeline_mode<synchronous>, transform_indices = @transform_4, window_bounds = array<i64: 1, 128>}, {pipeline_mode = #tpu.pipeline_mode<synchronous>, transform_indices = @transform_5, window_bounds = array<i64: 1, 128>}, {pipeline_mode = #tpu.pipeline_mode<synchronous>, transform_indices = @transform_6, window_bounds = array<i64: 1, 128>}, {transform_indices = @transform_7, window_bounds = array<i64: 16, 128>}]} {
    %c0 = arith.constant 0 : index
    %c0_0 = arith.constant 0 : index
    %0 = vector.load %arg1[%c0, %c0_0] : memref<16x128xbf16, #tpu.memory_space<vmem>>, vector<16x128xbf16>
    %c0_1 = arith.constant 0 : index
    %c0_2 = arith.constant 0 : index
    %1 = vector.load %arg2[%c0_1, %c0_2] : memref<128x256xbf16, #tpu.memory_space<vmem>>, vector<128x256xbf16>
    %cst = arith.constant dense<0.000000e+00> : vector<16x256xf32>
    %2 = tpu.matmul %0, %1, %cst {dimension_numbers = #tpu.dot_dimension_numbers<[1], [0], [0], [1], [0, 0, 1, 1], [], []>} : vector<16x128xbf16>, vector<128x256xbf16>, vector<16x256xf32> -> vector<16x256xf32>
    %c0_3 = arith.constant 0 : index
    %c0_4 = arith.constant 0 : index
    %3 = vector.load %arg3[%c0_3, %c0_4] : memref<1x256xf32, #tpu.memory_space<vmem>>, vector<1x256xf32>
    %4 = vector.broadcast %3 : vector<1x256xf32> to vector<16x256xf32>
    %5 = arith.addf %2, %4 : vector<16x256xf32>
    %cst_5 = arith.constant 0.000000e+00 : f32
    %6 = vector.broadcast %cst_5 : f32 to vector<16x256xf32>
    %7 = arith.maximumf %5, %6 : vector<16x256xf32>
    %8 = arith.truncf %7 : vector<16x256xf32> to vector<16x256xbf16>
    %c0_6 = arith.constant 0 : index
    %c0_7 = arith.constant 0 : index
    %9 = vector.load %arg4[%c0_6, %c0_7] : memref<256x128xbf16, #tpu.memory_space<vmem>>, vector<256x128xbf16>
    %cst_8 = arith.constant dense<0.000000e+00> : vector<16x128xf32>
    %10 = tpu.matmul %8, %9, %cst_8 {dimension_numbers = #tpu.dot_dimension_numbers<[1], [0], [0], [1], [0, 0, 1, 1], [], []>} : vector<16x256xbf16>, vector<256x128xbf16>, vector<16x128xf32> -> vector<16x128xf32>
    %c0_9 = arith.constant 0 : index
    %c0_10 = arith.constant 0 : index
    %11 = vector.load %arg5[%c0_9, %c0_10] : memref<1x128xf32, #tpu.memory_space<vmem>>, vector<1x128xf32>
    %12 = vector.broadcast %11 : vector<1x128xf32> to vector<16x128xf32>
    %13 = arith.addf %10, %12 : vector<16x128xf32>
    %14 = arith.extf %0 : vector<16x128xbf16> to vector<16x128xf32>
    %15 = arith.addf %13, %14 : vector<16x128xf32>
    %cst_11 = arith.constant dense<0.000000e+00> : vector<16xf32>
    %16 = vector.multi_reduction <add>, %15, %cst_11 [1] : vector<16x128xf32> to vector<16xf32>
    %17 = vector.shape_cast %16 : vector<16xf32> to vector<16x1xf32>
    %cst_12 = arith.constant 1.280000e+02 : f32
    %18 = vector.broadcast %cst_12 : f32 to vector<16x1xf32>
    %19 = arith.divf %17, %18 : vector<16x1xf32>
    %20 = vector.broadcast %19 : vector<16x1xf32> to vector<16x128xf32>
    %21 = arith.subf %15, %20 : vector<16x128xf32>
    %22 = arith.mulf %21, %21 : vector<16x128xf32>
    %cst_13 = arith.constant dense<0.000000e+00> : vector<16xf32>
    %23 = vector.multi_reduction <add>, %22, %cst_13 [1] : vector<16x128xf32> to vector<16xf32>
    %24 = vector.shape_cast %23 : vector<16xf32> to vector<16x1xf32>
    %cst_14 = arith.constant 1.280000e+02 : f32
    %25 = vector.broadcast %cst_14 : f32 to vector<16x1xf32>
    %26 = arith.divf %24, %25 : vector<16x1xf32>
    %27 = vector.broadcast %19 : vector<16x1xf32> to vector<16x128xf32>
    %28 = arith.subf %15, %27 : vector<16x128xf32>
    %cst_15 = arith.constant 9.99999974E-6 : f32
    %29 = vector.broadcast %cst_15 : f32 to vector<16x1xf32>
    %30 = arith.addf %26, %29 : vector<16x1xf32>
    %31 = math.rsqrt %30 : vector<16x1xf32>
    %32 = vector.broadcast %31 : vector<16x1xf32> to vector<16x128xf32>
    %33 = arith.mulf %28, %32 : vector<16x128xf32>
    %c0_16 = arith.constant 0 : index
    %c0_17 = arith.constant 0 : index
    %34 = vector.load %arg6[%c0_16, %c0_17] : memref<1x128xf32, #tpu.memory_space<vmem>>, vector<1x128xf32>
    %35 = vector.broadcast %34 : vector<1x128xf32> to vector<16x128xf32>
    %36 = arith.mulf %33, %35 : vector<16x128xf32>
    %c0_18 = arith.constant 0 : index
    %c0_19 = arith.constant 0 : index
    %37 = vector.load %arg7[%c0_18, %c0_19] : memref<1x128xf32, #tpu.memory_space<vmem>>, vector<1x128xf32>
    %38 = vector.broadcast %37 : vector<1x128xf32> to vector<16x128xf32>
    %39 = arith.addf %36, %38 : vector<16x128xf32>
    %40 = arith.truncf %39 : vector<16x128xf32> to vector<16x128xbf16>
    %c0_20 = arith.constant 0 : index
    %c0_21 = arith.constant 0 : index
    %41 = vector.load %arg8[%c0_20, %c0_21] : memref<16x128xbf16, #tpu.memory_space<vmem>>, vector<16x128xbf16>
    tpu.vector_store %arg8[%c0_20, %c0_21], %40 {strides = array<i32>} : memref<16x128xbf16, #tpu.memory_space<vmem>>, vector<16x128xbf16>,
    return
  }
  func.func @transform_0(%arg0: i32) -> (i32, i32) {
    %c0_i32 = arith.constant 0 : i32
    %c0_i32_0 = arith.constant 0 : i32
    return %arg0, %c0_i32 : i32, i32
  }
  func.func @transform_1(%arg0: i32) -> (i32, i32) {
    %c0_i32 = arith.constant 0 : i32
    %c0_i32_0 = arith.constant 0 : i32
    %c0_i32_1 = arith.constant 0 : i32
    return %c0_i32, %c0_i32_0 : i32, i32
  }
  func.func @transform_2(%arg0: i32) -> (i32, i32) {
    %c0_i32 = arith.constant 0 : i32
    %c0_i32_0 = arith.constant 0 : i32
    %c0_i32_1 = arith.constant 0 : i32
    return %c0_i32, %c0_i32_0 : i32, i32
  }
  func.func @transform_3(%arg0: i32) -> (i32, i32) {
    %c0_i32 = arith.constant 0 : i32
    %c0_i32_0 = arith.constant 0 : i32
    %c0_i32_1 = arith.constant 0 : i32
    return %c0_i32, %c0_i32_0 : i32, i32
  }
  func.func @transform_4(%arg0: i32) -> (i32, i32) {
    %c0_i32 = arith.constant 0 : i32
    %c0_i32_0 = arith.constant 0 : i32
    %c0_i32_1 = arith.constant 0 : i32
    return %c0_i32, %c0_i32_0 : i32, i32
  }
  func.func @transform_5(%arg0: i32) -> (i32, i32) {
    %c0_i32 = arith.constant 0 : i32
    %c0_i32_0 = arith.constant 0 : i32
    %c0_i32_1 = arith.constant 0 : i32
    return %c0_i32, %c0_i32_0 : i32, i32
  }
  func.func @transform_6(%arg0: i32) -> (i32, i32) {
    %c0_i32 = arith.constant 0 : i32
    %c0_i32_0 = arith.constant 0 : i32
    %c0_i32_1 = arith.constant 0 : i32
    return %c0_i32, %c0_i32_0 : i32, i32
  }
  func.func @transform_7(%arg0: i32) -> (i32, i32) {
    %c0_i32 = arith.constant 0 : i32
    %c0_i32_0 = arith.constant 0 : i32
    return %arg0, %c0_i32 : i32, i32
  }
}

module attributes {stable_mosaic.version = 11 : i64} {
  func.func @_mha_self_ln_kernel(%arg0: i32, %arg1: memref<1x16x128xbf16, #tpu.memory_space<vmem>>, %arg2: memref<128x384xbf16, #tpu.memory_space<vmem>>, %arg3: memref<1x384xf32, #tpu.memory_space<vmem>>, %arg4: memref<128x128xbf16, #tpu.memory_space<vmem>>, %arg5: memref<1x128xf32, #tpu.memory_space<vmem>>, %arg6: memref<1x16x16xf32, #tpu.memory_space<vmem>>, %arg7: memref<1x128xf32, #tpu.memory_space<vmem>>, %arg8: memref<1x128xf32, #tpu.memory_space<vmem>>, %arg9: memref<1x16x128xbf16, #tpu.memory_space<vmem>>) attributes {dimension_semantics = [#tpu.dimension_semantics<parallel>], iteration_bounds = array<i64: 2>, scalar_prefetch = 0 : i64, scratch_operands = 0 : i64, tpu.core_type = #tpu.core_type<tc>, window_params = [{transform_indices = @transform_0, window_bounds = array<i64: 1, 16, 128>}, {pipeline_mode = #tpu.pipeline_mode<synchronous>, transform_indices = @transform_1, window_bounds = array<i64: 128, 384>}, {pipeline_mode = #tpu.pipeline_mode<synchronous>, transform_indices = @transform_2, window_bounds = array<i64: 1, 384>}, {pipeline_mode = #tpu.pipeline_mode<synchronous>, transform_indices = @transform_3, window_bounds = array<i64: 128, 128>}, {pipeline_mode = #tpu.pipeline_mode<synchronous>, transform_indices = @transform_4, window_bounds = array<i64: 1, 128>}, {transform_indices = @transform_5, window_bounds = array<i64: 1, 16, 16>}, {pipeline_mode = #tpu.pipeline_mode<synchronous>, transform_indices = @transform_6, window_bounds = array<i64: 1, 128>}, {pipeline_mode = #tpu.pipeline_mode<synchronous>, transform_indices = @transform_7, window_bounds = array<i64: 1, 128>}, {transform_indices = @transform_8, window_bounds = array<i64: 1, 16, 128>}]} {
    %c0 = arith.constant 0 : index
    %c0_0 = arith.constant 0 : index
    %c0_1 = arith.constant 0 : index
    %0 = vector.load %arg1[%c0, %c0_0, %c0_1] : memref<1x16x128xbf16, #tpu.memory_space<vmem>>, vector<1x16x128xbf16>
    %1 = vector.shape_cast %0 : vector<1x16x128xbf16> to vector<16x128xbf16>
    %c0_2 = arith.constant 0 : index
    %c0_3 = arith.constant 0 : index
    %2 = vector.load %arg2[%c0_2, %c0_3] : memref<128x384xbf16, #tpu.memory_space<vmem>>, vector<128x384xbf16>
    %cst = arith.constant dense<0.000000e+00> : vector<16x384xf32>
    %3 = tpu.matmul %1, %2, %cst {dimension_numbers = #tpu.dot_dimension_numbers<[1], [0], [0], [1], [0, 0, 1, 1], [], []>} : vector<16x128xbf16>, vector<128x384xbf16>, vector<16x384xf32> -> vector<16x384xf32>
    %c0_4 = arith.constant 0 : index
    %c0_5 = arith.constant 0 : index
    %4 = vector.load %arg3[%c0_4, %c0_5] : memref<1x384xf32, #tpu.memory_space<vmem>>, vector<1x384xf32>
    %5 = vector.broadcast %4 : vector<1x384xf32> to vector<16x384xf32>
    %6 = arith.addf %3, %5 : vector<16x384xf32>
    %7 = arith.truncf %6 : vector<16x384xf32> to vector<16x384xbf16>
    %c0_6 = arith.constant 0 : index
    %c0_7 = arith.constant 0 : index
    %c0_8 = arith.constant 0 : index
    %8 = vector.load %arg6[%c0_6, %c0_7, %c0_8] : memref<1x16x16xf32, #tpu.memory_space<vmem>>, vector<1x16x16xf32>
    %9 = vector.shape_cast %8 : vector<1x16x16xf32> to vector<16x16xf32>
    %cst_9 = arith.constant 0.000000e+00 : f32
    %10 = vector.broadcast %cst_9 : f32 to vector<16x128xf32>
    %11 = vector.extract_strided_slice %7 {offsets = [0, 0], sizes = [16, 32], strides = [1, 1]} : vector<16x384xbf16> to vector<16x32xbf16>
    %12 = vector.extract_strided_slice %7 {offsets = [0, 128], sizes = [16, 32], strides = [1, 1]} : vector<16x384xbf16> to vector<16x32xbf16>
    %13 = vector.extract_strided_slice %7 {offsets = [0, 256], sizes = [16, 32], strides = [1, 1]} : vector<16x384xbf16> to vector<16x32xbf16>
    "tpu.trace_start"() <{level = 10 : i32, message = "qd,kd->qk"}> : () -> ()
    %cst_10 = arith.constant dense<0.000000e+00> : vector<16x16xf32>
    %14 = tpu.matmul %11, %12, %cst_10 {dimension_numbers = #tpu.dot_dimension_numbers<[1], [1], [0], [0], [0, 0, 1, 0], [], []>} : vector<16x32xbf16>, vector<16x32xbf16>, vector<16x16xf32> -> vector<16x16xf32>
    "tpu.trace_stop"() : () -> ()
    %cst_11 = arith.constant 0.176776692 : f32
    %15 = vector.broadcast %cst_11 : f32 to vector<16x16xf32>
    %16 = arith.mulf %14, %15 : vector<16x16xf32>
    %17 = arith.addf %16, %9 : vector<16x16xf32>
    %cst_12 = arith.constant dense<0xFF800000> : vector<16xf32>
    %18 = vector.multi_reduction <maximumf>, %17, %cst_12 [1] : vector<16x16xf32> to vector<16xf32>
    %19 = vector.shape_cast %18 : vector<16xf32> to vector<16x1xf32>
    %20 = vector.broadcast %19 : vector<16x1xf32> to vector<16x16xf32>
    %21 = arith.subf %17, %20 : vector<16x16xf32>
    %22 = math.exp %21 : vector<16x16xf32>
    %cst_13 = arith.constant dense<0.000000e+00> : vector<16xf32>
    %23 = vector.multi_reduction <add>, %22, %cst_13 [1] : vector<16x16xf32> to vector<16xf32>
    %24 = vector.shape_cast %23 : vector<16xf32> to vector<16x1xf32>
    %25 = tpu.reciprocal %24 {approx = true} : vector<16x1xf32> -> vector<16x1xf32>
    %26 = vector.broadcast %25 : vector<16x1xf32> to vector<16x16xf32>
    %27 = arith.mulf %22, %26 : vector<16x16xf32>
    %28 = arith.truncf %27 : vector<16x16xf32> to vector<16x16xbf16>
    %cst_14 = arith.constant dense<0.000000e+00> : vector<16x32xf32>
    %29 = tpu.matmul %28, %13, %cst_14 {dimension_numbers = #tpu.dot_dimension_numbers<[1], [0], [0], [1], [0, 0, 1, 1], [], []>} : vector<16x16xbf16>, vector<16x32xbf16>, vector<16x32xf32> -> vector<16x32xf32>
    %30 = arith.truncf %29 : vector<16x32xf32> to vector<16x32xbf16>
    %c0_15 = arith.constant 0 : index
    %c0_16 = arith.constant 0 : index
    %31 = vector.load %arg4[%c0_15, %c0_16] : memref<128x128xbf16, #tpu.memory_space<vmem>>, vector<32x128xbf16>
    %cst_17 = arith.constant dense<0.000000e+00> : vector<16x128xf32>
    %32 = tpu.matmul %30, %31, %cst_17 {dimension_numbers = #tpu.dot_dimension_numbers<[1], [0], [0], [1], [0, 0, 1, 1], [], []>} : vector<16x32xbf16>, vector<32x128xbf16>, vector<16x128xf32> -> vector<16x128xf32>
    %33 = arith.addf %10, %32 : vector<16x128xf32>
    %34 = vector.extract_strided_slice %7 {offsets = [0, 32], sizes = [16, 32], strides = [1, 1]} : vector<16x384xbf16> to vector<16x32xbf16>
    %35 = vector.extract_strided_slice %7 {offsets = [0, 160], sizes = [16, 32], strides = [1, 1]} : vector<16x384xbf16> to vector<16x32xbf16>
    %36 = vector.extract_strided_slice %7 {offsets = [0, 288], sizes = [16, 32], strides = [1, 1]} : vector<16x384xbf16> to vector<16x32xbf16>
    "tpu.trace_start"() <{level = 10 : i32, message = "qd,kd->qk"}> : () -> ()
    %cst_18 = arith.constant dense<0.000000e+00> : vector<16x16xf32>
    %37 = tpu.matmul %34, %35, %cst_18 {dimension_numbers = #tpu.dot_dimension_numbers<[1], [1], [0], [0], [0, 0, 1, 0], [], []>} : vector<16x32xbf16>, vector<16x32xbf16>, vector<16x16xf32> -> vector<16x16xf32>
    "tpu.trace_stop"() : () -> ()
    %cst_19 = arith.constant 0.176776692 : f32
    %38 = vector.broadcast %cst_19 : f32 to vector<16x16xf32>
    %39 = arith.mulf %37, %38 : vector<16x16xf32>
    %40 = arith.addf %39, %9 : vector<16x16xf32>
    %cst_20 = arith.constant dense<0xFF800000> : vector<16xf32>
    %41 = vector.multi_reduction <maximumf>, %40, %cst_20 [1] : vector<16x16xf32> to vector<16xf32>
    %42 = vector.shape_cast %41 : vector<16xf32> to vector<16x1xf32>
    %43 = vector.broadcast %42 : vector<16x1xf32> to vector<16x16xf32>
    %44 = arith.subf %40, %43 : vector<16x16xf32>
    %45 = math.exp %44 : vector<16x16xf32>
    %cst_21 = arith.constant dense<0.000000e+00> : vector<16xf32>
    %46 = vector.multi_reduction <add>, %45, %cst_21 [1] : vector<16x16xf32> to vector<16xf32>
    %47 = vector.shape_cast %46 : vector<16xf32> to vector<16x1xf32>
    %48 = tpu.reciprocal %47 {approx = true} : vector<16x1xf32> -> vector<16x1xf32>
    %49 = vector.broadcast %48 : vector<16x1xf32> to vector<16x16xf32>
    %50 = arith.mulf %45, %49 : vector<16x16xf32>
    %51 = arith.truncf %50 : vector<16x16xf32> to vector<16x16xbf16>
    %cst_22 = arith.constant dense<0.000000e+00> : vector<16x32xf32>
    %52 = tpu.matmul %51, %36, %cst_22 {dimension_numbers = #tpu.dot_dimension_numbers<[1], [0], [0], [1], [0, 0, 1, 1], [], []>} : vector<16x16xbf16>, vector<16x32xbf16>, vector<16x32xf32> -> vector<16x32xf32>
    %53 = arith.truncf %52 : vector<16x32xf32> to vector<16x32xbf16>
    %c32 = arith.constant 32 : index
    %c0_23 = arith.constant 0 : index
    %54 = vector.load %arg4[%c32, %c0_23] : memref<128x128xbf16, #tpu.memory_space<vmem>>, vector<32x128xbf16>
    %cst_24 = arith.constant dense<0.000000e+00> : vector<16x128xf32>
    %55 = tpu.matmul %53, %54, %cst_24 {dimension_numbers = #tpu.dot_dimension_numbers<[1], [0], [0], [1], [0, 0, 1, 1], [], []>} : vector<16x32xbf16>, vector<32x128xbf16>, vector<16x128xf32> -> vector<16x128xf32>
    %56 = arith.addf %33, %55 : vector<16x128xf32>
    %57 = vector.extract_strided_slice %7 {offsets = [0, 64], sizes = [16, 32], strides = [1, 1]} : vector<16x384xbf16> to vector<16x32xbf16>
    %58 = vector.extract_strided_slice %7 {offsets = [0, 192], sizes = [16, 32], strides = [1, 1]} : vector<16x384xbf16> to vector<16x32xbf16>
    %59 = vector.extract_strided_slice %7 {offsets = [0, 320], sizes = [16, 32], strides = [1, 1]} : vector<16x384xbf16> to vector<16x32xbf16>
    "tpu.trace_start"() <{level = 10 : i32, message = "qd,kd->qk"}> : () -> ()
    %cst_25 = arith.constant dense<0.000000e+00> : vector<16x16xf32>
    %60 = tpu.matmul %57, %58, %cst_25 {dimension_numbers = #tpu.dot_dimension_numbers<[1], [1], [0], [0], [0, 0, 1, 0], [], []>} : vector<16x32xbf16>, vector<16x32xbf16>, vector<16x16xf32> -> vector<16x16xf32>
    "tpu.trace_stop"() : () -> ()
    %cst_26 = arith.constant 0.176776692 : f32
    %61 = vector.broadcast %cst_26 : f32 to vector<16x16xf32>
    %62 = arith.mulf %60, %61 : vector<16x16xf32>
    %63 = arith.addf %62, %9 : vector<16x16xf32>
    %cst_27 = arith.constant dense<0xFF800000> : vector<16xf32>
    %64 = vector.multi_reduction <maximumf>, %63, %cst_27 [1] : vector<16x16xf32> to vector<16xf32>
    %65 = vector.shape_cast %64 : vector<16xf32> to vector<16x1xf32>
    %66 = vector.broadcast %65 : vector<16x1xf32> to vector<16x16xf32>
    %67 = arith.subf %63, %66 : vector<16x16xf32>
    %68 = math.exp %67 : vector<16x16xf32>
    %cst_28 = arith.constant dense<0.000000e+00> : vector<16xf32>
    %69 = vector.multi_reduction <add>, %68, %cst_28 [1] : vector<16x16xf32> to vector<16xf32>
    %70 = vector.shape_cast %69 : vector<16xf32> to vector<16x1xf32>
    %71 = tpu.reciprocal %70 {approx = true} : vector<16x1xf32> -> vector<16x1xf32>
    %72 = vector.broadcast %71 : vector<16x1xf32> to vector<16x16xf32>
    %73 = arith.mulf %68, %72 : vector<16x16xf32>
    %74 = arith.truncf %73 : vector<16x16xf32> to vector<16x16xbf16>
    %cst_29 = arith.constant dense<0.000000e+00> : vector<16x32xf32>
    %75 = tpu.matmul %74, %59, %cst_29 {dimension_numbers = #tpu.dot_dimension_numbers<[1], [0], [0], [1], [0, 0, 1, 1], [], []>} : vector<16x16xbf16>, vector<16x32xbf16>, vector<16x32xf32> -> vector<16x32xf32>
    %76 = arith.truncf %75 : vector<16x32xf32> to vector<16x32xbf16>
    %c64 = arith.constant 64 : index
    %c0_30 = arith.constant 0 : index
    %77 = vector.load %arg4[%c64, %c0_30] : memref<128x128xbf16, #tpu.memory_space<vmem>>, vector<32x128xbf16>
    %cst_31 = arith.constant dense<0.000000e+00> : vector<16x128xf32>
    %78 = tpu.matmul %76, %77, %cst_31 {dimension_numbers = #tpu.dot_dimension_numbers<[1], [0], [0], [1], [0, 0, 1, 1], [], []>} : vector<16x32xbf16>, vector<32x128xbf16>, vector<16x128xf32> -> vector<16x128xf32>
    %79 = arith.addf %56, %78 : vector<16x128xf32>
    %80 = vector.extract_strided_slice %7 {offsets = [0, 96], sizes = [16, 32], strides = [1, 1]} : vector<16x384xbf16> to vector<16x32xbf16>
    %81 = vector.extract_strided_slice %7 {offsets = [0, 224], sizes = [16, 32], strides = [1, 1]} : vector<16x384xbf16> to vector<16x32xbf16>
    %82 = vector.extract_strided_slice %7 {offsets = [0, 352], sizes = [16, 32], strides = [1, 1]} : vector<16x384xbf16> to vector<16x32xbf16>
    "tpu.trace_start"() <{level = 10 : i32, message = "qd,kd->qk"}> : () -> ()
    %cst_32 = arith.constant dense<0.000000e+00> : vector<16x16xf32>
    %83 = tpu.matmul %80, %81, %cst_32 {dimension_numbers = #tpu.dot_dimension_numbers<[1], [1], [0], [0], [0, 0, 1, 0], [], []>} : vector<16x32xbf16>, vector<16x32xbf16>, vector<16x16xf32> -> vector<16x16xf32>
    "tpu.trace_stop"() : () -> ()
    %cst_33 = arith.constant 0.176776692 : f32
    %84 = vector.broadcast %cst_33 : f32 to vector<16x16xf32>
    %85 = arith.mulf %83, %84 : vector<16x16xf32>
    %86 = arith.addf %85, %9 : vector<16x16xf32>
    %cst_34 = arith.constant dense<0xFF800000> : vector<16xf32>
    %87 = vector.multi_reduction <maximumf>, %86, %cst_34 [1] : vector<16x16xf32> to vector<16xf32>
    %88 = vector.shape_cast %87 : vector<16xf32> to vector<16x1xf32>
    %89 = vector.broadcast %88 : vector<16x1xf32> to vector<16x16xf32>
    %90 = arith.subf %86, %89 : vector<16x16xf32>
    %91 = math.exp %90 : vector<16x16xf32>
    %cst_35 = arith.constant dense<0.000000e+00> : vector<16xf32>
    %92 = vector.multi_reduction <add>, %91, %cst_35 [1] : vector<16x16xf32> to vector<16xf32>
    %93 = vector.shape_cast %92 : vector<16xf32> to vector<16x1xf32>
    %94 = tpu.reciprocal %93 {approx = true} : vector<16x1xf32> -> vector<16x1xf32>
    %95 = vector.broadcast %94 : vector<16x1xf32> to vector<16x16xf32>
    %96 = arith.mulf %91, %95 : vector<16x16xf32>
    %97 = arith.truncf %96 : vector<16x16xf32> to vector<16x16xbf16>
    %cst_36 = arith.constant dense<0.000000e+00> : vector<16x32xf32>
    %98 = tpu.matmul %97, %82, %cst_36 {dimension_numbers = #tpu.dot_dimension_numbers<[1], [0], [0], [1], [0, 0, 1, 1], [], []>} : vector<16x16xbf16>, vector<16x32xbf16>, vector<16x32xf32> -> vector<16x32xf32>
    %99 = arith.truncf %98 : vector<16x32xf32> to vector<16x32xbf16>
    %c96 = arith.constant 96 : index
    %c0_37 = arith.constant 0 : index
    %100 = vector.load %arg4[%c96, %c0_37] : memref<128x128xbf16, #tpu.memory_space<vmem>>, vector<32x128xbf16>
    %cst_38 = arith.constant dense<0.000000e+00> : vector<16x128xf32>
    %101 = tpu.matmul %99, %100, %cst_38 {dimension_numbers = #tpu.dot_dimension_numbers<[1], [0], [0], [1], [0, 0, 1, 1], [], []>} : vector<16x32xbf16>, vector<32x128xbf16>, vector<16x128xf32> -> vector<16x128xf32>
    %102 = arith.addf %79, %101 : vector<16x128xf32>
    %c0_39 = arith.constant 0 : index
    %c0_40 = arith.constant 0 : index
    %103 = vector.load %arg5[%c0_39, %c0_40] : memref<1x128xf32, #tpu.memory_space<vmem>>, vector<1x128xf32>
    %104 = vector.broadcast %103 : vector<1x128xf32> to vector<16x128xf32>
    %105 = arith.addf %102, %104 : vector<16x128xf32>
    %106 = arith.extf %1 : vector<16x128xbf16> to vector<16x128xf32>
    %107 = arith.addf %105, %106 : vector<16x128xf32>
    %cst_41 = arith.constant dense<0.000000e+00> : vector<16xf32>
    %108 = vector.multi_reduction <add>, %107, %cst_41 [1] : vector<16x128xf32> to vector<16xf32>
    %109 = vector.shape_cast %108 : vector<16xf32> to vector<16x1xf32>
    %cst_42 = arith.constant 1.280000e+02 : f32
    %110 = vector.broadcast %cst_42 : f32 to vector<16x1xf32>
    %111 = arith.divf %109, %110 : vector<16x1xf32>
    %112 = vector.broadcast %111 : vector<16x1xf32> to vector<16x128xf32>
    %113 = arith.subf %107, %112 : vector<16x128xf32>
    %114 = arith.mulf %113, %113 : vector<16x128xf32>
    %cst_43 = arith.constant dense<0.000000e+00> : vector<16xf32>
    %115 = vector.multi_reduction <add>, %114, %cst_43 [1] : vector<16x128xf32> to vector<16xf32>
    %116 = vector.shape_cast %115 : vector<16xf32> to vector<16x1xf32>
    %cst_44 = arith.constant 1.280000e+02 : f32
    %117 = vector.broadcast %cst_44 : f32 to vector<16x1xf32>
    %118 = arith.divf %116, %117 : vector<16x1xf32>
    %119 = vector.broadcast %111 : vector<16x1xf32> to vector<16x128xf32>
    %120 = arith.subf %107, %119 : vector<16x128xf32>
    %cst_45 = arith.constant 9.99999974E-6 : f32
    %121 = vector.broadcast %cst_45 : f32 to vector<16x1xf32>
    %122 = arith.addf %118, %121 : vector<16x1xf32>
    %123 = math.rsqrt %122 : vector<16x1xf32>
    %124 = vector.broadcast %123 : vector<16x1xf32> to vector<16x128xf32>
    %125 = arith.mulf %120, %124 : vector<16x128xf32>
    %c0_46 = arith.constant 0 : index
    %c0_47 = arith.constant 0 : index
    %126 = vector.load %arg7[%c0_46, %c0_47] : memref<1x128xf32, #tpu.memory_space<vmem>>, vector<1x128xf32>
    %127 = vector.broadcast %126 : vector<1x128xf32> to vector<16x128xf32>
    %128 = arith.mulf %125, %127 : vector<16x128xf32>
    %c0_48 = arith.constant 0 : index
    %c0_49 = arith.constant 0 : index
    %129 = vector.load %arg8[%c0_48, %c0_49] : memref<1x128xf32, #tpu.memory_space<vmem>>, vector<1x128xf32>
    %130 = vector.broadcast %129 : vector<1x128xf32> to vector<16x128xf32>
    %131 = arith.addf %128, %130 : vector<16x128xf32>
    %132 = arith.truncf %131 : vector<16x128xf32> to vector<16x128xbf16>
    %c0_50 = arith.constant 0 : index
    %c0_51 = arith.constant 0 : index
    %c0_52 = arith.constant 0 : index
    %133 = vector.load %arg9[%c0_50, %c0_51, %c0_52] : memref<1x16x128xbf16, #tpu.memory_space<vmem>>, vector<1x16x128xbf16>
    %134 = vector.shape_cast %133 : vector<1x16x128xbf16> to vector<16x128xbf16>
    %135 = vector.shape_cast %132 : vector<16x128xbf16> to vector<1x16x128xbf16>
    tpu.vector_store %arg9[%c0_50, %c0_51, %c0_52], %135 {strides = array<i32>} : memref<1x16x128xbf16, #tpu.memory_space<vmem>>, vector<1x16x128xbf16>,
    return
  }
  func.func @transform_0(%arg0: i32) -> (i32, i32, i32) {
    %c0_i32 = arith.constant 0 : i32
    %c0_i32_0 = arith.constant 0 : i32
    %c0_i32_1 = arith.constant 0 : i32
    return %arg0, %c0_i32, %c0_i32_0 : i32, i32, i32
  }
  func.func @transform_1(%arg0: i32) -> (i32, i32) {
    %c0_i32 = arith.constant 0 : i32
    %c0_i32_0 = arith.constant 0 : i32
    %c0_i32_1 = arith.constant 0 : i32
    return %c0_i32, %c0_i32_0 : i32, i32
  }
  func.func @transform_2(%arg0: i32) -> (i32, i32) {
    %c0_i32 = arith.constant 0 : i32
    %c0_i32_0 = arith.constant 0 : i32
    %c0_i32_1 = arith.constant 0 : i32
    return %c0_i32, %c0_i32_0 : i32, i32
  }
  func.func @transform_3(%arg0: i32) -> (i32, i32) {
    %c0_i32 = arith.constant 0 : i32
    %c0_i32_0 = arith.constant 0 : i32
    %c0_i32_1 = arith.constant 0 : i32
    return %c0_i32, %c0_i32_0 : i32, i32
  }
  func.func @transform_4(%arg0: i32) -> (i32, i32) {
    %c0_i32 = arith.constant 0 : i32
    %c0_i32_0 = arith.constant 0 : i32
    %c0_i32_1 = arith.constant 0 : i32
    return %c0_i32, %c0_i32_0 : i32, i32
  }
  func.func @transform_5(%arg0: i32) -> (i32, i32, i32) {
    %c0_i32 = arith.constant 0 : i32
    %c0_i32_0 = arith.constant 0 : i32
    %c0_i32_1 = arith.constant 0 : i32
    return %arg0, %c0_i32, %c0_i32_0 : i32, i32, i32
  }
  func.func @transform_6(%arg0: i32) -> (i32, i32) {
    %c0_i32 = arith.constant 0 : i32
    %c0_i32_0 = arith.constant 0 : i32
    %c0_i32_1 = arith.constant 0 : i32
    return %c0_i32, %c0_i32_0 : i32, i32
  }
  func.func @transform_7(%arg0: i32) -> (i32, i32) {
    %c0_i32 = arith.constant 0 : i32
    %c0_i32_0 = arith.constant 0 : i32
    %c0_i32_1 = arith.constant 0 : i32
    return %c0_i32, %c0_i32_0 : i32, i32
  }
  func.func @transform_8(%arg0: i32) -> (i32, i32, i32) {
    %c0_i32 = arith.constant 0 : i32
    %c0_i32_0 = arith.constant 0 : i32
    %c0_i32_1 = arith.constant 0 : i32
    return %arg0, %c0_i32, %c0_i32_0 : i32, i32, i32
  }
}

module attributes {stable_mosaic.version = 11 : i64} {
  func.func @_mha_self_ln_kernel(%arg0: i32, %arg1: memref<1x8x128xbf16, #tpu.memory_space<vmem>>, %arg2: memref<128x384xbf16, #tpu.memory_space<vmem>>, %arg3: memref<1x384xf32, #tpu.memory_space<vmem>>, %arg4: memref<128x128xbf16, #tpu.memory_space<vmem>>, %arg5: memref<1x128xf32, #tpu.memory_space<vmem>>, %arg6: memref<1x8x8xf32, #tpu.memory_space<vmem>>, %arg7: memref<1x128xf32, #tpu.memory_space<vmem>>, %arg8: memref<1x128xf32, #tpu.memory_space<vmem>>, %arg9: memref<1x8x128xbf16, #tpu.memory_space<vmem>>) attributes {dimension_semantics = [#tpu.dimension_semantics<parallel>], iteration_bounds = array<i64: 2>, scalar_prefetch = 0 : i64, scratch_operands = 0 : i64, tpu.core_type = #tpu.core_type<tc>, window_params = [{transform_indices = @transform_0, window_bounds = array<i64: 1, 8, 128>}, {pipeline_mode = #tpu.pipeline_mode<synchronous>, transform_indices = @transform_1, window_bounds = array<i64: 128, 384>}, {pipeline_mode = #tpu.pipeline_mode<synchronous>, transform_indices = @transform_2, window_bounds = array<i64: 1, 384>}, {pipeline_mode = #tpu.pipeline_mode<synchronous>, transform_indices = @transform_3, window_bounds = array<i64: 128, 128>}, {pipeline_mode = #tpu.pipeline_mode<synchronous>, transform_indices = @transform_4, window_bounds = array<i64: 1, 128>}, {transform_indices = @transform_5, window_bounds = array<i64: 1, 8, 8>}, {pipeline_mode = #tpu.pipeline_mode<synchronous>, transform_indices = @transform_6, window_bounds = array<i64: 1, 128>}, {pipeline_mode = #tpu.pipeline_mode<synchronous>, transform_indices = @transform_7, window_bounds = array<i64: 1, 128>}, {transform_indices = @transform_8, window_bounds = array<i64: 1, 8, 128>}]} {
    %c0 = arith.constant 0 : index
    %c0_0 = arith.constant 0 : index
    %c0_1 = arith.constant 0 : index
    %0 = vector.load %arg1[%c0, %c0_0, %c0_1] : memref<1x8x128xbf16, #tpu.memory_space<vmem>>, vector<1x8x128xbf16>
    %1 = vector.shape_cast %0 : vector<1x8x128xbf16> to vector<8x128xbf16>
    %c0_2 = arith.constant 0 : index
    %c0_3 = arith.constant 0 : index
    %2 = vector.load %arg2[%c0_2, %c0_3] : memref<128x384xbf16, #tpu.memory_space<vmem>>, vector<128x384xbf16>
    %cst = arith.constant dense<0.000000e+00> : vector<8x384xf32>
    %3 = tpu.matmul %1, %2, %cst {dimension_numbers = #tpu.dot_dimension_numbers<[1], [0], [0], [1], [0, 0, 1, 1], [], []>} : vector<8x128xbf16>, vector<128x384xbf16>, vector<8x384xf32> -> vector<8x384xf32>
    %c0_4 = arith.constant 0 : index
    %c0_5 = arith.constant 0 : index
    %4 = vector.load %arg3[%c0_4, %c0_5] : memref<1x384xf32, #tpu.memory_space<vmem>>, vector<1x384xf32>
    %5 = vector.broadcast %4 : vector<1x384xf32> to vector<8x384xf32>
    %6 = arith.addf %3, %5 : vector<8x384xf32>
    %7 = arith.truncf %6 : vector<8x384xf32> to vector<8x384xbf16>
    %c0_6 = arith.constant 0 : index
    %c0_7 = arith.constant 0 : index
    %c0_8 = arith.constant 0 : index
    %8 = vector.load %arg6[%c0_6, %c0_7, %c0_8] : memref<1x8x8xf32, #tpu.memory_space<vmem>>, vector<1x8x8xf32>
    %9 = vector.shape_cast %8 : vector<1x8x8xf32> to vector<8x8xf32>
    %10 = tpu.iota {dimensions = array<i32: 0>} : vector<8x8xi32>
    %11 = tpu.iota {dimensions = array<i32: 1>} : vector<8x8xi32>
    %12 = arith.cmpi sle, %11, %10 : vector<8x8xi32>
    %cst_9 = arith.constant -1.000000e+09 : f32
    %13 = vector.broadcast %cst_9 : f32 to vector<8x8xf32>
    %14 = arith.select %12, %9, %13 : vector<8x8xi1>, vector<8x8xf32>
    %cst_10 = arith.constant 0.000000e+00 : f32
    %15 = vector.broadcast %cst_10 : f32 to vector<8x128xf32>
    %16 = vector.extract_strided_slice %7 {offsets = [0, 0], sizes = [8, 32], strides = [1, 1]} : vector<8x384xbf16> to vector<8x32xbf16>
    %17 = vector.extract_strided_slice %7 {offsets = [0, 128], sizes = [8, 32], strides = [1, 1]} : vector<8x384xbf16> to vector<8x32xbf16>
    %18 = vector.extract_strided_slice %7 {offsets = [0, 256], sizes = [8, 32], strides = [1, 1]} : vector<8x384xbf16> to vector<8x32xbf16>
    "tpu.trace_start"() <{level = 10 : i32, message = "qd,kd->qk"}> : () -> ()
    %cst_11 = arith.constant dense<0.000000e+00> : vector<8x8xf32>
    %19 = tpu.matmul %16, %17, %cst_11 {dimension_numbers = #tpu.dot_dimension_numbers<[1], [1], [0], [0], [0, 0, 1, 0], [], []>} : vector<8x32xbf16>, vector<8x32xbf16>, vector<8x8xf32> -> vector<8x8xf32>
    "tpu.trace_stop"() : () -> ()
    %cst_12 = arith.constant 0.176776692 : f32
    %20 = vector.broadcast %cst_12 : f32 to vector<8x8xf32>
    %21 = arith.mulf %19, %20 : vector<8x8xf32>
    %22 = arith.addf %21, %14 : vector<8x8xf32>
    %cst_13 = arith.constant dense<0xFF800000> : vector<8xf32>
    %23 = vector.multi_reduction <maximumf>, %22, %cst_13 [1] : vector<8x8xf32> to vector<8xf32>
    %24 = vector.shape_cast %23 : vector<8xf32> to vector<8x1xf32>
    %25 = vector.broadcast %24 : vector<8x1xf32> to vector<8x8xf32>
    %26 = arith.subf %22, %25 : vector<8x8xf32>
    %27 = math.exp %26 : vector<8x8xf32>
    %cst_14 = arith.constant dense<0.000000e+00> : vector<8xf32>
    %28 = vector.multi_reduction <add>, %27, %cst_14 [1] : vector<8x8xf32> to vector<8xf32>
    %29 = vector.shape_cast %28 : vector<8xf32> to vector<8x1xf32>
    %30 = tpu.reciprocal %29 {approx = true} : vector<8x1xf32> -> vector<8x1xf32>
    %31 = vector.broadcast %30 : vector<8x1xf32> to vector<8x8xf32>
    %32 = arith.mulf %27, %31 : vector<8x8xf32>
    %33 = arith.truncf %32 : vector<8x8xf32> to vector<8x8xbf16>
    %cst_15 = arith.constant dense<0.000000e+00> : vector<8x32xf32>
    %34 = tpu.matmul %33, %18, %cst_15 {dimension_numbers = #tpu.dot_dimension_numbers<[1], [0], [0], [1], [0, 0, 1, 1], [], []>} : vector<8x8xbf16>, vector<8x32xbf16>, vector<8x32xf32> -> vector<8x32xf32>
    %35 = arith.truncf %34 : vector<8x32xf32> to vector<8x32xbf16>
    %c0_16 = arith.constant 0 : index
    %c0_17 = arith.constant 0 : index
    %36 = vector.load %arg4[%c0_16, %c0_17] : memref<128x128xbf16, #tpu.memory_space<vmem>>, vector<32x128xbf16>
    %cst_18 = arith.constant dense<0.000000e+00> : vector<8x128xf32>
    %37 = tpu.matmul %35, %36, %cst_18 {dimension_numbers = #tpu.dot_dimension_numbers<[1], [0], [0], [1], [0, 0, 1, 1], [], []>} : vector<8x32xbf16>, vector<32x128xbf16>, vector<8x128xf32> -> vector<8x128xf32>
    %38 = arith.addf %15, %37 : vector<8x128xf32>
    %39 = vector.extract_strided_slice %7 {offsets = [0, 32], sizes = [8, 32], strides = [1, 1]} : vector<8x384xbf16> to vector<8x32xbf16>
    %40 = vector.extract_strided_slice %7 {offsets = [0, 160], sizes = [8, 32], strides = [1, 1]} : vector<8x384xbf16> to vector<8x32xbf16>
    %41 = vector.extract_strided_slice %7 {offsets = [0, 288], sizes = [8, 32], strides = [1, 1]} : vector<8x384xbf16> to vector<8x32xbf16>
    "tpu.trace_start"() <{level = 10 : i32, message = "qd,kd->qk"}> : () -> ()
    %cst_19 = arith.constant dense<0.000000e+00> : vector<8x8xf32>
    %42 = tpu.matmul %39, %40, %cst_19 {dimension_numbers = #tpu.dot_dimension_numbers<[1], [1], [0], [0], [0, 0, 1, 0], [], []>} : vector<8x32xbf16>, vector<8x32xbf16>, vector<8x8xf32> -> vector<8x8xf32>
    "tpu.trace_stop"() : () -> ()
    %cst_20 = arith.constant 0.176776692 : f32
    %43 = vector.broadcast %cst_20 : f32 to vector<8x8xf32>
    %44 = arith.mulf %42, %43 : vector<8x8xf32>
    %45 = arith.addf %44, %14 : vector<8x8xf32>
    %cst_21 = arith.constant dense<0xFF800000> : vector<8xf32>
    %46 = vector.multi_reduction <maximumf>, %45, %cst_21 [1] : vector<8x8xf32> to vector<8xf32>
    %47 = vector.shape_cast %46 : vector<8xf32> to vector<8x1xf32>
    %48 = vector.broadcast %47 : vector<8x1xf32> to vector<8x8xf32>
    %49 = arith.subf %45, %48 : vector<8x8xf32>
    %50 = math.exp %49 : vector<8x8xf32>
    %cst_22 = arith.constant dense<0.000000e+00> : vector<8xf32>
    %51 = vector.multi_reduction <add>, %50, %cst_22 [1] : vector<8x8xf32> to vector<8xf32>
    %52 = vector.shape_cast %51 : vector<8xf32> to vector<8x1xf32>
    %53 = tpu.reciprocal %52 {approx = true} : vector<8x1xf32> -> vector<8x1xf32>
    %54 = vector.broadcast %53 : vector<8x1xf32> to vector<8x8xf32>
    %55 = arith.mulf %50, %54 : vector<8x8xf32>
    %56 = arith.truncf %55 : vector<8x8xf32> to vector<8x8xbf16>
    %cst_23 = arith.constant dense<0.000000e+00> : vector<8x32xf32>
    %57 = tpu.matmul %56, %41, %cst_23 {dimension_numbers = #tpu.dot_dimension_numbers<[1], [0], [0], [1], [0, 0, 1, 1], [], []>} : vector<8x8xbf16>, vector<8x32xbf16>, vector<8x32xf32> -> vector<8x32xf32>
    %58 = arith.truncf %57 : vector<8x32xf32> to vector<8x32xbf16>
    %c32 = arith.constant 32 : index
    %c0_24 = arith.constant 0 : index
    %59 = vector.load %arg4[%c32, %c0_24] : memref<128x128xbf16, #tpu.memory_space<vmem>>, vector<32x128xbf16>
    %cst_25 = arith.constant dense<0.000000e+00> : vector<8x128xf32>
    %60 = tpu.matmul %58, %59, %cst_25 {dimension_numbers = #tpu.dot_dimension_numbers<[1], [0], [0], [1], [0, 0, 1, 1], [], []>} : vector<8x32xbf16>, vector<32x128xbf16>, vector<8x128xf32> -> vector<8x128xf32>
    %61 = arith.addf %38, %60 : vector<8x128xf32>
    %62 = vector.extract_strided_slice %7 {offsets = [0, 64], sizes = [8, 32], strides = [1, 1]} : vector<8x384xbf16> to vector<8x32xbf16>
    %63 = vector.extract_strided_slice %7 {offsets = [0, 192], sizes = [8, 32], strides = [1, 1]} : vector<8x384xbf16> to vector<8x32xbf16>
    %64 = vector.extract_strided_slice %7 {offsets = [0, 320], sizes = [8, 32], strides = [1, 1]} : vector<8x384xbf16> to vector<8x32xbf16>
    "tpu.trace_start"() <{level = 10 : i32, message = "qd,kd->qk"}> : () -> ()
    %cst_26 = arith.constant dense<0.000000e+00> : vector<8x8xf32>
    %65 = tpu.matmul %62, %63, %cst_26 {dimension_numbers = #tpu.dot_dimension_numbers<[1], [1], [0], [0], [0, 0, 1, 0], [], []>} : vector<8x32xbf16>, vector<8x32xbf16>, vector<8x8xf32> -> vector<8x8xf32>
    "tpu.trace_stop"() : () -> ()
    %cst_27 = arith.constant 0.176776692 : f32
    %66 = vector.broadcast %cst_27 : f32 to vector<8x8xf32>
    %67 = arith.mulf %65, %66 : vector<8x8xf32>
    %68 = arith.addf %67, %14 : vector<8x8xf32>
    %cst_28 = arith.constant dense<0xFF800000> : vector<8xf32>
    %69 = vector.multi_reduction <maximumf>, %68, %cst_28 [1] : vector<8x8xf32> to vector<8xf32>
    %70 = vector.shape_cast %69 : vector<8xf32> to vector<8x1xf32>
    %71 = vector.broadcast %70 : vector<8x1xf32> to vector<8x8xf32>
    %72 = arith.subf %68, %71 : vector<8x8xf32>
    %73 = math.exp %72 : vector<8x8xf32>
    %cst_29 = arith.constant dense<0.000000e+00> : vector<8xf32>
    %74 = vector.multi_reduction <add>, %73, %cst_29 [1] : vector<8x8xf32> to vector<8xf32>
    %75 = vector.shape_cast %74 : vector<8xf32> to vector<8x1xf32>
    %76 = tpu.reciprocal %75 {approx = true} : vector<8x1xf32> -> vector<8x1xf32>
    %77 = vector.broadcast %76 : vector<8x1xf32> to vector<8x8xf32>
    %78 = arith.mulf %73, %77 : vector<8x8xf32>
    %79 = arith.truncf %78 : vector<8x8xf32> to vector<8x8xbf16>
    %cst_30 = arith.constant dense<0.000000e+00> : vector<8x32xf32>
    %80 = tpu.matmul %79, %64, %cst_30 {dimension_numbers = #tpu.dot_dimension_numbers<[1], [0], [0], [1], [0, 0, 1, 1], [], []>} : vector<8x8xbf16>, vector<8x32xbf16>, vector<8x32xf32> -> vector<8x32xf32>
    %81 = arith.truncf %80 : vector<8x32xf32> to vector<8x32xbf16>
    %c64 = arith.constant 64 : index
    %c0_31 = arith.constant 0 : index
    %82 = vector.load %arg4[%c64, %c0_31] : memref<128x128xbf16, #tpu.memory_space<vmem>>, vector<32x128xbf16>
    %cst_32 = arith.constant dense<0.000000e+00> : vector<8x128xf32>
    %83 = tpu.matmul %81, %82, %cst_32 {dimension_numbers = #tpu.dot_dimension_numbers<[1], [0], [0], [1], [0, 0, 1, 1], [], []>} : vector<8x32xbf16>, vector<32x128xbf16>, vector<8x128xf32> -> vector<8x128xf32>
    %84 = arith.addf %61, %83 : vector<8x128xf32>
    %85 = vector.extract_strided_slice %7 {offsets = [0, 96], sizes = [8, 32], strides = [1, 1]} : vector<8x384xbf16> to vector<8x32xbf16>
    %86 = vector.extract_strided_slice %7 {offsets = [0, 224], sizes = [8, 32], strides = [1, 1]} : vector<8x384xbf16> to vector<8x32xbf16>
    %87 = vector.extract_strided_slice %7 {offsets = [0, 352], sizes = [8, 32], strides = [1, 1]} : vector<8x384xbf16> to vector<8x32xbf16>
    "tpu.trace_start"() <{level = 10 : i32, message = "qd,kd->qk"}> : () -> ()
    %cst_33 = arith.constant dense<0.000000e+00> : vector<8x8xf32>
    %88 = tpu.matmul %85, %86, %cst_33 {dimension_numbers = #tpu.dot_dimension_numbers<[1], [1], [0], [0], [0, 0, 1, 0], [], []>} : vector<8x32xbf16>, vector<8x32xbf16>, vector<8x8xf32> -> vector<8x8xf32>
    "tpu.trace_stop"() : () -> ()
    %cst_34 = arith.constant 0.176776692 : f32
    %89 = vector.broadcast %cst_34 : f32 to vector<8x8xf32>
    %90 = arith.mulf %88, %89 : vector<8x8xf32>
    %91 = arith.addf %90, %14 : vector<8x8xf32>
    %cst_35 = arith.constant dense<0xFF800000> : vector<8xf32>
    %92 = vector.multi_reduction <maximumf>, %91, %cst_35 [1] : vector<8x8xf32> to vector<8xf32>
    %93 = vector.shape_cast %92 : vector<8xf32> to vector<8x1xf32>
    %94 = vector.broadcast %93 : vector<8x1xf32> to vector<8x8xf32>
    %95 = arith.subf %91, %94 : vector<8x8xf32>
    %96 = math.exp %95 : vector<8x8xf32>
    %cst_36 = arith.constant dense<0.000000e+00> : vector<8xf32>
    %97 = vector.multi_reduction <add>, %96, %cst_36 [1] : vector<8x8xf32> to vector<8xf32>
    %98 = vector.shape_cast %97 : vector<8xf32> to vector<8x1xf32>
    %99 = tpu.reciprocal %98 {approx = true} : vector<8x1xf32> -> vector<8x1xf32>
    %100 = vector.broadcast %99 : vector<8x1xf32> to vector<8x8xf32>
    %101 = arith.mulf %96, %100 : vector<8x8xf32>
    %102 = arith.truncf %101 : vector<8x8xf32> to vector<8x8xbf16>
    %cst_37 = arith.constant dense<0.000000e+00> : vector<8x32xf32>
    %103 = tpu.matmul %102, %87, %cst_37 {dimension_numbers = #tpu.dot_dimension_numbers<[1], [0], [0], [1], [0, 0, 1, 1], [], []>} : vector<8x8xbf16>, vector<8x32xbf16>, vector<8x32xf32> -> vector<8x32xf32>
    %104 = arith.truncf %103 : vector<8x32xf32> to vector<8x32xbf16>
    %c96 = arith.constant 96 : index
    %c0_38 = arith.constant 0 : index
    %105 = vector.load %arg4[%c96, %c0_38] : memref<128x128xbf16, #tpu.memory_space<vmem>>, vector<32x128xbf16>
    %cst_39 = arith.constant dense<0.000000e+00> : vector<8x128xf32>
    %106 = tpu.matmul %104, %105, %cst_39 {dimension_numbers = #tpu.dot_dimension_numbers<[1], [0], [0], [1], [0, 0, 1, 1], [], []>} : vector<8x32xbf16>, vector<32x128xbf16>, vector<8x128xf32> -> vector<8x128xf32>
    %107 = arith.addf %84, %106 : vector<8x128xf32>
    %c0_40 = arith.constant 0 : index
    %c0_41 = arith.constant 0 : index
    %108 = vector.load %arg5[%c0_40, %c0_41] : memref<1x128xf32, #tpu.memory_space<vmem>>, vector<1x128xf32>
    %109 = vector.broadcast %108 : vector<1x128xf32> to vector<8x128xf32>
    %110 = arith.addf %107, %109 : vector<8x128xf32>
    %111 = arith.extf %1 : vector<8x128xbf16> to vector<8x128xf32>
    %112 = arith.addf %110, %111 : vector<8x128xf32>
    %cst_42 = arith.constant dense<0.000000e+00> : vector<8xf32>
    %113 = vector.multi_reduction <add>, %112, %cst_42 [1] : vector<8x128xf32> to vector<8xf32>
    %114 = vector.shape_cast %113 : vector<8xf32> to vector<8x1xf32>
    %cst_43 = arith.constant 1.280000e+02 : f32
    %115 = vector.broadcast %cst_43 : f32 to vector<8x1xf32>
    %116 = arith.divf %114, %115 : vector<8x1xf32>
    %117 = vector.broadcast %116 : vector<8x1xf32> to vector<8x128xf32>
    %118 = arith.subf %112, %117 : vector<8x128xf32>
    %119 = arith.mulf %118, %118 : vector<8x128xf32>
    %cst_44 = arith.constant dense<0.000000e+00> : vector<8xf32>
    %120 = vector.multi_reduction <add>, %119, %cst_44 [1] : vector<8x128xf32> to vector<8xf32>
    %121 = vector.shape_cast %120 : vector<8xf32> to vector<8x1xf32>
    %cst_45 = arith.constant 1.280000e+02 : f32
    %122 = vector.broadcast %cst_45 : f32 to vector<8x1xf32>
    %123 = arith.divf %121, %122 : vector<8x1xf32>
    %124 = vector.broadcast %116 : vector<8x1xf32> to vector<8x128xf32>
    %125 = arith.subf %112, %124 : vector<8x128xf32>
    %cst_46 = arith.constant 9.99999974E-6 : f32
    %126 = vector.broadcast %cst_46 : f32 to vector<8x1xf32>
    %127 = arith.addf %123, %126 : vector<8x1xf32>
    %128 = math.rsqrt %127 : vector<8x1xf32>
    %129 = vector.broadcast %128 : vector<8x1xf32> to vector<8x128xf32>
    %130 = arith.mulf %125, %129 : vector<8x128xf32>
    %c0_47 = arith.constant 0 : index
    %c0_48 = arith.constant 0 : index
    %131 = vector.load %arg7[%c0_47, %c0_48] : memref<1x128xf32, #tpu.memory_space<vmem>>, vector<1x128xf32>
    %132 = vector.broadcast %131 : vector<1x128xf32> to vector<8x128xf32>
    %133 = arith.mulf %130, %132 : vector<8x128xf32>
    %c0_49 = arith.constant 0 : index
    %c0_50 = arith.constant 0 : index
    %134 = vector.load %arg8[%c0_49, %c0_50] : memref<1x128xf32, #tpu.memory_space<vmem>>, vector<1x128xf32>
    %135 = vector.broadcast %134 : vector<1x128xf32> to vector<8x128xf32>
    %136 = arith.addf %133, %135 : vector<8x128xf32>
    %137 = arith.truncf %136 : vector<8x128xf32> to vector<8x128xbf16>
    %c0_51 = arith.constant 0 : index
    %c0_52 = arith.constant 0 : index
    %c0_53 = arith.constant 0 : index
    %138 = vector.load %arg9[%c0_51, %c0_52, %c0_53] : memref<1x8x128xbf16, #tpu.memory_space<vmem>>, vector<1x8x128xbf16>
    %139 = vector.shape_cast %138 : vector<1x8x128xbf16> to vector<8x128xbf16>
    %140 = vector.shape_cast %137 : vector<8x128xbf16> to vector<1x8x128xbf16>
    tpu.vector_store %arg9[%c0_51, %c0_52, %c0_53], %140 {strides = array<i32>} : memref<1x8x128xbf16, #tpu.memory_space<vmem>>, vector<1x8x128xbf16>,
    return
  }
  func.func @transform_0(%arg0: i32) -> (i32, i32, i32) {
    %c0_i32 = arith.constant 0 : i32
    %c0_i32_0 = arith.constant 0 : i32
    %c0_i32_1 = arith.constant 0 : i32
    return %arg0, %c0_i32, %c0_i32_0 : i32, i32, i32
  }
  func.func @transform_1(%arg0: i32) -> (i32, i32) {
    %c0_i32 = arith.constant 0 : i32
    %c0_i32_0 = arith.constant 0 : i32
    %c0_i32_1 = arith.constant 0 : i32
    return %c0_i32, %c0_i32_0 : i32, i32
  }
  func.func @transform_2(%arg0: i32) -> (i32, i32) {
    %c0_i32 = arith.constant 0 : i32
    %c0_i32_0 = arith.constant 0 : i32
    %c0_i32_1 = arith.constant 0 : i32
    return %c0_i32, %c0_i32_0 : i32, i32
  }
  func.func @transform_3(%arg0: i32) -> (i32, i32) {
    %c0_i32 = arith.constant 0 : i32
    %c0_i32_0 = arith.constant 0 : i32
    %c0_i32_1 = arith.constant 0 : i32
    return %c0_i32, %c0_i32_0 : i32, i32
  }
  func.func @transform_4(%arg0: i32) -> (i32, i32) {
    %c0_i32 = arith.constant 0 : i32
    %c0_i32_0 = arith.constant 0 : i32
    %c0_i32_1 = arith.constant 0 : i32
    return %c0_i32, %c0_i32_0 : i32, i32
  }
  func.func @transform_5(%arg0: i32) -> (i32, i32, i32) {
    %c0_i32 = arith.constant 0 : i32
    %c0_i32_0 = arith.constant 0 : i32
    %c0_i32_1 = arith.constant 0 : i32
    return %arg0, %c0_i32, %c0_i32_0 : i32, i32, i32
  }
  func.func @transform_6(%arg0: i32) -> (i32, i32) {
    %c0_i32 = arith.constant 0 : i32
    %c0_i32_0 = arith.constant 0 : i32
    %c0_i32_1 = arith.constant 0 : i32
    return %c0_i32, %c0_i32_0 : i32, i32
  }
  func.func @transform_7(%arg0: i32) -> (i32, i32) {
    %c0_i32 = arith.constant 0 : i32
    %c0_i32_0 = arith.constant 0 : i32
    %c0_i32_1 = arith.constant 0 : i32
    return %c0_i32, %c0_i32_0 : i32, i32
  }
  func.func @transform_8(%arg0: i32) -> (i32, i32, i32) {
    %c0_i32 = arith.constant 0 : i32
    %c0_i32_0 = arith.constant 0 : i32
    %c0_i32_1 = arith.constant 0 : i32
    return %arg0, %c0_i32, %c0_i32_0 : i32, i32, i32
  }
}

module attributes {stable_mosaic.version = 11 : i64} {
  func.func @_mha_cross_ln_kernel(%arg0: i32, %arg1: memref<1x8x128xbf16, #tpu.memory_space<vmem>>, %arg2: memref<1x16x128xbf16, #tpu.memory_space<vmem>>, %arg3: memref<128x128xbf16, #tpu.memory_space<vmem>>, %arg4: memref<1x128xf32, #tpu.memory_space<vmem>>, %arg5: memref<128x256xbf16, #tpu.memory_space<vmem>>, %arg6: memref<1x256xf32, #tpu.memory_space<vmem>>, %arg7: memref<128x128xbf16, #tpu.memory_space<vmem>>, %arg8: memref<1x128xf32, #tpu.memory_space<vmem>>, %arg9: memref<1x8x16xf32, #tpu.memory_space<vmem>>, %arg10: memref<1x128xf32, #tpu.memory_space<vmem>>, %arg11: memref<1x128xf32, #tpu.memory_space<vmem>>, %arg12: memref<1x8x128xbf16, #tpu.memory_space<vmem>>) attributes {dimension_semantics = [#tpu.dimension_semantics<parallel>], iteration_bounds = array<i64: 2>, scalar_prefetch = 0 : i64, scratch_operands = 0 : i64, tpu.core_type = #tpu.core_type<tc>, window_params = [{transform_indices = @transform_0, window_bounds = array<i64: 1, 8, 128>}, {transform_indices = @transform_1, window_bounds = array<i64: 1, 16, 128>}, {pipeline_mode = #tpu.pipeline_mode<synchronous>, transform_indices = @transform_2, window_bounds = array<i64: 128, 128>}, {pipeline_mode = #tpu.pipeline_mode<synchronous>, transform_indices = @transform_3, window_bounds = array<i64: 1, 128>}, {pipeline_mode = #tpu.pipeline_mode<synchronous>, transform_indices = @transform_4, window_bounds = array<i64: 128, 256>}, {pipeline_mode = #tpu.pipeline_mode<synchronous>, transform_indices = @transform_5, window_bounds = array<i64: 1, 256>}, {pipeline_mode = #tpu.pipeline_mode<synchronous>, transform_indices = @transform_6, window_bounds = array<i64: 128, 128>}, {pipeline_mode = #tpu.pipeline_mode<synchronous>, transform_indices = @transform_7, window_bounds = array<i64: 1, 128>}, {transform_indices = @transform_8, window_bounds = array<i64: 1, 8, 16>}, {pipeline_mode = #tpu.pipeline_mode<synchronous>, transform_indices = @transform_9, window_bounds = array<i64: 1, 128>}, {pipeline_mode = #tpu.pipeline_mode<synchronous>, transform_indices = @transform_10, window_bounds = array<i64: 1, 128>}, {transform_indices = @transform_11, window_bounds = array<i64: 1, 8, 128>}]} {
    %c0 = arith.constant 0 : index
    %c0_0 = arith.constant 0 : index
    %c0_1 = arith.constant 0 : index
    %0 = vector.load %arg1[%c0, %c0_0, %c0_1] : memref<1x8x128xbf16, #tpu.memory_space<vmem>>, vector<1x8x128xbf16>
    %1 = vector.shape_cast %0 : vector<1x8x128xbf16> to vector<8x128xbf16>
    %c0_2 = arith.constant 0 : index
    %c0_3 = arith.constant 0 : index
    %c0_4 = arith.constant 0 : index
    %2 = vector.load %arg2[%c0_2, %c0_3, %c0_4] : memref<1x16x128xbf16, #tpu.memory_space<vmem>>, vector<1x16x128xbf16>
    %3 = vector.shape_cast %2 : vector<1x16x128xbf16> to vector<16x128xbf16>
    %c0_5 = arith.constant 0 : index
    %c0_6 = arith.constant 0 : index
    %4 = vector.load %arg3[%c0_5, %c0_6] : memref<128x128xbf16, #tpu.memory_space<vmem>>, vector<128x128xbf16>
    %cst = arith.constant dense<0.000000e+00> : vector<8x128xf32>
    %5 = tpu.matmul %1, %4, %cst {dimension_numbers = #tpu.dot_dimension_numbers<[1], [0], [0], [1], [0, 0, 1, 1], [], []>} : vector<8x128xbf16>, vector<128x128xbf16>, vector<8x128xf32> -> vector<8x128xf32>
    %c0_7 = arith.constant 0 : index
    %c0_8 = arith.constant 0 : index
    %6 = vector.load %arg4[%c0_7, %c0_8] : memref<1x128xf32, #tpu.memory_space<vmem>>, vector<1x128xf32>
    %7 = vector.broadcast %6 : vector<1x128xf32> to vector<8x128xf32>
    %8 = arith.addf %5, %7 : vector<8x128xf32>
    %9 = arith.truncf %8 : vector<8x128xf32> to vector<8x128xbf16>
    %c0_9 = arith.constant 0 : index
    %c0_10 = arith.constant 0 : index
    %10 = vector.load %arg5[%c0_9, %c0_10] : memref<128x256xbf16, #tpu.memory_space<vmem>>, vector<128x256xbf16>
    %cst_11 = arith.constant dense<0.000000e+00> : vector<16x256xf32>
    %11 = tpu.matmul %3, %10, %cst_11 {dimension_numbers = #tpu.dot_dimension_numbers<[1], [0], [0], [1], [0, 0, 1, 1], [], []>} : vector<16x128xbf16>, vector<128x256xbf16>, vector<16x256xf32> -> vector<16x256xf32>
    %c0_12 = arith.constant 0 : index
    %c0_13 = arith.constant 0 : index
    %12 = vector.load %arg6[%c0_12, %c0_13] : memref<1x256xf32, #tpu.memory_space<vmem>>, vector<1x256xf32>
    %13 = vector.broadcast %12 : vector<1x256xf32> to vector<16x256xf32>
    %14 = arith.addf %11, %13 : vector<16x256xf32>
    %15 = arith.truncf %14 : vector<16x256xf32> to vector<16x256xbf16>
    %c0_14 = arith.constant 0 : index
    %c0_15 = arith.constant 0 : index
    %c0_16 = arith.constant 0 : index
    %16 = vector.load %arg9[%c0_14, %c0_15, %c0_16] : memref<1x8x16xf32, #tpu.memory_space<vmem>>, vector<1x8x16xf32>
    %17 = vector.shape_cast %16 : vector<1x8x16xf32> to vector<8x16xf32>
    %cst_17 = arith.constant 0.000000e+00 : f32
    %18 = vector.broadcast %cst_17 : f32 to vector<8x128xf32>
    %19 = vector.extract_strided_slice %9 {offsets = [0, 0], sizes = [8, 32], strides = [1, 1]} : vector<8x128xbf16> to vector<8x32xbf16>
    %20 = vector.extract_strided_slice %15 {offsets = [0, 0], sizes = [16, 32], strides = [1, 1]} : vector<16x256xbf16> to vector<16x32xbf16>
    %21 = vector.extract_strided_slice %15 {offsets = [0, 128], sizes = [16, 32], strides = [1, 1]} : vector<16x256xbf16> to vector<16x32xbf16>
    "tpu.trace_start"() <{level = 10 : i32, message = "qd,kd->qk"}> : () -> ()
    %cst_18 = arith.constant dense<0.000000e+00> : vector<8x16xf32>
    %22 = tpu.matmul %19, %20, %cst_18 {dimension_numbers = #tpu.dot_dimension_numbers<[1], [1], [0], [0], [0, 0, 1, 0], [], []>} : vector<8x32xbf16>, vector<16x32xbf16>, vector<8x16xf32> -> vector<8x16xf32>
    "tpu.trace_stop"() : () -> ()
    %cst_19 = arith.constant 0.176776692 : f32
    %23 = vector.broadcast %cst_19 : f32 to vector<8x16xf32>
    %24 = arith.mulf %22, %23 : vector<8x16xf32>
    %25 = arith.addf %24, %17 : vector<8x16xf32>
    %cst_20 = arith.constant dense<0xFF800000> : vector<8xf32>
    %26 = vector.multi_reduction <maximumf>, %25, %cst_20 [1] : vector<8x16xf32> to vector<8xf32>
    %27 = vector.shape_cast %26 : vector<8xf32> to vector<8x1xf32>
    %28 = vector.broadcast %27 : vector<8x1xf32> to vector<8x16xf32>
    %29 = arith.subf %25, %28 : vector<8x16xf32>
    %30 = math.exp %29 : vector<8x16xf32>
    %cst_21 = arith.constant dense<0.000000e+00> : vector<8xf32>
    %31 = vector.multi_reduction <add>, %30, %cst_21 [1] : vector<8x16xf32> to vector<8xf32>
    %32 = vector.shape_cast %31 : vector<8xf32> to vector<8x1xf32>
    %33 = tpu.reciprocal %32 {approx = true} : vector<8x1xf32> -> vector<8x1xf32>
    %34 = vector.broadcast %33 : vector<8x1xf32> to vector<8x16xf32>
    %35 = arith.mulf %30, %34 : vector<8x16xf32>
    %36 = arith.truncf %35 : vector<8x16xf32> to vector<8x16xbf16>
    %cst_22 = arith.constant dense<0.000000e+00> : vector<8x32xf32>
    %37 = tpu.matmul %36, %21, %cst_22 {dimension_numbers = #tpu.dot_dimension_numbers<[1], [0], [0], [1], [0, 0, 1, 1], [], []>} : vector<8x16xbf16>, vector<16x32xbf16>, vector<8x32xf32> -> vector<8x32xf32>
    %38 = arith.truncf %37 : vector<8x32xf32> to vector<8x32xbf16>
    %c0_23 = arith.constant 0 : index
    %c0_24 = arith.constant 0 : index
    %39 = vector.load %arg7[%c0_23, %c0_24] : memref<128x128xbf16, #tpu.memory_space<vmem>>, vector<32x128xbf16>
    %cst_25 = arith.constant dense<0.000000e+00> : vector<8x128xf32>
    %40 = tpu.matmul %38, %39, %cst_25 {dimension_numbers = #tpu.dot_dimension_numbers<[1], [0], [0], [1], [0, 0, 1, 1], [], []>} : vector<8x32xbf16>, vector<32x128xbf16>, vector<8x128xf32> -> vector<8x128xf32>
    %41 = arith.addf %18, %40 : vector<8x128xf32>
    %42 = vector.extract_strided_slice %9 {offsets = [0, 32], sizes = [8, 32], strides = [1, 1]} : vector<8x128xbf16> to vector<8x32xbf16>
    %43 = vector.extract_strided_slice %15 {offsets = [0, 32], sizes = [16, 32], strides = [1, 1]} : vector<16x256xbf16> to vector<16x32xbf16>
    %44 = vector.extract_strided_slice %15 {offsets = [0, 160], sizes = [16, 32], strides = [1, 1]} : vector<16x256xbf16> to vector<16x32xbf16>
    "tpu.trace_start"() <{level = 10 : i32, message = "qd,kd->qk"}> : () -> ()
    %cst_26 = arith.constant dense<0.000000e+00> : vector<8x16xf32>
    %45 = tpu.matmul %42, %43, %cst_26 {dimension_numbers = #tpu.dot_dimension_numbers<[1], [1], [0], [0], [0, 0, 1, 0], [], []>} : vector<8x32xbf16>, vector<16x32xbf16>, vector<8x16xf32> -> vector<8x16xf32>
    "tpu.trace_stop"() : () -> ()
    %cst_27 = arith.constant 0.176776692 : f32
    %46 = vector.broadcast %cst_27 : f32 to vector<8x16xf32>
    %47 = arith.mulf %45, %46 : vector<8x16xf32>
    %48 = arith.addf %47, %17 : vector<8x16xf32>
    %cst_28 = arith.constant dense<0xFF800000> : vector<8xf32>
    %49 = vector.multi_reduction <maximumf>, %48, %cst_28 [1] : vector<8x16xf32> to vector<8xf32>
    %50 = vector.shape_cast %49 : vector<8xf32> to vector<8x1xf32>
    %51 = vector.broadcast %50 : vector<8x1xf32> to vector<8x16xf32>
    %52 = arith.subf %48, %51 : vector<8x16xf32>
    %53 = math.exp %52 : vector<8x16xf32>
    %cst_29 = arith.constant dense<0.000000e+00> : vector<8xf32>
    %54 = vector.multi_reduction <add>, %53, %cst_29 [1] : vector<8x16xf32> to vector<8xf32>
    %55 = vector.shape_cast %54 : vector<8xf32> to vector<8x1xf32>
    %56 = tpu.reciprocal %55 {approx = true} : vector<8x1xf32> -> vector<8x1xf32>
    %57 = vector.broadcast %56 : vector<8x1xf32> to vector<8x16xf32>
    %58 = arith.mulf %53, %57 : vector<8x16xf32>
    %59 = arith.truncf %58 : vector<8x16xf32> to vector<8x16xbf16>
    %cst_30 = arith.constant dense<0.000000e+00> : vector<8x32xf32>
    %60 = tpu.matmul %59, %44, %cst_30 {dimension_numbers = #tpu.dot_dimension_numbers<[1], [0], [0], [1], [0, 0, 1, 1], [], []>} : vector<8x16xbf16>, vector<16x32xbf16>, vector<8x32xf32> -> vector<8x32xf32>
    %61 = arith.truncf %60 : vector<8x32xf32> to vector<8x32xbf16>
    %c32 = arith.constant 32 : index
    %c0_31 = arith.constant 0 : index
    %62 = vector.load %arg7[%c32, %c0_31] : memref<128x128xbf16, #tpu.memory_space<vmem>>, vector<32x128xbf16>
    %cst_32 = arith.constant dense<0.000000e+00> : vector<8x128xf32>
    %63 = tpu.matmul %61, %62, %cst_32 {dimension_numbers = #tpu.dot_dimension_numbers<[1], [0], [0], [1], [0, 0, 1, 1], [], []>} : vector<8x32xbf16>, vector<32x128xbf16>, vector<8x128xf32> -> vector<8x128xf32>
    %64 = arith.addf %41, %63 : vector<8x128xf32>
    %65 = vector.extract_strided_slice %9 {offsets = [0, 64], sizes = [8, 32], strides = [1, 1]} : vector<8x128xbf16> to vector<8x32xbf16>
    %66 = vector.extract_strided_slice %15 {offsets = [0, 64], sizes = [16, 32], strides = [1, 1]} : vector<16x256xbf16> to vector<16x32xbf16>
    %67 = vector.extract_strided_slice %15 {offsets = [0, 192], sizes = [16, 32], strides = [1, 1]} : vector<16x256xbf16> to vector<16x32xbf16>
    "tpu.trace_start"() <{level = 10 : i32, message = "qd,kd->qk"}> : () -> ()
    %cst_33 = arith.constant dense<0.000000e+00> : vector<8x16xf32>
    %68 = tpu.matmul %65, %66, %cst_33 {dimension_numbers = #tpu.dot_dimension_numbers<[1], [1], [0], [0], [0, 0, 1, 0], [], []>} : vector<8x32xbf16>, vector<16x32xbf16>, vector<8x16xf32> -> vector<8x16xf32>
    "tpu.trace_stop"() : () -> ()
    %cst_34 = arith.constant 0.176776692 : f32
    %69 = vector.broadcast %cst_34 : f32 to vector<8x16xf32>
    %70 = arith.mulf %68, %69 : vector<8x16xf32>
    %71 = arith.addf %70, %17 : vector<8x16xf32>
    %cst_35 = arith.constant dense<0xFF800000> : vector<8xf32>
    %72 = vector.multi_reduction <maximumf>, %71, %cst_35 [1] : vector<8x16xf32> to vector<8xf32>
    %73 = vector.shape_cast %72 : vector<8xf32> to vector<8x1xf32>
    %74 = vector.broadcast %73 : vector<8x1xf32> to vector<8x16xf32>
    %75 = arith.subf %71, %74 : vector<8x16xf32>
    %76 = math.exp %75 : vector<8x16xf32>
    %cst_36 = arith.constant dense<0.000000e+00> : vector<8xf32>
    %77 = vector.multi_reduction <add>, %76, %cst_36 [1] : vector<8x16xf32> to vector<8xf32>
    %78 = vector.shape_cast %77 : vector<8xf32> to vector<8x1xf32>
    %79 = tpu.reciprocal %78 {approx = true} : vector<8x1xf32> -> vector<8x1xf32>
    %80 = vector.broadcast %79 : vector<8x1xf32> to vector<8x16xf32>
    %81 = arith.mulf %76, %80 : vector<8x16xf32>
    %82 = arith.truncf %81 : vector<8x16xf32> to vector<8x16xbf16>
    %cst_37 = arith.constant dense<0.000000e+00> : vector<8x32xf32>
    %83 = tpu.matmul %82, %67, %cst_37 {dimension_numbers = #tpu.dot_dimension_numbers<[1], [0], [0], [1], [0, 0, 1, 1], [], []>} : vector<8x16xbf16>, vector<16x32xbf16>, vector<8x32xf32> -> vector<8x32xf32>
    %84 = arith.truncf %83 : vector<8x32xf32> to vector<8x32xbf16>
    %c64 = arith.constant 64 : index
    %c0_38 = arith.constant 0 : index
    %85 = vector.load %arg7[%c64, %c0_38] : memref<128x128xbf16, #tpu.memory_space<vmem>>, vector<32x128xbf16>
    %cst_39 = arith.constant dense<0.000000e+00> : vector<8x128xf32>
    %86 = tpu.matmul %84, %85, %cst_39 {dimension_numbers = #tpu.dot_dimension_numbers<[1], [0], [0], [1], [0, 0, 1, 1], [], []>} : vector<8x32xbf16>, vector<32x128xbf16>, vector<8x128xf32> -> vector<8x128xf32>
    %87 = arith.addf %64, %86 : vector<8x128xf32>
    %88 = vector.extract_strided_slice %9 {offsets = [0, 96], sizes = [8, 32], strides = [1, 1]} : vector<8x128xbf16> to vector<8x32xbf16>
    %89 = vector.extract_strided_slice %15 {offsets = [0, 96], sizes = [16, 32], strides = [1, 1]} : vector<16x256xbf16> to vector<16x32xbf16>
    %90 = vector.extract_strided_slice %15 {offsets = [0, 224], sizes = [16, 32], strides = [1, 1]} : vector<16x256xbf16> to vector<16x32xbf16>
    "tpu.trace_start"() <{level = 10 : i32, message = "qd,kd->qk"}> : () -> ()
    %cst_40 = arith.constant dense<0.000000e+00> : vector<8x16xf32>
    %91 = tpu.matmul %88, %89, %cst_40 {dimension_numbers = #tpu.dot_dimension_numbers<[1], [1], [0], [0], [0, 0, 1, 0], [], []>} : vector<8x32xbf16>, vector<16x32xbf16>, vector<8x16xf32> -> vector<8x16xf32>
    "tpu.trace_stop"() : () -> ()
    %cst_41 = arith.constant 0.176776692 : f32
    %92 = vector.broadcast %cst_41 : f32 to vector<8x16xf32>
    %93 = arith.mulf %91, %92 : vector<8x16xf32>
    %94 = arith.addf %93, %17 : vector<8x16xf32>
    %cst_42 = arith.constant dense<0xFF800000> : vector<8xf32>
    %95 = vector.multi_reduction <maximumf>, %94, %cst_42 [1] : vector<8x16xf32> to vector<8xf32>
    %96 = vector.shape_cast %95 : vector<8xf32> to vector<8x1xf32>
    %97 = vector.broadcast %96 : vector<8x1xf32> to vector<8x16xf32>
    %98 = arith.subf %94, %97 : vector<8x16xf32>
    %99 = math.exp %98 : vector<8x16xf32>
    %cst_43 = arith.constant dense<0.000000e+00> : vector<8xf32>
    %100 = vector.multi_reduction <add>, %99, %cst_43 [1] : vector<8x16xf32> to vector<8xf32>
    %101 = vector.shape_cast %100 : vector<8xf32> to vector<8x1xf32>
    %102 = tpu.reciprocal %101 {approx = true} : vector<8x1xf32> -> vector<8x1xf32>
    %103 = vector.broadcast %102 : vector<8x1xf32> to vector<8x16xf32>
    %104 = arith.mulf %99, %103 : vector<8x16xf32>
    %105 = arith.truncf %104 : vector<8x16xf32> to vector<8x16xbf16>
    %cst_44 = arith.constant dense<0.000000e+00> : vector<8x32xf32>
    %106 = tpu.matmul %105, %90, %cst_44 {dimension_numbers = #tpu.dot_dimension_numbers<[1], [0], [0], [1], [0, 0, 1, 1], [], []>} : vector<8x16xbf16>, vector<16x32xbf16>, vector<8x32xf32> -> vector<8x32xf32>
    %107 = arith.truncf %106 : vector<8x32xf32> to vector<8x32xbf16>
    %c96 = arith.constant 96 : index
    %c0_45 = arith.constant 0 : index
    %108 = vector.load %arg7[%c96, %c0_45] : memref<128x128xbf16, #tpu.memory_space<vmem>>, vector<32x128xbf16>
    %cst_46 = arith.constant dense<0.000000e+00> : vector<8x128xf32>
    %109 = tpu.matmul %107, %108, %cst_46 {dimension_numbers = #tpu.dot_dimension_numbers<[1], [0], [0], [1], [0, 0, 1, 1], [], []>} : vector<8x32xbf16>, vector<32x128xbf16>, vector<8x128xf32> -> vector<8x128xf32>
    %110 = arith.addf %87, %109 : vector<8x128xf32>
    %c0_47 = arith.constant 0 : index
    %c0_48 = arith.constant 0 : index
    %111 = vector.load %arg8[%c0_47, %c0_48] : memref<1x128xf32, #tpu.memory_space<vmem>>, vector<1x128xf32>
    %112 = vector.broadcast %111 : vector<1x128xf32> to vector<8x128xf32>
    %113 = arith.addf %110, %112 : vector<8x128xf32>
    %114 = arith.extf %1 : vector<8x128xbf16> to vector<8x128xf32>
    %115 = arith.addf %113, %114 : vector<8x128xf32>
    %cst_49 = arith.constant dense<0.000000e+00> : vector<8xf32>
    %116 = vector.multi_reduction <add>, %115, %cst_49 [1] : vector<8x128xf32> to vector<8xf32>
    %117 = vector.shape_cast %116 : vector<8xf32> to vector<8x1xf32>
    %cst_50 = arith.constant 1.280000e+02 : f32
    %118 = vector.broadcast %cst_50 : f32 to vector<8x1xf32>
    %119 = arith.divf %117, %118 : vector<8x1xf32>
    %120 = vector.broadcast %119 : vector<8x1xf32> to vector<8x128xf32>
    %121 = arith.subf %115, %120 : vector<8x128xf32>
    %122 = arith.mulf %121, %121 : vector<8x128xf32>
    %cst_51 = arith.constant dense<0.000000e+00> : vector<8xf32>
    %123 = vector.multi_reduction <add>, %122, %cst_51 [1] : vector<8x128xf32> to vector<8xf32>
    %124 = vector.shape_cast %123 : vector<8xf32> to vector<8x1xf32>
    %cst_52 = arith.constant 1.280000e+02 : f32
    %125 = vector.broadcast %cst_52 : f32 to vector<8x1xf32>
    %126 = arith.divf %124, %125 : vector<8x1xf32>
    %127 = vector.broadcast %119 : vector<8x1xf32> to vector<8x128xf32>
    %128 = arith.subf %115, %127 : vector<8x128xf32>
    %cst_53 = arith.constant 9.99999974E-6 : f32
    %129 = vector.broadcast %cst_53 : f32 to vector<8x1xf32>
    %130 = arith.addf %126, %129 : vector<8x1xf32>
    %131 = math.rsqrt %130 : vector<8x1xf32>
    %132 = vector.broadcast %131 : vector<8x1xf32> to vector<8x128xf32>
    %133 = arith.mulf %128, %132 : vector<8x128xf32>
    %c0_54 = arith.constant 0 : index
    %c0_55 = arith.constant 0 : index
    %134 = vector.load %arg10[%c0_54, %c0_55] : memref<1x128xf32, #tpu.memory_space<vmem>>, vector<1x128xf32>
    %135 = vector.broadcast %134 : vector<1x128xf32> to vector<8x128xf32>
    %136 = arith.mulf %133, %135 : vector<8x128xf32>
    %c0_56 = arith.constant 0 : index
    %c0_57 = arith.constant 0 : index
    %137 = vector.load %arg11[%c0_56, %c0_57] : memref<1x128xf32, #tpu.memory_space<vmem>>, vector<1x128xf32>
    %138 = vector.broadcast %137 : vector<1x128xf32> to vector<8x128xf32>
    %139 = arith.addf %136, %138 : vector<8x128xf32>
    %140 = arith.truncf %139 : vector<8x128xf32> to vector<8x128xbf16>
    %c0_58 = arith.constant 0 : index
    %c0_59 = arith.constant 0 : index
    %c0_60 = arith.constant 0 : index
    %141 = vector.load %arg12[%c0_58, %c0_59, %c0_60] : memref<1x8x128xbf16, #tpu.memory_space<vmem>>, vector<1x8x128xbf16>
    %142 = vector.shape_cast %141 : vector<1x8x128xbf16> to vector<8x128xbf16>
    %143 = vector.shape_cast %140 : vector<8x128xbf16> to vector<1x8x128xbf16>
    tpu.vector_store %arg12[%c0_58, %c0_59, %c0_60], %143 {strides = array<i32>} : memref<1x8x128xbf16, #tpu.memory_space<vmem>>, vector<1x8x128xbf16>,
    return
  }
  func.func @transform_0(%arg0: i32) -> (i32, i32, i32) {
    %c0_i32 = arith.constant 0 : i32
    %c0_i32_0 = arith.constant 0 : i32
    %c0_i32_1 = arith.constant 0 : i32
    return %arg0, %c0_i32, %c0_i32_0 : i32, i32, i32
  }
  func.func @transform_1(%arg0: i32) -> (i32, i32, i32) {
    %c0_i32 = arith.constant 0 : i32
    %c0_i32_0 = arith.constant 0 : i32
    %c0_i32_1 = arith.constant 0 : i32
    return %arg0, %c0_i32, %c0_i32_0 : i32, i32, i32
  }
  func.func @transform_2(%arg0: i32) -> (i32, i32) {
    %c0_i32 = arith.constant 0 : i32
    %c0_i32_0 = arith.constant 0 : i32
    %c0_i32_1 = arith.constant 0 : i32
    return %c0_i32, %c0_i32_0 : i32, i32
  }
  func.func @transform_3(%arg0: i32) -> (i32, i32) {
    %c0_i32 = arith.constant 0 : i32
    %c0_i32_0 = arith.constant 0 : i32
    %c0_i32_1 = arith.constant 0 : i32
    return %c0_i32, %c0_i32_0 : i32, i32
  }
  func.func @transform_4(%arg0: i32) -> (i32, i32) {
    %c0_i32 = arith.constant 0 : i32
    %c0_i32_0 = arith.constant 0 : i32
    %c0_i32_1 = arith.constant 0 : i32
    return %c0_i32, %c0_i32_0 : i32, i32
  }
  func.func @transform_5(%arg0: i32) -> (i32, i32) {
    %c0_i32 = arith.constant 0 : i32
    %c0_i32_0 = arith.constant 0 : i32
    %c0_i32_1 = arith.constant 0 : i32
    return %c0_i32, %c0_i32_0 : i32, i32
  }
  func.func @transform_6(%arg0: i32) -> (i32, i32) {
    %c0_i32 = arith.constant 0 : i32
    %c0_i32_0 = arith.constant 0 : i32
    %c0_i32_1 = arith.constant 0 : i32
    return %c0_i32, %c0_i32_0 : i32, i32
  }
  func.func @transform_7(%arg0: i32) -> (i32, i32) {
    %c0_i32 = arith.constant 0 : i32
    %c0_i32_0 = arith.constant 0 : i32
    %c0_i32_1 = arith.constant 0 : i32
    return %c0_i32, %c0_i32_0 : i32, i32
  }
  func.func @transform_8(%arg0: i32) -> (i32, i32, i32) {
    %c0_i32 = arith.constant 0 : i32
    %c0_i32_0 = arith.constant 0 : i32
    %c0_i32_1 = arith.constant 0 : i32
    return %arg0, %c0_i32, %c0_i32_0 : i32, i32, i32
  }
  func.func @transform_9(%arg0: i32) -> (i32, i32) {
    %c0_i32 = arith.constant 0 : i32
    %c0_i32_0 = arith.constant 0 : i32
    %c0_i32_1 = arith.constant 0 : i32
    return %c0_i32, %c0_i32_0 : i32, i32
  }
  func.func @transform_10(%arg0: i32) -> (i32, i32) {
    %c0_i32 = arith.constant 0 : i32
    %c0_i32_0 = arith.constant 0 : i32
    %c0_i32_1 = arith.constant 0 : i32
    return %c0_i32, %c0_i32_0 : i32, i32
  }
  func.func @transform_11(%arg0: i32) -> (i32, i32, i32) {
    %c0_i32 = arith.constant 0 : i32
    %c0_i32_0 = arith.constant 0 : i32
    %c0_i32_1 = arith.constant 0 : i32
    return %arg0, %c0_i32, %c0_i32_0 : i32, i32, i32
  }
}

module attributes {stable_mosaic.version = 11 : i64} {
  func.func @_ffn_add_ln_kernel(%arg0: i32, %arg1: memref<8x128xbf16, #tpu.memory_space<vmem>>, %arg2: memref<128x256xbf16, #tpu.memory_space<vmem>>, %arg3: memref<1x256xf32, #tpu.memory_space<vmem>>, %arg4: memref<256x128xbf16, #tpu.memory_space<vmem>>, %arg5: memref<1x128xf32, #tpu.memory_space<vmem>>, %arg6: memref<1x128xf32, #tpu.memory_space<vmem>>, %arg7: memref<1x128xf32, #tpu.memory_space<vmem>>, %arg8: memref<8x128xbf16, #tpu.memory_space<vmem>>) attributes {dimension_semantics = [#tpu.dimension_semantics<parallel>], iteration_bounds = array<i64: 2>, scalar_prefetch = 0 : i64, scratch_operands = 0 : i64, tpu.core_type = #tpu.core_type<tc>, window_params = [{transform_indices = @transform_0, window_bounds = array<i64: 8, 128>}, {pipeline_mode = #tpu.pipeline_mode<synchronous>, transform_indices = @transform_1, window_bounds = array<i64: 128, 256>}, {pipeline_mode = #tpu.pipeline_mode<synchronous>, transform_indices = @transform_2, window_bounds = array<i64: 1, 256>}, {pipeline_mode = #tpu.pipeline_mode<synchronous>, transform_indices = @transform_3, window_bounds = array<i64: 256, 128>}, {pipeline_mode = #tpu.pipeline_mode<synchronous>, transform_indices = @transform_4, window_bounds = array<i64: 1, 128>}, {pipeline_mode = #tpu.pipeline_mode<synchronous>, transform_indices = @transform_5, window_bounds = array<i64: 1, 128>}, {pipeline_mode = #tpu.pipeline_mode<synchronous>, transform_indices = @transform_6, window_bounds = array<i64: 1, 128>}, {transform_indices = @transform_7, window_bounds = array<i64: 8, 128>}]} {
    %c0 = arith.constant 0 : index
    %c0_0 = arith.constant 0 : index
    %0 = vector.load %arg1[%c0, %c0_0] : memref<8x128xbf16, #tpu.memory_space<vmem>>, vector<8x128xbf16>
    %c0_1 = arith.constant 0 : index
    %c0_2 = arith.constant 0 : index
    %1 = vector.load %arg2[%c0_1, %c0_2] : memref<128x256xbf16, #tpu.memory_space<vmem>>, vector<128x256xbf16>
    %cst = arith.constant dense<0.000000e+00> : vector<8x256xf32>
    %2 = tpu.matmul %0, %1, %cst {dimension_numbers = #tpu.dot_dimension_numbers<[1], [0], [0], [1], [0, 0, 1, 1], [], []>} : vector<8x128xbf16>, vector<128x256xbf16>, vector<8x256xf32> -> vector<8x256xf32>
    %c0_3 = arith.constant 0 : index
    %c0_4 = arith.constant 0 : index
    %3 = vector.load %arg3[%c0_3, %c0_4] : memref<1x256xf32, #tpu.memory_space<vmem>>, vector<1x256xf32>
    %4 = vector.broadcast %3 : vector<1x256xf32> to vector<8x256xf32>
    %5 = arith.addf %2, %4 : vector<8x256xf32>
    %cst_5 = arith.constant 0.000000e+00 : f32
    %6 = vector.broadcast %cst_5 : f32 to vector<8x256xf32>
    %7 = arith.maximumf %5, %6 : vector<8x256xf32>
    %8 = arith.truncf %7 : vector<8x256xf32> to vector<8x256xbf16>
    %c0_6 = arith.constant 0 : index
    %c0_7 = arith.constant 0 : index
    %9 = vector.load %arg4[%c0_6, %c0_7] : memref<256x128xbf16, #tpu.memory_space<vmem>>, vector<256x128xbf16>
    %cst_8 = arith.constant dense<0.000000e+00> : vector<8x128xf32>
    %10 = tpu.matmul %8, %9, %cst_8 {dimension_numbers = #tpu.dot_dimension_numbers<[1], [0], [0], [1], [0, 0, 1, 1], [], []>} : vector<8x256xbf16>, vector<256x128xbf16>, vector<8x128xf32> -> vector<8x128xf32>
    %c0_9 = arith.constant 0 : index
    %c0_10 = arith.constant 0 : index
    %11 = vector.load %arg5[%c0_9, %c0_10] : memref<1x128xf32, #tpu.memory_space<vmem>>, vector<1x128xf32>
    %12 = vector.broadcast %11 : vector<1x128xf32> to vector<8x128xf32>
    %13 = arith.addf %10, %12 : vector<8x128xf32>
    %14 = arith.extf %0 : vector<8x128xbf16> to vector<8x128xf32>
    %15 = arith.addf %13, %14 : vector<8x128xf32>
    %cst_11 = arith.constant dense<0.000000e+00> : vector<8xf32>
    %16 = vector.multi_reduction <add>, %15, %cst_11 [1] : vector<8x128xf32> to vector<8xf32>
    %17 = vector.shape_cast %16 : vector<8xf32> to vector<8x1xf32>
    %cst_12 = arith.constant 1.280000e+02 : f32
    %18 = vector.broadcast %cst_12 : f32 to vector<8x1xf32>
    %19 = arith.divf %17, %18 : vector<8x1xf32>
    %20 = vector.broadcast %19 : vector<8x1xf32> to vector<8x128xf32>
    %21 = arith.subf %15, %20 : vector<8x128xf32>
    %22 = arith.mulf %21, %21 : vector<8x128xf32>
    %cst_13 = arith.constant dense<0.000000e+00> : vector<8xf32>
    %23 = vector.multi_reduction <add>, %22, %cst_13 [1] : vector<8x128xf32> to vector<8xf32>
    %24 = vector.shape_cast %23 : vector<8xf32> to vector<8x1xf32>
    %cst_14 = arith.constant 1.280000e+02 : f32
    %25 = vector.broadcast %cst_14 : f32 to vector<8x1xf32>
    %26 = arith.divf %24, %25 : vector<8x1xf32>
    %27 = vector.broadcast %19 : vector<8x1xf32> to vector<8x128xf32>
    %28 = arith.subf %15, %27 : vector<8x128xf32>
    %cst_15 = arith.constant 9.99999974E-6 : f32
    %29 = vector.broadcast %cst_15 : f32 to vector<8x1xf32>
    %30 = arith.addf %26, %29 : vector<8x1xf32>
    %31 = math.rsqrt %30 : vector<8x1xf32>
    %32 = vector.broadcast %31 : vector<8x1xf32> to vector<8x128xf32>
    %33 = arith.mulf %28, %32 : vector<8x128xf32>
    %c0_16 = arith.constant 0 : index
    %c0_17 = arith.constant 0 : index
    %34 = vector.load %arg6[%c0_16, %c0_17] : memref<1x128xf32, #tpu.memory_space<vmem>>, vector<1x128xf32>
    %35 = vector.broadcast %34 : vector<1x128xf32> to vector<8x128xf32>
    %36 = arith.mulf %33, %35 : vector<8x128xf32>
    %c0_18 = arith.constant 0 : index
    %c0_19 = arith.constant 0 : index
    %37 = vector.load %arg7[%c0_18, %c0_19] : memref<1x128xf32, #tpu.memory_space<vmem>>, vector<1x128xf32>
    %38 = vector.broadcast %37 : vector<1x128xf32> to vector<8x128xf32>
    %39 = arith.addf %36, %38 : vector<8x128xf32>
    %40 = arith.truncf %39 : vector<8x128xf32> to vector<8x128xbf16>
    %c0_20 = arith.constant 0 : index
    %c0_21 = arith.constant 0 : index
    %41 = vector.load %arg8[%c0_20, %c0_21] : memref<8x128xbf16, #tpu.memory_space<vmem>>, vector<8x128xbf16>
    tpu.vector_store %arg8[%c0_20, %c0_21], %40 {strides = array<i32>} : memref<8x128xbf16, #tpu.memory_space<vmem>>, vector<8x128xbf16>,
    return
  }
  func.func @transform_0(%arg0: i32) -> (i32, i32) {
    %c0_i32 = arith.constant 0 : i32
    %c0_i32_0 = arith.constant 0 : i32
    return %arg0, %c0_i32 : i32, i32
  }
  func.func @transform_1(%arg0: i32) -> (i32, i32) {
    %c0_i32 = arith.constant 0 : i32
    %c0_i32_0 = arith.constant 0 : i32
    %c0_i32_1 = arith.constant 0 : i32
    return %c0_i32, %c0_i32_0 : i32, i32
  }
  func.func @transform_2(%arg0: i32) -> (i32, i32) {
    %c0_i32 = arith.constant 0 : i32
    %c0_i32_0 = arith.constant 0 : i32
    %c0_i32_1 = arith.constant 0 : i32
    return %c0_i32, %c0_i32_0 : i32, i32
  }
  func.func @transform_3(%arg0: i32) -> (i32, i32) {
    %c0_i32 = arith.constant 0 : i32
    %c0_i32_0 = arith.constant 0 : i32
    %c0_i32_1 = arith.constant 0 : i32
    return %c0_i32, %c0_i32_0 : i32, i32
  }
  func.func @transform_4(%arg0: i32) -> (i32, i32) {
    %c0_i32 = arith.constant 0 : i32
    %c0_i32_0 = arith.constant 0 : i32
    %c0_i32_1 = arith.constant 0 : i32
    return %c0_i32, %c0_i32_0 : i32, i32
  }
  func.func @transform_5(%arg0: i32) -> (i32, i32) {
    %c0_i32 = arith.constant 0 : i32
    %c0_i32_0 = arith.constant 0 : i32
    %c0_i32_1 = arith.constant 0 : i32
    return %c0_i32, %c0_i32_0 : i32, i32
  }
  func.func @transform_6(%arg0: i32) -> (i32, i32) {
    %c0_i32 = arith.constant 0 : i32
    %c0_i32_0 = arith.constant 0 : i32
    %c0_i32_1 = arith.constant 0 : i32
    return %c0_i32, %c0_i32_0 : i32, i32
  }
  func.func @transform_7(%arg0: i32) -> (i32, i32) {
    %c0_i32 = arith.constant 0 : i32
    %c0_i32_0 = arith.constant 0 : i32
    return %arg0, %c0_i32 : i32, i32
  }
}

module attributes {stable_mosaic.version = 11 : i64} {
  func.func @_linear_kernel_nok(%arg0: i32, %arg1: i32, %arg2: memref<8x128xbf16, #tpu.memory_space<vmem>>, %arg3: memref<128x128xbf16, #tpu.memory_space<vmem>>, %arg4: memref<1x128xf32, #tpu.memory_space<vmem>>, %arg5: memref<8x128xf32, #tpu.memory_space<vmem>>) attributes {dimension_semantics = [#tpu.dimension_semantics<parallel>, #tpu.dimension_semantics<parallel>], iteration_bounds = array<i64: 2, 1>, scalar_prefetch = 0 : i64, scratch_operands = 0 : i64, tpu.core_type = #tpu.core_type<tc>, window_params = [{transform_indices = @transform_0, window_bounds = array<i64: 8, 128>}, {transform_indices = @transform_1, window_bounds = array<i64: 128, 128>}, {transform_indices = @transform_2, window_bounds = array<i64: 1, 128>}, {transform_indices = @transform_3, window_bounds = array<i64: 8, 128>}]} {
    %c0 = arith.constant 0 : index
    %c0_0 = arith.constant 0 : index
    %0 = vector.load %arg2[%c0, %c0_0] : memref<8x128xbf16, #tpu.memory_space<vmem>>, vector<8x128xbf16>
    %c0_1 = arith.constant 0 : index
    %c0_2 = arith.constant 0 : index
    %1 = vector.load %arg3[%c0_1, %c0_2] : memref<128x128xbf16, #tpu.memory_space<vmem>>, vector<128x128xbf16>
    %cst = arith.constant dense<0.000000e+00> : vector<8x128xf32>
    %2 = tpu.matmul %0, %1, %cst {dimension_numbers = #tpu.dot_dimension_numbers<[1], [0], [0], [1], [0, 0, 1, 1], [], []>} : vector<8x128xbf16>, vector<128x128xbf16>, vector<8x128xf32> -> vector<8x128xf32>
    %c0_3 = arith.constant 0 : index
    %c0_4 = arith.constant 0 : index
    %3 = vector.load %arg4[%c0_3, %c0_4] : memref<1x128xf32, #tpu.memory_space<vmem>>, vector<1x128xf32>
    %4 = vector.broadcast %3 : vector<1x128xf32> to vector<8x128xf32>
    %5 = arith.addf %2, %4 : vector<8x128xf32>
    %c0_5 = arith.constant 0 : index
    %c0_6 = arith.constant 0 : index
    %6 = vector.load %arg5[%c0_5, %c0_6] : memref<8x128xf32, #tpu.memory_space<vmem>>, vector<8x128xf32>
    tpu.vector_store %arg5[%c0_5, %c0_6], %5 {strides = array<i32>} : memref<8x128xf32, #tpu.memory_space<vmem>>, vector<8x128xf32>,
    return
  }
  func.func @transform_0(%arg0: i32, %arg1: i32) -> (i32, i32) {
    %c0_i32 = arith.constant 0 : i32
    %c0_i32_0 = arith.constant 0 : i32
    return %arg0, %c0_i32 : i32, i32
  }
  func.func @transform_1(%arg0: i32, %arg1: i32) -> (i32, i32) {
    %c0_i32 = arith.constant 0 : i32
    %c0_i32_0 = arith.constant 0 : i32
    return %c0_i32, %arg1 : i32, i32
  }
  func.func @transform_2(%arg0: i32, %arg1: i32) -> (i32, i32) {
    %c0_i32 = arith.constant 0 : i32
    %c0_i32_0 = arith.constant 0 : i32
    return %c0_i32, %arg1 : i32, i32
  }
  func.func @transform_3(%arg0: i32, %arg1: i32) -> (i32, i32) {
    %c0_i32 = arith.constant 0 : i32
    return %arg0, %arg1 : i32, i32
  }
}

</mosaic_0001>

<bundles_post_ra>
// kernel: transformer_forward.12
= control target key start
LH: loop header
LB: loop body
LE: loop exit
PB: predicated region body
PF: predicated region fallthrough
CT: control target
= control target key end

     0   :  { %s957_s24 = smov 0   ;;  %s1143_s0 = inlined_call_operand.vmem [shape: bf16[32,128], index: 0, kind: input, shape index: {}]   ;;  %s1144_s1 = inlined_call_operand.vmem [shape: bf16[128,256], index: 1, kind: input, shape index: {}]   ;;  %s1145_s2 = inlined_call_operand.vmem [shape: f32[1,256], index: 2, kind: input, shape index: {}]   ;;  %s1146_s3 = inlined_call_operand.vmem [shape: bf16[256,128], index: 3, kind: input, shape index: {}]   ;;  %s1147_s4 = inlined_call_operand.vmem [shape: f32[1,128], index: 4, kind: input, shape index: {}]   ;;  %s1148_s5 = inlined_call_operand.vmem [shape: f32[1,128], index: 5, kind: input, shape index: {}]   ;;  %s1149_s6 = inlined_call_operand.vmem [shape: f32[1,128], index: 6, kind: input, shape index: {}]   ;;  %s1150_s7 = inlined_call_operand.vmem [shape: bf16[32,128], index: 7, kind: output, shape index: {}]  }
   0x1 LB: > { %s709_s25 = sadd.s32 4294967295, %s914_s24   ;;  %p713_p0 = scmp.ge.s32.totalorder %s914_s24, 1  ;;  %s914_s24 = sphi %s957_s24, %s17_s24  }
   0x2   : > { %p238_p1 = scmp.lt.s32.totalorder %s914_s24, 3 }
   0x4   : > { %p239_p2 = pnand %p713_p0, %p238_p1 }
   0x5   : > { %s714_s30 = sshll.u32 (!%p239_p2), %s709_s25, 1 }
   0x6   : > { %242 = sbr.rel (%p239_p2) target bundleno = 600 (0x258), region = 48  ;;  %p271_p3 = scmp.lt.s32.totalorder (!%p239_p2), %s714_s30, 3 }
   0xb   : > { %v780_v0 = vld [vmem:[%s1144_s1 + $0x70] sm:$0xf]  ;;  %v868_v1 = vld [vmem:[%s1144_s1 + $0x74] sm:$0xf0]  ;;  %v867_v2 = vld [vmem:[%s1144_s1 + $0x74] sm:$0xf] }
   0xc   : > { %v781_v3 = vor.u32 %v868_v1, %v780_v0  ;;  %v782_v4 = vld [vmem:[%s1144_s1 + $0x78] sm:$0xf0]  ;;  %v772_v5 = vld [vmem:[%s1144_s1 + $0x60] sm:$0xf]  ;;  %v866_v6 = vld [vmem:[%s1144_s1 + $0x64] sm:$0xf0] }
   0xd   : > { %v785_v7 = vor.u32 %v867_v2, %v782_v4  ;;  %v865_v8 = vld [vmem:[%s1144_s1 + $0x64] sm:$0xf]  ;;  %v774_v9 = vld [vmem:[%s1144_s1 + $0x68] sm:$0xf0]  ;;  %v773_v10 = vor.u32 %v866_v6, %v772_v5  ;;  %v764_v12 = vld [vmem:[%s1144_s1 + $0x50] sm:$0xf] }
   0xe   : > { %392 = vmatpush.bf16.msra.mxu0 %v781_v3  ;;  %v777_v11 = vor.u32 %v865_v8, %v774_v9  ;;  %v864_v13 = vld [vmem:[%s1144_s1 + $0x54] sm:$0xf0]  ;;  %v863_v14 = vld [vmem:[%s1144_s1 + $0x54] sm:$0xf]  ;;  %v766_v15 = vld [vmem:[%s1144_s1 + $0x58] sm:$0xf0] }
   0xf   : > { %406 = vmatpush.bf16.msra.mxu1 %v785_v7  ;;  %v765_v16 = vor.u32 %v864_v13, %v764_v12  ;;  %v769_v17 = vor.u32 %v863_v14, %v766_v15  ;;  %v756_v18 = vld [vmem:[%s1144_s1 + $0x40] sm:$0xf]  ;;  %v862_v19 = vld [vmem:[%s1144_s1 + $0x44] sm:$0xf0]  ;;  %v861_v20 = vld [vmem:[%s1144_s1 + $0x44] sm:$0xf] }
  0x10   : > { %v758_v21 = vld [vmem:[%s1144_s1 + $0x48] sm:$0xf0]  ;;  %v876_v22 = vld [vmem:[%s1146_s3 + $0x38] sm:$0xff]  ;;  %v757_v23 = vor.u32 %v862_v19, %v756_v18  ;;  %v748_v24 = vld [vmem:[%s1144_s1 + $0x30] sm:$0xf]  ;;  %s1152_s30 = smov (!%p271_p3, %s714_s30), 3 }
  0x11   : > { %v884_v25 = vld [vmem:[%s1146_s3 + $0x78] sm:$0xff]  ;;  %v761_v26 = vor.u32 %v861_v20, %v758_v21  ;;  %v859_v28 = vld [vmem:[%s1144_s1 + $0x34] sm:$0xf]  ;;  %558 = vmatpush.bf16.msra.mxu2 %v876_v22  ;;  %v740_v34 = vld [vmem:[%s1144_s1 + $0x20] sm:$0xf]  ;;  %s715_s16 = sshll.u32 %s1152_s30, 2 }
  0x12   : > { %393 = vmatpush.bf16.msra.mxu0 %v773_v10  ;;  %v860_v27 = vld [vmem:[%s1144_s1 + $0x34] sm:$0xf0]  ;;  %v875_v29 = vld [vmem:[%s1146_s3 + $0x30] sm:$0xff]  ;;  %v750_v30 = vld [vmem:[%s1144_s1 + $0x38] sm:$0xf0]  ;;  %572 = vmatpush.bf16.msra.mxu3 %v884_v25  ;;  %s1095_s23 = scalar_lea.vmem %s1143_s0, %s715_s16  ;;  %s280_s10 = scalar_lea.vmem %s1150_s7, %s715_s16 }
  0x13   : > { %407 = vmatpush.bf16.msra.mxu1 %v777_v11  ;;  %v883_v31 = vld [vmem:[%s1146_s3 + $0x70] sm:$0xff]  ;;  %v749_v32 = vor.u32 %v860_v27, %v748_v24  ;;  %v753_v33 = vor.u32 %v859_v28, %v750_v30  ;;  %v858_v35 = vld [vmem:[%s1144_s1 + $0x24] sm:$0xf0]  ;;  %v857_v37 = vld [vmem:[%s1144_s1 + $0x24] sm:$0xf] }
  0x14   : > { %v874_v36 = vld [vmem:[%s1146_s3 + $0x28] sm:$0xff]  ;;  %v741_v40 = vor.u32 %v858_v35, %v740_v34  ;;  %v732_v42 = vld [vmem:[%s1144_s1 + $0x10] sm:$0xf]  ;;  %v856_v43 = vld [vmem:[%s1144_s1 + $0x14] sm:$0xf0] }
  0x15   : > { %559 = vmatpush.bf16.msra.mxu2 %v875_v29  ;;  %v742_v38 = vld [vmem:[%s1144_s1 + $0x28] sm:$0xf0]  ;;  %v873_v44 = vld [vmem:[%s1146_s3 + $0x20] sm:$0xff]  ;;  %v855_v45 = vld [vmem:[%s1144_s1 + $0x14] sm:$0xf]  ;;  %v733_v48 = vor.u32 %v856_v43, %v732_v42 }
  0x16   : > { %394 = vmatpush.bf16.msra.mxu0 %v765_v16  ;;  %573 = vmatpush.bf16.msra.mxu3 %v883_v31  ;;  %v882_v39 = vld [vmem:[%s1146_s3 + $0x68] sm:$0xff]  ;;  %v745_v41 = vor.u32 %v857_v37, %v742_v38  ;;  %v734_v46 = vld [vmem:[%s1144_s1 + $0x18] sm:$0xf0]  ;;  %v881_v47 = vld [vmem:[%s1146_s3 + $0x60] sm:$0xff] }
  0x17   : > { %408 = vmatpush.bf16.msra.mxu1 %v769_v17  ;;  %v737_v49 = vor.u32 %v855_v45, %v734_v46  ;;  %v724_v50 = vld [vmem:[%s1144_s1] sm:$0xf]  ;;  %v854_v51 = vld [vmem:[%s1144_s1 + $0x4] sm:$0xf0]  ;;  %v853_v52 = vld [vmem:[%s1144_s1 + $0x4] sm:$0xf] }
  0x18   : > { %v726_v53 = vld [vmem:[%s1144_s1 + $0x8] sm:$0xf0]  ;;  %v725_v54 = vor.u32 %v854_v51, %v724_v50  ;;  %v852_v56 = vld [vmem:[%s1095_s23] sm:$0xff]  ;;  %v872_v57 = vld [vmem:[%s1146_s3 + $0x18] sm:$0xff] }
  0x19   : > { %560 = vmatpush.bf16.msra.mxu2 %v874_v36  ;;  %v729_v55 = vor.u32 %v853_v52, %v726_v53  ;;  %v880_v58 = vld [vmem:[%s1146_s3 + $0x58] sm:$0xff]  ;;  %v871_v59 = vld [vmem:[%s1146_s3 + $0x10] sm:$0xff]  ;;  %v870_v61 = vld [vmem:[%s1146_s3 + $0x8] sm:$0xff] }
  0x1a   : > { %395 = vmatpush.bf16.msra.mxu0 %v757_v23  ;;  %574 = vmatpush.bf16.msra.mxu3 %v882_v39  ;;  %v879_v60 = vld [vmem:[%s1146_s3 + $0x50] sm:$0xff]  ;;  %v878_v62 = vld [vmem:[%s1146_s3 + $0x48] sm:$0xff]  ;;  %v869_v63 = vld [vmem:[%s1146_s3] sm:$0xff] }
  0x1b   : > { %409 = vmatpush.bf16.msra.mxu1 %v761_v26  ;;  %v877_v0 = vld [vmem:[%s1146_s3 + $0x40] sm:$0xff] }
  0x1c   : > { %v300_v1 = vld [vmem:[%s1145_s2] sm:$0x3] }
  0x1d   : > { %561 = vmatpush.bf16.msra.mxu2 %v873_v44  ;;  %v302_v4 = vperm.slane %v300_v1, 0  ;;  %v303_v5 = vperm.slane %v300_v1, 1  ;;  %v899_v18 = vld [vmem:[%s1147_s4] ss:$0 sm:$0xff] }
  0x1e   : > { %396 = vmatpush.bf16.msra.mxu0 %v749_v32  ;;  %575 = vmatpush.bf16.msra.mxu3 %v881_v47  ;;  %v282_v19 = vld [vmem:[%s1095_s23] sm:$0xff]   ;;  %v916_v32 = vmov 128.0  }
  0x1f   : > { %410 = vmatpush.bf16.msra.mxu1 %v753_v33  ;;  %v586_v23 = vunpack.c.l.bf16 %v282_v19  ;;  %v587_v28 = vunpack.c.h.bf16 %v282_v19  ;;  %902 = vrcp.f32 %v916_v32  ;;  %v900_v1 = vld [vmem:[%s1148_s5] ss:$0 sm:$0xff] }
  0x21   : > { %562 = vmatpush.bf16.msra.mxu2 %v872_v57 }
  0x22   : > { %397 = vmatpush.bf16.msra.mxu0 %v741_v40  ;;  %576 = vmatpush.bf16.msra.mxu3 %v880_v58 }
  0x23   : > { %411 = vmatpush.bf16.msra.mxu1 %v745_v41 }
  0x25   : > { %563 = vmatpush.bf16.msra.mxu2 %v871_v59  ;;  %v903_v33 = vpop.eup %902 }
  0x26   : > { %398 = vmatpush.bf16.msra.mxu0 %v733_v48  ;;  %577 = vmatpush.bf16.msra.mxu3 %v879_v60  ;;  %v595_v34 = vmul.f32 128.0, %v903_v33  ;;  %vm599_vm0 = vweird.f32 %v903_v33 }
  0x27   : > { %412 = vmatpush.bf16.msra.mxu1 %v737_v49 }
  0x28   : > { %v596_v35 = vsub.f32 1.0, %v595_v34 }
  0x29   : > { %564 = vmatpush.bf16.msra.mxu2 %v870_v61 }
  0x2a   : > { %399 = vmatpush.bf16.msra.mxu0 %v725_v54  ;;  %578 = vmatpush.bf16.msra.mxu3 %v878_v62  ;;  %v597_v36 = vmul.f32 %v903_v33, %v596_v35 }
  0x2b   : > { %413 = vmatpush.bf16.msra.mxu1 %v729_v55 }
  0x2c   : > { %v598_v37 = vadd.f32 %v903_v33, %v597_v36 }
  0x2d   : > { %400 = vmatmul.bf16.vlgmr.msra.gmra.mxu0 %v852_v56  ;;  %565 = vmatpush.bf16.msra.mxu2 %v869_v63 }
  0x2e   : > { %414 = vmatmul.bf16.vlgmr.msra.gmra.mxu1 %v852_v56  ;;  %579 = vmatpush.bf16.msra.mxu3 %v877_v0  ;;  %v600_v38 = vsel %vm599_vm0, %v903_v33, %v598_v37 }
  0xaa   : > { %v401_v2 = vpop.f32.mrf.mxu0 }
  0xab   : > { %v415_v3 = vpop.f32.mrf.mxu1  ;;  %v402_v6 = vadd.f32 %v401_v2, %v302_v4 }
  0xac   : > { %v416_v7 = vadd.f32 %v415_v3, %v303_v5 }
  0xad   : > { %v420_v12 = vmax.f32 %v402_v6, 0.0 }
  0xae   : > { %v421_v14 = vmax.f32 %v416_v7, 0.0 }
  0xb2   : > { %v403_v8 = vpop.f32.mrf.mxu0 }
  0xb3   : > { %v404_v9 = vadd.f32 %v403_v8, %v302_v4  ;;  %v417_v10 = vpop.f32.mrf.mxu1 }
  0xb4   : > { %v418_v11 = vadd.f32 %v417_v10, %v303_v5  ;;  %v901_v5 = vld [vmem:[%s1149_s6] ss:$0 sm:$0xff] }
  0xb5   : > { %v422_v13 = vmax.f32 %v404_v9, 0.0 }
  0xb6   : > { %v423_v15 = vmax.f32 %v418_v11, 0.0 }
  0xb7   : > { %v424_v16 = vpack.c.bf16 %v422_v13, %v420_v12 }
  0xb8   : > { %v425_v17 = vpack.c.bf16 %v423_v15, %v421_v14 }
  0xb9   : > { %566 = vmatmul.bf16.vlgmr.msra.gmra.mxu2 %v424_v16 }
  0xba   : > { %580 = vmatmul.bf16.vlgmr.msra.gmra.mxu3 %v425_v17 }
 0x13c   : > { %v567_v20 = vpop.f32.mrf.mxu2 }
 0x13d   : > { %v568_v21 = vadd.f32 %v899_v18, %v567_v20  ;;  %v581_v22 = vpop.f32.mrf.mxu3 }
 0x13f   : > { %v582_v24 = vadd.f32 %v581_v22, %v568_v21 }
 0x141   : > { %v588_v25 = vadd.f32 %v586_v23, %v582_v24 }
 0x143   : > { %590 = vadd.xlane.f32.xlu0 %v588_v25 }
 0x144   : > { %v569_v26 = vpop.f32.mrf.mxu2 }
 0x145   : > { %v570_v27 = vadd.f32 %v899_v18, %v569_v26  ;;  %v583_v29 = vpop.f32.mrf.mxu3 }
 0x147   : > { %v584_v30 = vadd.f32 %v583_v29, %v570_v27 }
 0x149   : > { %v589_v31 = vadd.f32 %v587_v28, %v584_v30 }
 0x14b   : > { %592 = vadd.xlane.f32.xlu0 %v589_v31 }
 0x1b6   : > { %v591_v39 = vpop.xlane.xlu0 %590 }
 0x1b7   : > { %v601_v40 = vmul.f32 %v600_v38, %v591_v39 }
 0x1b9   : > { %v603_v41 = vsub.f32 %v588_v25, %v601_v40 }
 0x1bb   : > { %v605_v42 = vmul.f32 %v603_v41, %v603_v41 }
 0x1bd   : > { %607 = vadd.xlane.f32.xlu1 %v605_v42 }
 0x1be   : > { %v593_v43 = vpop.xlane.xlu0 %592 }
 0x1bf   : > { %v602_v44 = vmul.f32 %v600_v38, %v593_v43 }
 0x1c1   : > { %v604_v45 = vsub.f32 %v589_v31, %v602_v44 }
 0x1c3   : > { %v606_v46 = vmul.f32 %v604_v45, %v604_v45 }
 0x1c5   : > { %609 = vadd.xlane.f32.xlu1 %v606_v46 }
 0x230   : > { %v608_v47 = vpop.xlane.xlu1 %607 }
 0x231   : > { %v611_v48 = vmul.f32 %v608_v47, %v600_v38 }
 0x233   : > { %v613_v49 = vadd.f32 1e-05, %v611_v48 }
 0x235   : > { %904 = vrsqrt.f32 %v613_v49  ;;  %vm621_vm2 = vweird.f32 %v613_v49 }
 0x238   : > { %v610_v50 = vpop.xlane.xlu1 %609 }
 0x239   : > { %v612_v51 = vmul.f32 %v610_v50, %v600_v38 }
 0x23b   : > { %v905_v52 = vpop.eup %904  ;;  %v614_v53 = vadd.f32 1e-05, %v612_v51 }
 0x23c   : > { %v616_v54 = vmul.f32 %v905_v52, %v613_v49  ;;  %vm622_vm1 = vweird.f32 %v905_v52 }
 0x23d   : > { %906 = vrsqrt.f32 %v614_v53  ;;  %vm623_vm3 = vmor %vm621_vm2, %vm622_vm1  ;;  %vm631_vm5 = vweird.f32 %v614_v53 }
 0x23e   : > { %v617_v55 = vmul.f32 %v905_v52, %v616_v54 }
 0x240   : > { %v618_v56 = vmul.f32 0.5, %v617_v55 }
 0x242   : > { %v619_v57 = vsub.f32 1.5, %v618_v56 }
 0x243   : > { %v907_v58 = vpop.eup %906 }
 0x244   : > { %v620_v59 = vmul.f32 %v905_v52, %v619_v57  ;;  %v626_v60 = vmul.f32 %v907_v58, %v614_v53  ;;  %vm632_vm4 = vweird.f32 %v907_v58 }
 0x245   : > { %vm633_vm6 = vmor %vm631_vm5, %vm632_vm4 }
 0x246   : > { %v627_v61 = vmul.f32 %v907_v58, %v626_v60  ;;  %v624_v62 = vsel %vm623_vm3, %v905_v52, %v620_v59 }
 0x247   : > { %v635_v2 = vmul.f32 %v624_v62, %v603_v41 }
 0x248   : > { %v628_v63 = vmul.f32 0.5, %v627_v61 }
 0x249   : > { %v641_v6 = vmul.f32 %v900_v1, %v635_v2 }
 0x24a   : > { %v629_v0 = vsub.f32 1.5, %v628_v63 }
 0x24b   : > { %v647_v9 = vadd.f32 %v901_v5, %v641_v6 }
 0x24c   : > { %v630_v3 = vmul.f32 %v907_v58, %v629_v0 }
 0x24e   : > { %v634_v4 = vsel %vm633_vm6, %v907_v58, %v630_v3 }
 0x24f   : > { %v636_v7 = vmul.f32 %v634_v4, %v604_v45 }
 0x251   : > { %v642_v8 = vmul.f32 %v900_v1, %v636_v7 }
 0x253   : > { %v648_v10 = vadd.f32 %v901_v5, %v642_v8 }
 0x255   : > { %v888_v11 = vpack.c.bf16 %v648_v10, %v647_v9 }
 0x257   : > { %889 = vst [vmem:[%s280_s10] sm:$0xff] %v888_v11  }
 0x258 PF: > { %s17_s24 = sadd.s32 1, %s914_s24  }
 0x259   : > { %p14_p4 = scmp.ge.s32.totalorder %s17_s24, 4  }
 0x25b   :  { %16 = sbr.rel (!%p14_p4) target bundleno = 1 (0x1), region = 78 }

// kernel: transformer_forward.11
= control target key start
LH: loop header
LB: loop body
LE: loop exit
PB: predicated region body
PF: predicated region fallthrough
CT: control target
= control target key end

     0   :  { %s1432_s27 = smov 0   ;;  %s1723_s0 = inlined_call_operand.vmem [shape: bf16[2,16,128], index: 0, kind: input, shape index: {}]   ;;  %s1724_s1 = inlined_call_operand.vmem [shape: bf16[128,384], index: 1, kind: input, shape index: {}]   ;;  %s1725_s2 = inlined_call_operand.vmem [shape: f32[1,384], index: 2, kind: input, shape index: {}]   ;;  %s1726_s3 = inlined_call_operand.vmem [shape: bf16[128,128], index: 3, kind: input, shape index: {}]   ;;  %s1727_s4 = inlined_call_operand.vmem [shape: f32[1,128], index: 4, kind: input, shape index: {}]   ;;  %s1728_s5 = inlined_call_operand.vmem [shape: f32[2,16,16], index: 5, kind: input, shape index: {}]   ;;  %s1729_s6 = inlined_call_operand.vmem [shape: f32[1,128], index: 6, kind: input, shape index: {}]   ;;  %s1730_s7 = inlined_call_operand.vmem [shape: f32[1,128], index: 7, kind: input, shape index: {}]   ;;  %s1731_s8 = inlined_call_operand.vmem [shape: bf16[2,16,128], index: 8, kind: output, shape index: {}]  }
   0x1 LB: > { %s1124_s28 = sadd.s32 4294967295, %s1381_s27   ;;  %p1128_p0 = scmp.ge.s32.totalorder %s1381_s27, 1  ;;  %s1381_s27 = sphi %s1432_s27, %s18_s27  }
   0x2   : > { %p272_p1 = scmp.lt.s32.totalorder %s1381_s27, 3 }
   0x4   : > { %p273_p2 = pnand %p1128_p0, %p272_p1 }
   0x5   : > { %p311_p3 = scmp.lt.s32.totalorder (!%p273_p2), %s1124_s28, 1  ;;  %s1383_s10 = smov (!%p273_p2), 96  }
   0x6   : > { %276 = sbr.rel (%p273_p2) target bundleno = 1728 (0x6c0), region = 52  ;;  %s1384_s11 = smov (!%p273_p2), 32  }
   0x7   : > { %s1385_s12 = smov (!%p273_p2), 64  }
   0xb   : > { %v1225_v0 = vld [vmem:[%s1724_s1 + $0xa8] sm:$0xf]  ;;  %v1307_v1 = vld [vmem:[%s1724_s1 + $0xb0] sm:$0xf0]  ;;  %v1306_v2 = vld [vmem:[%s1724_s1 + $0xac] sm:$0xf] }
   0xc   : > { %v1226_v3 = vor.u32 %v1307_v1, %v1225_v0  ;;  %v1227_v4 = vld [vmem:[%s1724_s1 + $0xb4] sm:$0xf0]  ;;  %v1213_v5 = vld [vmem:[%s1724_s1 + $0x90] sm:$0xf]  ;;  %v1304_v6 = vld [vmem:[%s1724_s1 + $0x98] sm:$0xf0] }
   0xd   : > { %v1230_v7 = vor.u32 %v1306_v2, %v1227_v4  ;;  %v1303_v8 = vld [vmem:[%s1724_s1 + $0x94] sm:$0xf]  ;;  %v1215_v9 = vld [vmem:[%s1724_s1 + $0x9c] sm:$0xf0]  ;;  %v1214_v10 = vor.u32 %v1304_v6, %v1213_v5  ;;  %v1201_v12 = vld [vmem:[%s1724_s1 + $0x78] sm:$0xf] }
   0xe   : > { %503 = vmatpush.bf16.msra.mxu0 %v1226_v3  ;;  %v1218_v11 = vor.u32 %v1303_v8, %v1215_v9  ;;  %v1301_v13 = vld [vmem:[%s1724_s1 + $0x80] sm:$0xf0]  ;;  %v1300_v14 = vld [vmem:[%s1724_s1 + $0x7c] sm:$0xf]  ;;  %v1203_v15 = vld [vmem:[%s1724_s1 + $0x84] sm:$0xf0] }
   0xf   : > { %517 = vmatpush.bf16.msra.mxu1 %v1230_v7  ;;  %v1202_v16 = vor.u32 %v1301_v13, %v1201_v12  ;;  %v1206_v17 = vor.u32 %v1300_v14, %v1203_v15  ;;  %v1189_v18 = vld [vmem:[%s1724_s1 + $0x60] sm:$0xf]  ;;  %v1298_v19 = vld [vmem:[%s1724_s1 + $0x68] sm:$0xf0]  ;;  %v1297_v20 = vld [vmem:[%s1724_s1 + $0x64] sm:$0xf] }
  0x10   : > { %v1191_v21 = vld [vmem:[%s1724_s1 + $0x6c] sm:$0xf0]  ;;  %v1190_v22 = vor.u32 %v1298_v19, %v1189_v18  ;;  %v1308_v24 = vld [vmem:[%s1724_s1 + $0xb8] sm:$0xf0]  ;;  %v1221_v25 = vld [vmem:[%s1724_s1 + $0x98] sm:$0xf] }
  0x11   : > { %v1233_v23 = vld [vmem:[%s1724_s1 + $0xb0] sm:$0xf]  ;;  %v1194_v26 = vor.u32 %v1297_v20, %v1191_v21  ;;  %v1177_v27 = vld [vmem:[%s1724_s1 + $0x48] sm:$0xf]  ;;  %v1295_v28 = vld [vmem:[%s1724_s1 + $0x50] sm:$0xf0] }
  0x12   : > { %504 = vmatpush.bf16.msra.mxu0 %v1214_v10  ;;  %v1234_v29 = vor.u32 %v1308_v24, %v1233_v23  ;;  %v1305_v30 = vld [vmem:[%s1724_s1 + $0xa0] sm:$0xf0]  ;;  %v1294_v31 = vld [vmem:[%s1724_s1 + $0x4c] sm:$0xf]  ;;  %v1179_v32 = vld [vmem:[%s1724_s1 + $0x54] sm:$0xf0]  ;;  %v1178_v34 = vor.u32 %v1295_v28, %v1177_v27 }
  0x13   : > { %518 = vmatpush.bf16.msra.mxu1 %v1218_v11  ;;  %v1222_v33 = vor.u32 %v1305_v30, %v1221_v25  ;;  %v1209_v35 = vld [vmem:[%s1724_s1 + $0x80] sm:$0xf]  ;;  %v1302_v36 = vld [vmem:[%s1724_s1 + $0x88] sm:$0xf0]  ;;  %v1182_v37 = vor.u32 %v1294_v31, %v1179_v32  ;;  %v1165_v38 = vld [vmem:[%s1724_s1 + $0x30] sm:$0xf] }
  0x14   : > { %531 = vmatpush.bf16.msra.mxu2 %v1234_v29  ;;  %v1292_v39 = vld [vmem:[%s1724_s1 + $0x38] sm:$0xf0]  ;;  %v1291_v40 = vld [vmem:[%s1724_s1 + $0x34] sm:$0xf]  ;;  %v1167_v41 = vld [vmem:[%s1724_s1 + $0x3c] sm:$0xf0]  ;;  %v1210_v42 = vor.u32 %v1302_v36, %v1209_v35 }
  0x15   : > { %v1166_v43 = vor.u32 %v1292_v39, %v1165_v38  ;;  %v1197_v44 = vld [vmem:[%s1724_s1 + $0x68] sm:$0xf]  ;;  %v1299_v45 = vld [vmem:[%s1724_s1 + $0x70] sm:$0xf0]  ;;  %v1170_v46 = vor.u32 %v1291_v40, %v1167_v41  ;;  %v1153_v47 = vld [vmem:[%s1724_s1 + $0x18] sm:$0xf] }
  0x16   : > { %505 = vmatpush.bf16.msra.mxu0 %v1202_v16  ;;  %v1289_v48 = vld [vmem:[%s1724_s1 + $0x20] sm:$0xf0]  ;;  %s1733_s28 = smov (!%p311_p3, %s1124_s28), 1  ;;  %v1288_v49 = vld [vmem:[%s1724_s1 + $0x1c] sm:$0xf]  ;;  %v1198_v51 = vor.u32 %v1299_v45, %v1197_v44  ;;  %vm559_vm0 = vcmask 261120  }
  0x17   : > { %519 = vmatpush.bf16.msra.mxu1 %v1206_v17  ;;  %v1155_v50 = vld [vmem:[%s1724_s1 + $0x24] sm:$0xf0]  ;;  %v1154_v52 = vor.u32 %v1289_v48, %v1153_v47  ;;  %v1185_v53 = vld [vmem:[%s1724_s1 + $0x50] sm:$0xf]  ;;  %v1296_v54 = vld [vmem:[%s1724_s1 + $0x58] sm:$0xf0] }
  0x18   : > { %532 = vmatpush.bf16.msra.mxu2 %v1222_v33  ;;  %v1158_v55 = vor.u32 %v1288_v49, %v1155_v50  ;;  %v1141_v56 = vld [vmem:[%s1724_s1] sm:$0xf]  ;;  %v1286_v57 = vld [vmem:[%s1724_s1 + $0x8] sm:$0xf0]  ;;  %s1281_s29 = sshll.u32 %s1733_s28, 3  ;;  %v1186_v60 = vor.u32 %v1296_v54, %v1185_v53  ;;  %s1282_s13 = sshll.u32 %s1733_s28, 4 }
  0x19   : > { %v1285_v58 = vld [vmem:[%s1724_s1 + $0x4] sm:$0xf]  ;;  %v1143_v59 = vld [vmem:[%s1724_s1 + $0xc] sm:$0xf0]  ;;  %v1142_v61 = vor.u32 %v1286_v57, %v1141_v56  ;;  %s1578_s14 = scalar_lea.vmem %s1723_s0, %s1281_s29  ;;  %v1173_v62 = vld [vmem:[%s1724_s1 + $0x38] sm:$0xf]  ;;  %s320_s17 = scalar_lea.vmem %s1728_s5, %s1282_s13 }
  0x1a   : > { %506 = vmatpush.bf16.msra.mxu0 %v1190_v22  ;;  %v1293_v63 = vld [vmem:[%s1724_s1 + $0x40] sm:$0xf0]  ;;  %v1146_v0 = vor.u32 %v1285_v58, %v1143_v59  ;;  %v1161_v3 = vld [vmem:[%s1724_s1 + $0x20] sm:$0xf]  ;;  %v1290_v4 = vld [vmem:[%s1724_s1 + $0x28] sm:$0xf0]  ;;  %s325_s23 = scalar_lea.vmem %s1731_s8, %s1281_s29 }
  0x1b   : > { %520 = vmatpush.bf16.msra.mxu1 %v1194_v26  ;;  %v1284_v1 = vld [vmem:[%s1578_s14] sm:$0xff]  ;;  %v1174_v2 = vor.u32 %v1293_v63, %v1173_v62  ;;  %v1162_v5 = vor.u32 %v1290_v4, %v1161_v3  ;;  %v1149_v6 = vld [vmem:[%s1724_s1 + $0x8] sm:$0xf]  ;;  %v1287_v7 = vld [vmem:[%s1724_s1 + $0x10] sm:$0xf0]  ;;  %vm584_vm1 = vcmask 130048  }
  0x1c   : > { %533 = vmatpush.bf16.msra.mxu2 %v1210_v42  ;;  %v1150_v8 = vor.u32 %v1287_v7, %v1149_v6  ;;  %v361_v9 = vld [vmem:[%s1725_s2] sm:$0x7]  ;;  %v1624_v47 = vld [vmem:[%s320_s17 + $0x8] sm:$0xff] }
  0x1d   : > { %v363_v12 = vperm.slane %v361_v9, 0  ;;  %v364_v13 = vperm.slane %v361_v9, 1  ;;  %v365_v25 = vperm.slane %v361_v9, 2  ;;  %v1620_v42 = vld [vmem:[%s320_s17] sm:$0xff] }
  0x1e   : > { %507 = vmatpush.bf16.msra.mxu0 %v1178_v34 }
  0x1f   : > { %521 = vmatpush.bf16.msra.mxu1 %v1182_v37 }
  0x20   : > { %534 = vmatpush.bf16.msra.mxu2 %v1198_v51  ;;  %v1310_v51 = vld [vmem:[%s1726_s3 + $0x8] sm:$0xff] }
  0x22   : > { %508 = vmatpush.bf16.msra.mxu0 %v1166_v43 }
  0x23   : > { %522 = vmatpush.bf16.msra.mxu1 %v1170_v46 }
  0x24   : > { %535 = vmatpush.bf16.msra.mxu2 %v1186_v60 }
  0x26   : > { %509 = vmatpush.bf16.msra.mxu0 %v1154_v52  ;;  %v1309_v52 = vld [vmem:[%s1726_s3] sm:$0xff] }
  0x27   : > { %523 = vmatpush.bf16.msra.mxu1 %v1158_v55 }
  0x28   : > { %536 = vmatpush.bf16.msra.mxu2 %v1174_v2 }
  0x2a   : > { %510 = vmatpush.bf16.msra.mxu0 %v1142_v61 }
  0x2b   : > { %524 = vmatpush.bf16.msra.mxu1 %v1146_v0 }
  0x2c   : > { %537 = vmatpush.bf16.msra.mxu2 %v1162_v5 }
  0x2d   : > { %511 = vmatmul.bf16.vlgmr.msra.gmra.mxu0 %v1284_v1 }
  0x2e   : > { %525 = vmatmul.bf16.vlgmr.msra.gmra.mxu1 %v1284_v1 }
  0x30   : > { %538 = vmatpush.bf16.msra.mxu2 %v1150_v8 }
  0x33   : > { %539 = vmatmul.bf16.vlgmr.msra.gmra.mxu2 %v1284_v1 }
  0x34   : > { %762 = vmatpush.bf16.msrb.mxu2 %v1310_v51 }
  0x38   : > { %763 = vmatpush.bf16.msrb.mxu2 %v1309_v52 }
  0xaa   : > { %v512_v10 = vpop.f32.mrf.mxu0 }
  0xab   : > { %v526_v11 = vpop.f32.mrf.mxu1  ;;  %v513_v14 = vadd.f32 %v512_v10, %v363_v12 }
  0xac   : > { %v527_v15 = vadd.f32 %v526_v11, %v364_v13 }
  0xae   : > { %v545_v19 = vpack.c.bf16 %v527_v15, %v513_v14 }
  0xb0   : > { %v556_v22 = vunpack.c.h.b16 %v545_v19  ;;  %v553_v30 = vunpack.c.l.b16 %v545_v19 }
  0xb2   : > { %v514_v16 = vpop.f32.mrf.mxu0 }
  0xb3   : > { %v515_v17 = vadd.f32 %v514_v16, %v363_v12  ;;  %v528_v18 = vpop.f32.mrf.mxu1 }
  0xb4   : > { %v529_v20 = vadd.f32 %v528_v18, %v364_v13 }
  0xb6   : > { %v547_v21 = vpack.c.bf16 %v529_v20, %v515_v17  ;;  %v540_v26 = vpop.f32.mrf.mxu2 }
  0xb7   : > { %v541_v29 = vadd.f32 %v540_v26, %v365_v25 }
  0xb8   : > { %v557_v23 = vunpack.c.h.b16 %v547_v21  ;;  %v554_v28 = vunpack.c.l.b16 %v547_v21 }
  0xb9   : > { %v546_v32 = vpack.c.bf16 %v541_v29, %v541_v29 }
  0xba   : > { %v1602_v24 = vpack.c.b16 %v557_v23, %v556_v22  ;;  %v555_v31 = vpack.c.b16 %v554_v28, %v553_v30 }
  0xbb   : > { %v610_v35 = vunpack.c.l.b16 %v546_v32 }
  0xbc   : > { %638 = vrot.lane.b32.xlu2 %v1602_v24, %s1383_s10  ;;  %v564_v27 = vsel %vm559_vm0, %v1602_v24, 0 }
  0xbd   : > { %573 = vmatpush.bf16.xpose.msra.mxu3 %v564_v27 }
  0xbe   : > { %v542_v33 = vpop.f32.mrf.mxu2 }
  0xbf   : > { %v543_v34 = vadd.f32 %v542_v33, %v365_v25 }
  0xc1   : > { %v548_v36 = vpack.c.bf16 %v543_v34, %v543_v34 }
  0xc3   : > { %v611_v37 = vunpack.c.l.b16 %v548_v36 }
  0xc4   : > { %636 = vrot.lane.b32.xlu2 %v555_v31, %s1383_s10  ;;  %1235 = vmatmul.msk.bf16.vlgmr.msra.gmra.mxu3 %vm559_vm0, %v555_v31 }
  0xc5   : > { %v1610_v38 = vpack.c.b16 %v611_v37, %v610_v35 }
  0xc7   : > { %624 = vmatpush.bf16.msrb.mxu3 %v1610_v38 }
  0xcc   : > { %877 = vrot.lane.b32.xlu2 %v555_v31, %s1384_s11 }
  0xd4   : > { %770 = vrot.lane.b32.xlu2 %v555_v31, %s1385_s12 }
 0x116   : > { %v639_v39 = vpop.permute.xlu2 %638 }
 0x117   : > { %v644_v40 = vsel %vm559_vm0, %v639_v39, 0 }
 0x118   : > { %653 = vmatpush.bf16.xpose.msra.mxu3 %v644_v40 }
 0x11e   : > { %v637_v8 = vpop.permute.xlu2 %636 }
 0x126   : > { %v878_v11 = vpop.permute.xlu2 %877 }
 0x12e   : > { %v771_v12 = vpop.permute.xlu2 %770 }
 0x147   : > { %v575_v41 = vpop.f32.mrf.mxu3 }
 0x148   : > { %v580_v43 = vmul.f32 0.17677669, %v575_v41 }
 0x14a   : > { %v582_v44 = vadd.f32 %v580_v43, %v1620_v42 }
 0x14c   : > { %v585_v45 = vsel %vm584_vm1, %v582_v44, -inf }
 0x14d   : > { %586 = vmax.xlane.f32.xlu0 %v585_v45 }
 0x14f   : > { %v577_v46 = vpop.f32.mrf.mxu3 }
 0x150   : > { %v581_v48 = vmul.f32 0.17677669, %v577_v46 }
 0x152   : > { %v583_v49 = vadd.f32 %v581_v48, %v1624_v47 }
 0x154   : > { %v588_v50 = vsel %vm584_vm1, %v583_v49, -inf }
 0x155   : > { %589 = vmax.xlane.f32.xlu0 %v588_v50 }
 0x169   : > { %879 = vrot.lane.b32.xlu0 %v1602_v24, %s1384_s11 }
 0x1c0   : > { %v587_v53 = vpop.xlane.xlu0 %586 }
 0x1c1   : > { %v591_v54 = vsub.f32 %v582_v44, %v587_v53 }
 0x1c3   : > { %v593_v55 = vmul.f32 1.442695, %v591_v54 }
 0x1c5   : > { %1337 = vpow2.f32 %v593_v55 }
 0x1c8   : > { %v590_v56 = vpop.xlane.xlu0 %589 }
 0x1c9   : > { %v592_v57 = vsub.f32 %v583_v49, %v590_v56 }
 0x1cb   : > { %v1338_v58 = vpop.eup %1337  ;;  %v595_v59 = vmul.f32 1.442695, %v592_v57 }
 0x1cc   : > { %v597_v60 = vsel %vm584_vm1, %v1338_v58, 0.0 }
 0x1cd   : > { %1339 = vpow2.f32 %v595_v59  ;;  %598 = vadd.xlane.f32.xlu1 %v597_v60 }
 0x1d3   : > { %v1340_v61 = vpop.eup %1339 }
 0x1d4   : > { %v600_v62 = vsel %vm584_vm1, %v1340_v61, 0.0 }
 0x1d5   : > { %601 = vadd.xlane.f32.xlu1 %v600_v62 }
 0x1db   : > { %v880_v63 = vpop.permute.xlu0 %879 }
 0x1dc   : > { %v885_v0 = vsel %vm559_vm0, %v880_v63, 0 }
 0x1dd   : > { %894 = vmatpush.bf16.xpose.msra.mxu2 %v885_v0 }
 0x1ee   : > { %772 = vrot.lane.b32.xlu1 %v1602_v24, %s1385_s12 }
 0x240   : > { %v599_v1 = vpop.xlane.xlu1 %598 }
 0x241   : > { %1341 = vrcp.f32 %v599_v1 }
 0x247   : > { %v1342_v3 = vpop.eup %1341 }
 0x248   : > { %v602_v2 = vpop.xlane.xlu1 %601  ;;  %v605_v5 = vmul.f32 %v1342_v3, %v1338_v58 }
 0x249   : > { %1343 = vrcp.f32 %v602_v2 }
 0x24f   : > { %v1344_v4 = vpop.eup %1343 }
 0x250   : > { %v606_v6 = vmul.f32 %v1344_v4, %v1340_v61 }
 0x252   : > { %v607_v7 = vpack.c.bf16 %v606_v6, %v605_v5 }
 0x254   : > { %1236 = vmatmul.msk.bf16.vlgmr.msrb.gmra.mxu3 %vm584_vm1, %v607_v7 }
 0x260   : > { %v773_v9 = vpop.permute.xlu1 %772 }
 0x261   : > { %v778_v10 = vsel %vm559_vm0, %v773_v9, 0 }
 0x262   : > { %787 = vmatpush.bf16.xpose.msrb.mxu3 %v778_v10 }
 0x264   : > { %1237 = vmatmul.msk.bf16.vlgmr.msra.gmra.mxu3 %vm559_vm0, %v637_v8 }
 0x274   : > { %1257 = vmatmul.msk.bf16.vlgmr.msrb.gmra.mxu3 %vm559_vm0, %v771_v12 }
 0x2d7   : > { %v626_v13 = vpop.f32.mrf.mxu3 }
 0x2df   : > { %v628_v14 = vpop.f32.mrf.mxu3 }
 0x2e0   : > { %v631_v15 = vpack.c.bf16 %v628_v14, %v626_v13 }
 0x2e2   : > { %1256 = vmatmul.msk.bf16.vlgmr.msrb.gmra.mxu2 %vm559_vm0, %v631_v15 }
 0x2e7   : > { %v655_v16 = vpop.f32.mrf.mxu3 }
 0x2e8   : > { %v660_v17 = vmul.f32 0.17677669, %v655_v16 }
 0x2ea   : > { %v662_v18 = vadd.f32 %v660_v17, %v1620_v42  ;;  %v1312_v17 = vld [vmem:[%s1726_s3 + $0x18] sm:$0xff] }
 0x2eb   : > { %733 = vmatpush.bf16.msrb.mxu1 %v1312_v17 }
 0x2ec   : > { %v664_v19 = vsel %vm584_vm1, %v662_v18, -inf }
 0x2ed   : > { %665 = vmax.xlane.f32.xlu2 %v664_v19 }
 0x2ef   : > { %v657_v20 = vpop.f32.mrf.mxu3 }
 0x2f0   : > { %v661_v21 = vmul.f32 0.17677669, %v657_v20 }
 0x2f2   : > { %1268 = vmatmul.msk.bf16.vlgmr.msra.gmra.mxu2 %vm559_vm0, %v878_v11  ;;  %v663_v22 = vadd.f32 %v661_v21, %v1624_v47 }
 0x2f4   : > { %v667_v23 = vsel %vm584_vm1, %v663_v22, -inf }
 0x2f5   : > { %668 = vmax.xlane.f32.xlu0 %v667_v23 }
 0x2f7   : > { %v789_v24 = vpop.f32.mrf.mxu3 }
 0x2f8   : > { %v794_v25 = vmul.f32 0.17677669, %v789_v24 }
 0x2fa   : > { %v796_v26 = vadd.f32 %v794_v25, %v1620_v42 }
 0x2fc   : > { %v798_v27 = vsel %vm584_vm1, %v796_v26, -inf }
 0x2fd   : > { %799 = vmax.xlane.f32.xlu0 %v798_v27 }
 0x2ff   : > { %v791_v51 = vpop.f32.mrf.mxu3 }
 0x300   : > { %v795_v53 = vmul.f32 0.17677669, %v791_v51 }
 0x360   : > { %v666_v33 = vpop.xlane.xlu2 %665 }
 0x361   : > { %v670_v34 = vsub.f32 %v662_v18, %v666_v33  ;;  %v1311_v18 = vld [vmem:[%s1726_s3 + $0x10] sm:$0xff] }
 0x362   : > { %734 = vmatpush.bf16.msrb.mxu1 %v1311_v18 }
 0x363   : > { %v672_v37 = vmul.f32 1.442695, %v670_v34 }
 0x365   : > { %v1653_v28 = vpop.f32.mrf.mxu2 }
 0x368   : > { %v669_v29 = vpop.xlane.xlu0 %668 }
 0x369   : > { %v671_v30 = vsub.f32 %v663_v22, %v669_v29 }
 0x36b   : > { %v674_v31 = vmul.f32 1.442695, %v671_v30 }
 0x36d   : > { %1345 = vpow2.f32 %v674_v31  ;;  %v1655_v32 = vpop.f32.mrf.mxu2 }
 0x36e   : > { %1347 = vpow2.f32 %v672_v37 }
 0x370   : > { %v800_v40 = vpop.xlane.xlu0 %799 }
 0x371   : > { %v804_v44 = vsub.f32 %v796_v26, %v800_v40  ;;  %v1316_v40 = vld [vmem:[%s1726_s3 + $0x38] sm:$0xff] }
 0x373   : > { %v1346_v35 = vpop.eup %1345  ;;  %v806_v46 = vmul.f32 1.442695, %v804_v44  ;;  %v1313_v44 = vld [vmem:[%s1726_s3 + $0x20] sm:$0xff] }
 0x374   : > { %v679_v36 = vsel %vm584_vm1, %v1346_v35, 0.0  ;;  %v1348_v50 = vpop.eup %1347 }
 0x375   : > { %v896_v39 = vpop.f32.mrf.mxu2  ;;  %680 = vadd.xlane.f32.xlu0 %v679_v36  ;;  %1349 = vpow2.f32 %v806_v46  ;;  %v676_v54 = vsel %vm584_vm1, %v1348_v50, 0.0 }
 0x376   : > { %v901_v41 = vmul.f32 0.17677669, %v896_v39 }
 0x378   : > { %v903_v43 = vadd.f32 %v901_v41, %v1620_v42  ;;  %v797_v42 = vadd.f32 %v795_v53, %v1624_v47  ;;  %v1315_v41 = vld [vmem:[%s1726_s3 + $0x30] sm:$0xff] }
 0x37a   : > { %v905_v45 = vsel %vm584_vm1, %v903_v43, -inf  ;;  %v801_v57 = vsel %vm584_vm1, %v797_v42, -inf }
 0x37b   : > { %906 = vmax.xlane.f32.xlu1 %v905_v45  ;;  %v1664_v56 = vpop.eup %1349 }
 0x37c   : > { %v810_v58 = vsel %vm584_vm1, %v1664_v56, 0.0 }
 0x37d   : > { %v898_v48 = vpop.f32.mrf.mxu2 }
 0x37e   : > { %v902_v49 = vmul.f32 0.17677669, %v898_v48 }
 0x380   : > { %v904_v52 = vadd.f32 %v902_v49, %v1624_v47 }
 0x382   : > { %v908_v55 = vsel %vm584_vm1, %v904_v52, -inf }
 0x383   : > { %677 = vadd.xlane.f32.xlu1 %v676_v54  ;;  %909 = vmax.xlane.f32.xlu2 %v908_v55 }
 0x38b   : > { %802 = vmax.xlane.f32.xlu2 %v801_v57  ;;  %811 = vadd.xlane.f32.xlu1 %v810_v58  ;;  %v1334_v58 = vld [vmem:[%s1727_s4] ss:$0 sm:$0xff] }
 0x3a3   : > { %687 = vrot.lane.b32.xlu2 %v1610_v38, %s1383_s10 }
 0x3e8   : > { %v681_v47 = vpop.xlane.xlu0 %680 }
 0x3ee   : > { %v907_v59 = vpop.xlane.xlu1 %906 }
 0x3ef   : > { %v911_v60 = vsub.f32 %v903_v43, %v907_v59  ;;  %v1314_v43 = vld [vmem:[%s1726_s3 + $0x28] sm:$0xff] }
 0x3f0   : > { %867 = vmatpush.bf16.msra.mxu1 %v1314_v43 }
 0x3f1   : > { %v913_v61 = vmul.f32 1.442695, %v911_v60 }
 0x3f3   : > { %1351 = vpow2.f32 %v913_v61 }
 0x3f4   : > { %868 = vmatpush.bf16.msra.mxu1 %v1313_v44  ;;  %v1336_v44 = vld [vmem:[%s1730_s7] ss:$0 sm:$0xff] }
 0x3f6   : > { %v910_v62 = vpop.xlane.xlu2 %909  ;;  %v678_v63 = vpop.xlane.xlu1 %677 }
 0x3f7   : > { %1353 = vrcp.f32 %v678_v63  ;;  %v912_v5 = vsub.f32 %v904_v52, %v910_v62 }
 0x3f8   : > { %1355 = vrcp.f32 %v681_v47 }
 0x3f9   : > { %v1352_v0 = vpop.eup %1351  ;;  %v915_v9 = vmul.f32 1.442695, %v912_v5  ;;  %v1386_v5 = vmov 128.0  }
 0x3fa   : > { %v917_v1 = vsel %vm584_vm1, %v1352_v0, 0.0 }
 0x3fb   : > { %918 = vadd.xlane.f32.xlu1 %v917_v1 }
 0x3fd   : > { %v1354_v4 = vpop.eup %1353 }
 0x3fe   : > { %v803_v2 = vpop.xlane.xlu2 %802  ;;  %v1356_v7 = vpop.eup %1355  ;;  %v684_v8 = vmul.f32 %v1354_v4, %v1348_v50 }
 0x3ff   : > { %v805_v3 = vsub.f32 %v797_v42, %v803_v2  ;;  %v685_v10 = vmul.f32 %v1356_v7, %v1346_v35  ;;  %v812_v19 = vpop.xlane.xlu1 %811 }
 0x401   : > { %v808_v6 = vmul.f32 1.442695, %v805_v3  ;;  %v686_v12 = vpack.c.bf16 %v685_v10, %v684_v8 }
 0x403   : > { %1357 = vpow2.f32 %v808_v6 }
 0x404   : > { %1359 = vpow2.f32 %v915_v9 }
 0x406   : > { %v688_v11 = vpop.permute.xlu2 %687 }
 0x407   : > { %700 = vmatpush.bf16.msrb.mxu0 %v688_v11 }
 0x409   : > { %v1358_v13 = vpop.eup %1357 }
 0x40a   : > { %1238 = vmatmul.msk.bf16.vlgmr.msrb.gmra.mxu0 %vm584_vm1, %v686_v12  ;;  %v813_v14 = vsel %vm584_vm1, %v1358_v13, 0.0  ;;  %v1360_v15 = vpop.eup %1359 }
 0x40b   : > { %814 = vadd.xlane.f32.xlu0 %v813_v14  ;;  %v920_v16 = vsel %vm584_vm1, %v1360_v15, 0.0 }
 0x413   : > { %921 = vadd.xlane.f32.xlu0 %v920_v16 }
 0x414   : > { %928 = vrot.lane.b32.xlu1 %v1610_v38, %s1384_s11 }
 0x427   : > { %821 = vrot.lane.b32.xlu0 %v1610_v38, %s1385_s12 }
 0x46e   : > { %v919_v20 = vpop.xlane.xlu1 %918 }
 0x46f   : > { %1361 = vrcp.f32 %v919_v20 }
 0x475   : > { %v1362_v38 = vpop.eup %1361 }
 0x476   : > { %v925_v26 = vmul.f32 %v1362_v38, %v1352_v0 }
 0x47e   : > { %v815_v21 = vpop.xlane.xlu0 %814 }
 0x486   : > { %v929_v22 = vpop.permute.xlu1 %928  ;;  %v922_v23 = vpop.xlane.xlu0 %921 }
 0x487   : > { %1363 = vrcp.f32 %v922_v23  ;;  %v702_v24 = vpop.f32.mrf.mxu0  ;;  %941 = vmatpush.bf16.msra.mxu3 %v929_v22 }
 0x488   : > { %1365 = vrcp.f32 %v815_v21 }
 0x489   : > { %1367 = vrcp.f32 %v812_v19 }
 0x48a   : > { %1369 = vrcp.f32 %v1386_v5 }
 0x48d   : > { %v1364_v25 = vpop.eup %1363 }
 0x48e   : > { %v926_v27 = vmul.f32 %v1364_v25, %v1360_v15  ;;  %v1366_v33 = vpop.eup %1365 }
 0x48f   : > { %v704_v29 = vpop.f32.mrf.mxu0  ;;  %v1368_v34 = vpop.eup %1367  ;;  %v819_v35 = vmul.f32 %v1366_v33, %v1358_v13 }
 0x490   : > { %v927_v30 = vpack.c.bf16 %v926_v27, %v925_v26  ;;  %v707_v31 = vpack.c.bf16 %v704_v29, %v702_v24  ;;  %v818_v36 = vmul.f32 %v1368_v34, %v1664_v56  ;;  %v327_v56 = vld [vmem:[%s1578_s14] sm:$0xff]   ;;  %v1370_v6 = vpop.eup %1369 }
 0x491   : > { %v990_v60 = vunpack.c.l.bf16 %v327_v56  ;;  %v999_v7 = vmul.f32 128.0, %v1370_v6  ;;  %vm1003_vm2 = vweird.f32 %v1370_v6 }
 0x492   : > { %1247 = vmatmul.msk.bf16.vlgmr.msrb.gmra.mxu1 %vm559_vm0, %v707_v31  ;;  %1269 = vmatmul.msk.bf16.vlgmr.msra.gmra.mxu3 %vm584_vm1, %v927_v30  ;;  %v820_v39 = vpack.c.bf16 %v819_v35, %v818_v36 }
 0x493   : > { %v1000_v8 = vsub.f32 1.0, %v999_v7 }
 0x495   : > { %v1001_v9 = vmul.f32 %v1370_v6, %v1000_v8 }
 0x497   : > { %v1002_v10 = vadd.f32 %v1370_v6, %v1001_v9 }
 0x499   : > { %v822_v37 = vpop.permute.xlu0 %821  ;;  %v1004_v11 = vsel %vm1003_vm2, %v1370_v6, %v1002_v10 }
 0x49a   : > { %834 = vmatpush.bf16.msra.mxu0 %v822_v37 }
 0x49d   : > { %1258 = vmatmul.msk.bf16.vlgmr.msra.gmra.mxu0 %vm584_vm1, %v820_v39  ;;  %v1335_v39 = vld [vmem:[%s1729_s6] ss:$0 sm:$0xff] }
 0x49e   : > { %974 = vmatpush.bf16.msrb.mxu0 %v1316_v40 }
 0x4a2   : > { %975 = vmatpush.bf16.msrb.mxu0 %v1315_v41 }
 0x50f   : > { %v736_v52 = vpop.f32.mrf.mxu1 }
 0x510   : > { %v766_v54 = vadd.f32 %v1653_v28, %v736_v52  ;;  %v991_v28 = vunpack.c.h.bf16 %v327_v56 }
 0x515   : > { %v943_v45 = vpop.f32.mrf.mxu3 }
 0x517   : > { %v738_v53 = vpop.f32.mrf.mxu1 }
 0x518   : > { %v768_v62 = vadd.f32 %v1655_v32, %v738_v53 }
 0x51a   : > { %v836_v46 = vpop.f32.mrf.mxu0 }
 0x51d   : > { %v945_v48 = vpop.f32.mrf.mxu3 }
 0x51e   : > { %v948_v49 = vpack.c.bf16 %v945_v48, %v943_v45 }
 0x520   : > { %1278 = vmatmul.msk.bf16.vlgmr.msrb.gmra.mxu0 %vm559_vm0, %v948_v49 }
 0x522   : > { %v838_v50 = vpop.f32.mrf.mxu0 }
 0x523   : > { %v841_v51 = vpack.c.bf16 %v838_v50, %v836_v46 }
 0x525   : > { %1267 = vmatmul.msk.bf16.vlgmr.msra.gmra.mxu1 %vm559_vm0, %v841_v51 }
 0x59d   : > { %v977_v55 = vpop.f32.mrf.mxu0 }
 0x5a2   : > { %v870_v42 = vpop.f32.mrf.mxu1 }
 0x5a3   : > { %v875_v57 = vadd.f32 %v870_v42, %v766_v54 }
 0x5a5   : > { %v982_v59 = vadd.f32 %v977_v55, %v875_v57  ;;  %v979_v1 = vpop.f32.mrf.mxu0 }
 0x5a7   : > { %v988_v61 = vadd.f32 %v1334_v58, %v982_v59 }
 0x5a9   : > { %v992_v63 = vadd.f32 %v990_v60, %v988_v61 }
 0x5aa   : > { %v872_v0 = vpop.f32.mrf.mxu1 }
 0x5ab   : > { %v876_v47 = vadd.f32 %v872_v0, %v768_v62  ;;  %994 = vadd.xlane.f32.xlu2 %v992_v63 }
 0x5ad   : > { %v983_v2 = vadd.f32 %v979_v1, %v876_v47 }
 0x5af   : > { %v989_v3 = vadd.f32 %v1334_v58, %v983_v2 }
 0x5b1   : > { %v993_v4 = vadd.f32 %v991_v28, %v989_v3 }
 0x5b3   : > { %996 = vadd.xlane.f32.xlu0 %v993_v4 }
 0x61e   : > { %v995_v32 = vpop.xlane.xlu2 %994 }
 0x61f   : > { %v1005_v12 = vmul.f32 %v1004_v11, %v995_v32 }
 0x621   : > { %v1007_v13 = vsub.f32 %v992_v63, %v1005_v12 }
 0x623   : > { %v1009_v14 = vmul.f32 %v1007_v13, %v1007_v13 }
 0x625   : > { %1011 = vadd.xlane.f32.xlu1 %v1009_v14 }
 0x626   : > { %v997_v15 = vpop.xlane.xlu0 %996 }
 0x627   : > { %v1006_v16 = vmul.f32 %v1004_v11, %v997_v15 }
 0x629   : > { %v1008_v17 = vsub.f32 %v993_v4, %v1006_v16 }
 0x62b   : > { %v1010_v18 = vmul.f32 %v1008_v17, %v1008_v17 }
 0x62d   : > { %1013 = vadd.xlane.f32.xlu2 %v1010_v18 }
 0x698   : > { %v1012_v19 = vpop.xlane.xlu1 %1011 }
 0x699   : > { %v1015_v20 = vmul.f32 %v1012_v19, %v1004_v11 }
 0x69b   : > { %v1017_v21 = vadd.f32 1e-05, %v1015_v20 }
 0x69d   : > { %1371 = vrsqrt.f32 %v1017_v21  ;;  %vm1025_vm4 = vweird.f32 %v1017_v21 }
 0x6a0   : > { %v1014_v22 = vpop.xlane.xlu2 %1013 }
 0x6a1   : > { %v1016_v23 = vmul.f32 %v1014_v22, %v1004_v11 }
 0x6a3   : > { %v1372_v24 = vpop.eup %1371  ;;  %v1018_v38 = vadd.f32 1e-05, %v1016_v23 }
 0x6a4   : > { %v1020_v25 = vmul.f32 %v1372_v24, %v1017_v21  ;;  %vm1026_vm3 = vweird.f32 %v1372_v24 }
 0x6a5   : > { %1373 = vrsqrt.f32 %v1018_v38  ;;  %vm1027_vm5 = vmor %vm1025_vm4, %vm1026_vm3  ;;  %vm1035_vm7 = vweird.f32 %v1018_v38 }
 0x6a6   : > { %v1021_v26 = vmul.f32 %v1372_v24, %v1020_v25 }
 0x6a8   : > { %v1022_v27 = vmul.f32 0.5, %v1021_v26 }
 0x6aa   : > { %v1023_v29 = vsub.f32 1.5, %v1022_v27 }
 0x6ab   : > { %v1374_v30 = vpop.eup %1373 }
 0x6ac   : > { %v1024_v31 = vmul.f32 %v1372_v24, %v1023_v29  ;;  %v1030_v33 = vmul.f32 %v1374_v30, %v1018_v38  ;;  %vm1036_vm6 = vweird.f32 %v1374_v30 }
 0x6ad   : > { %vm1037_vm8 = vmor %vm1035_vm7, %vm1036_vm6 }
 0x6ae   : > { %v1031_v34 = vmul.f32 %v1374_v30, %v1030_v33  ;;  %v1028_v35 = vsel %vm1027_vm5, %v1372_v24, %v1024_v31 }
 0x6af   : > { %v1039_v40 = vmul.f32 %v1028_v35, %v1007_v13 }
 0x6b0   : > { %v1032_v36 = vmul.f32 0.5, %v1031_v34 }
 0x6b1   : > { %v1045_v45 = vmul.f32 %v1335_v39, %v1039_v40 }
 0x6b2   : > { %v1033_v37 = vsub.f32 1.5, %v1032_v36 }
 0x6b3   : > { %v1051_v49 = vadd.f32 %v1336_v44, %v1045_v45 }
 0x6b4   : > { %v1034_v41 = vmul.f32 %v1374_v30, %v1033_v37 }
 0x6b6   : > { %v1038_v43 = vsel %vm1037_vm8, %v1374_v30, %v1034_v41 }
 0x6b7   : > { %v1040_v46 = vmul.f32 %v1038_v43, %v1008_v17 }
 0x6b9   : > { %v1046_v48 = vmul.f32 %v1335_v39, %v1040_v46 }
 0x6bb   : > { %v1052_v50 = vadd.f32 %v1336_v44, %v1046_v48 }
 0x6bd   : > { %v1320_v51 = vpack.c.bf16 %v1052_v50, %v1051_v49 }
 0x6bf   : > { %1321 = vst [vmem:[%s325_s23] sm:$0xff] %v1320_v51  }
 0x6c0 PF: > { %s18_s27 = sadd.s32 1, %s1381_s27  }
 0x6c1   : > { %p15_p4 = scmp.ge.s32.totalorder %s18_s27, 4  }
 0x6c3   :  { %17 = sbr.rel (!%p15_p4) target bundleno = 1 (0x1), region = 85 }

// kernel: transformer_forward.15
= control target key start
LH: loop header
LB: loop body
LE: loop exit
PB: predicated region body
PF: predicated region fallthrough
CT: control target
= control target key end

     0   :  { %s1292_s27 = smov 0   ;;  %s1554_s0 = inlined_call_operand.vmem [shape: bf16[2,8,128], index: 0, kind: input, shape index: {}]   ;;  %s1555_s1 = inlined_call_operand.vmem [shape: bf16[128,384], index: 1, kind: input, shape index: {}]   ;;  %s1556_s2 = inlined_call_operand.vmem [shape: f32[1,384], index: 2, kind: input, shape index: {}]   ;;  %s1557_s3 = inlined_call_operand.vmem [shape: bf16[128,128], index: 3, kind: input, shape index: {}]   ;;  %s1558_s4 = inlined_call_operand.vmem [shape: f32[1,128], index: 4, kind: input, shape index: {}]   ;;  %s1559_s5 = inlined_call_operand.vmem [shape: f32[2,8,8], index: 5, kind: input, shape index: {}]   ;;  %s1560_s6 = inlined_call_operand.vmem [shape: f32[1,128], index: 6, kind: input, shape index: {}]   ;;  %s1561_s7 = inlined_call_operand.vmem [shape: f32[1,128], index: 7, kind: input, shape index: {}]   ;;  %s1562_s8 = inlined_call_operand.vmem [shape: bf16[2,8,128], index: 8, kind: output, shape index: {}]  }
   0x1 LB: > { %s1018_s28 = sadd.s32 4294967295, %s1241_s27   ;;  %p1022_p0 = scmp.ge.s32.totalorder %s1241_s27, 1  ;;  %s1241_s27 = sphi %s1292_s27, %s18_s27  }
   0x2   : > { %p270_p1 = scmp.lt.s32.totalorder %s1241_s27, 3 }
   0x4   : > { %p271_p2 = pnand %p1022_p0, %p270_p1 }
   0x5   : > { %p306_p3 = scmp.lt.s32.totalorder (!%p271_p2), %s1018_s28, 1  ;;  %s1243_s12 = smov (!%p271_p2), 32  }
   0x6   : > { %274 = sbr.rel (%p271_p2) target bundleno = 1671 (0x687), region = 52  ;;  %s1244_s13 = smov (!%p271_p2), 96  }
   0x7   : > { %s1245_s14 = smov (!%p271_p2), 64  }
   0xb   : > { %v1112_v0 = vld [vmem:[%s1555_s1 + $0xa8] sm:$0xf]  ;;  %v1190_v1 = vld [vmem:[%s1555_s1 + $0xb0] sm:$0xf0]  ;;  %v1189_v2 = vld [vmem:[%s1555_s1 + $0xac] sm:$0xf] }
   0xc   : > { %v1113_v3 = vor.u32 %v1190_v1, %v1112_v0  ;;  %v1114_v4 = vld [vmem:[%s1555_s1 + $0xb4] sm:$0xf0]  ;;  %v1100_v5 = vld [vmem:[%s1555_s1 + $0x90] sm:$0xf]  ;;  %v1187_v6 = vld [vmem:[%s1555_s1 + $0x98] sm:$0xf0] }
   0xd   : > { %v1117_v7 = vor.u32 %v1189_v2, %v1114_v4  ;;  %v1186_v8 = vld [vmem:[%s1555_s1 + $0x94] sm:$0xf]  ;;  %v1102_v9 = vld [vmem:[%s1555_s1 + $0x9c] sm:$0xf0]  ;;  %v1101_v10 = vor.u32 %v1187_v6, %v1100_v5  ;;  %v1088_v12 = vld [vmem:[%s1555_s1 + $0x78] sm:$0xf] }
   0xe   : > { %488 = vmatpush.bf16.msra.mxu0 %v1113_v3  ;;  %v1105_v11 = vor.u32 %v1186_v8, %v1102_v9  ;;  %v1184_v13 = vld [vmem:[%s1555_s1 + $0x80] sm:$0xf0]  ;;  %v1183_v14 = vld [vmem:[%s1555_s1 + $0x7c] sm:$0xf]  ;;  %v1090_v15 = vld [vmem:[%s1555_s1 + $0x84] sm:$0xf0] }
   0xf   : > { %501 = vmatpush.bf16.msra.mxu1 %v1117_v7  ;;  %v1089_v16 = vor.u32 %v1184_v13, %v1088_v12  ;;  %v1093_v17 = vor.u32 %v1183_v14, %v1090_v15  ;;  %v1076_v18 = vld [vmem:[%s1555_s1 + $0x60] sm:$0xf]  ;;  %v1181_v19 = vld [vmem:[%s1555_s1 + $0x68] sm:$0xf0]  ;;  %v1180_v20 = vld [vmem:[%s1555_s1 + $0x64] sm:$0xf] }
  0x10   : > { %v1078_v21 = vld [vmem:[%s1555_s1 + $0x6c] sm:$0xf0]  ;;  %v1077_v22 = vor.u32 %v1181_v19, %v1076_v18  ;;  %v1191_v24 = vld [vmem:[%s1555_s1 + $0xb8] sm:$0xf0]  ;;  %v1108_v25 = vld [vmem:[%s1555_s1 + $0x98] sm:$0xf] }
  0x11   : > { %v1120_v23 = vld [vmem:[%s1555_s1 + $0xb0] sm:$0xf]  ;;  %v1081_v26 = vor.u32 %v1180_v20, %v1078_v21  ;;  %v1064_v27 = vld [vmem:[%s1555_s1 + $0x48] sm:$0xf]  ;;  %v1178_v28 = vld [vmem:[%s1555_s1 + $0x50] sm:$0xf0] }
  0x12   : > { %489 = vmatpush.bf16.msra.mxu0 %v1101_v10  ;;  %v1121_v29 = vor.u32 %v1191_v24, %v1120_v23  ;;  %v1188_v30 = vld [vmem:[%s1555_s1 + $0xa0] sm:$0xf0]  ;;  %v1177_v31 = vld [vmem:[%s1555_s1 + $0x4c] sm:$0xf]  ;;  %v1066_v32 = vld [vmem:[%s1555_s1 + $0x54] sm:$0xf0]  ;;  %v1065_v34 = vor.u32 %v1178_v28, %v1064_v27 }
  0x13   : > { %502 = vmatpush.bf16.msra.mxu1 %v1105_v11  ;;  %v1109_v33 = vor.u32 %v1188_v30, %v1108_v25  ;;  %v1096_v35 = vld [vmem:[%s1555_s1 + $0x80] sm:$0xf]  ;;  %v1185_v36 = vld [vmem:[%s1555_s1 + $0x88] sm:$0xf0]  ;;  %v1069_v37 = vor.u32 %v1177_v31, %v1066_v32  ;;  %v1052_v38 = vld [vmem:[%s1555_s1 + $0x30] sm:$0xf] }
  0x14   : > { %514 = vmatpush.bf16.msra.mxu2 %v1121_v29  ;;  %v1175_v39 = vld [vmem:[%s1555_s1 + $0x38] sm:$0xf0]  ;;  %v1174_v40 = vld [vmem:[%s1555_s1 + $0x34] sm:$0xf]  ;;  %v1054_v41 = vld [vmem:[%s1555_s1 + $0x3c] sm:$0xf0]  ;;  %v1097_v42 = vor.u32 %v1185_v36, %v1096_v35  ;;  %v530_v36 = vlaneseq }
  0x15   : > { %v1053_v43 = vor.u32 %v1175_v39, %v1052_v38  ;;  %v1084_v44 = vld [vmem:[%s1555_s1 + $0x68] sm:$0xf]  ;;  %v1182_v45 = vld [vmem:[%s1555_s1 + $0x70] sm:$0xf0]  ;;  %v1057_v46 = vor.u32 %v1174_v40, %v1054_v41  ;;  %v1040_v47 = vld [vmem:[%s1555_s1 + $0x18] sm:$0xf] }
  0x16   : > { %490 = vmatpush.bf16.msra.mxu0 %v1089_v16  ;;  %v1172_v48 = vld [vmem:[%s1555_s1 + $0x20] sm:$0xf0]  ;;  %v1171_v49 = vld [vmem:[%s1555_s1 + $0x1c] sm:$0xf]  ;;  %v1042_v50 = vld [vmem:[%s1555_s1 + $0x24] sm:$0xf0]  ;;  %v1085_v51 = vor.u32 %v1182_v45, %v1084_v44 }
  0x17   : > { %503 = vmatpush.bf16.msra.mxu1 %v1093_v17  ;;  %s1564_s28 = smov (!%p306_p3, %s1018_s28), 1  ;;  %v1041_v52 = vor.u32 %v1172_v48, %v1040_v47  ;;  %v1072_v53 = vld [vmem:[%s1555_s1 + $0x50] sm:$0xf]  ;;  %v1179_v54 = vld [vmem:[%s1555_s1 + $0x58] sm:$0xf0]  ;;  %v1045_v55 = vor.u32 %v1171_v49, %v1042_v50  ;;  %v1193_v10 = vld [vmem:[%s1557_s3 + $0x8] sm:$0xff] }
  0x18   : > { %515 = vmatpush.bf16.msra.mxu2 %v1109_v33  ;;  %v1028_v56 = vld [vmem:[%s1555_s1] sm:$0xf]  ;;  %v1169_v57 = vld [vmem:[%s1555_s1 + $0x8] sm:$0xf0]  ;;  %v1168_v58 = vld [vmem:[%s1555_s1 + $0x4] sm:$0xf]  ;;  %v1073_v60 = vor.u32 %v1179_v54, %v1072_v53 }
  0x19   : > { %v1030_v59 = vld [vmem:[%s1555_s1 + $0xc] sm:$0xf0]  ;;  %s1023_s11 = sshll.u32 %s1564_s28, 2  ;;  %v1029_v61 = vor.u32 %v1169_v57, %v1028_v56  ;;  %v1060_v62 = vld [vmem:[%s1555_s1 + $0x38] sm:$0xf]  ;;  %vm539_vm0 = vcmask 261120  }
  0x1a   : > { %491 = vmatpush.bf16.msra.mxu0 %v1077_v22  ;;  %v1176_v63 = vld [vmem:[%s1555_s1 + $0x40] sm:$0xf0]  ;;  %v1033_v0 = vor.u32 %v1168_v58, %v1030_v59  ;;  %s309_s18 = scalar_lea.vmem %s1554_s0, %s1023_s11  ;;  %v1048_v3 = vld [vmem:[%s1555_s1 + $0x20] sm:$0xf]  ;;  %v1173_v4 = vld [vmem:[%s1555_s1 + $0x28] sm:$0xf0]  ;;  %s317_s22 = scalar_lea.vmem %s1562_s8, %s1023_s11 }
  0x1b   : > { %504 = vmatpush.bf16.msra.mxu1 %v1081_v26  ;;  %v1061_v1 = vor.u32 %v1176_v63, %v1060_v62  ;;  %v1444_v2 = vld [vmem:[%s309_s18] sm:$0xf]  ;;  %v1049_v5 = vor.u32 %v1173_v4, %v1048_v3  ;;  %v1036_v6 = vld [vmem:[%s1555_s1 + $0x8] sm:$0xf]  ;;  %v1170_v7 = vld [vmem:[%s1555_s1 + $0x10] sm:$0xf0] }
  0x1c   : > { %516 = vmatpush.bf16.msra.mxu2 %v1097_v42  ;;  %v1037_v8 = vor.u32 %v1170_v7, %v1036_v6  ;;  %v352_v9 = vld [vmem:[%s1556_s2] sm:$0x7]  ;;  %vm577_vm1 = vcmask 1043456   ;;  %s1024_s17 = sshll.u32 %s1564_s28, 3  ;;  %v533_v38 = vand.u32 127, %v530_v36  ;;  %vm561_vm3 = vcmask 64512  }
  0x1d   : > { %v354_v11 = vperm.slane %v352_v9, 0  ;;  %v355_v12 = vperm.slane %v352_v9, 1  ;;  %v1192_v25 = vld [vmem:[%s1557_s3] sm:$0xff]  ;;  %v356_v27 = vperm.slane %v352_v9, 2  ;;  %s313_s20 = scalar_lea.vmem %s1559_s5, %s1024_s17 }
  0x1e   : > { %492 = vmatpush.bf16.msra.mxu0 %v1065_v34  ;;  %v529_v39 = vld [vmem:[%s313_s20] sm:$0xff] }
  0x1f   : > { %505 = vmatpush.bf16.msra.mxu1 %v1069_v37  ;;  %v531_v37 = vshrl.u32 %v530_v36, 7 }
  0x20   : > { %517 = vmatpush.bf16.msra.mxu2 %v1085_v51 }
  0x21   : > { %vm534_vm2 = vcmp.le.s32.totalorder %v533_v38, %v531_v37 }
  0x22   : > { %493 = vmatpush.bf16.msra.mxu0 %v1053_v43  ;;  %v535_v41 = vsel %vm534_vm2, %v529_v39, -1e+09 }
  0x23   : > { %506 = vmatpush.bf16.msra.mxu1 %v1057_v46 }
  0x24   : > { %518 = vmatpush.bf16.msra.mxu2 %v1073_v60 }
  0x26   : > { %494 = vmatpush.bf16.msra.mxu0 %v1041_v52 }
  0x27   : > { %507 = vmatpush.bf16.msra.mxu1 %v1045_v55 }
  0x28   : > { %519 = vmatpush.bf16.msra.mxu2 %v1061_v1 }
  0x2a   : > { %495 = vmatpush.bf16.msra.mxu0 %v1029_v61 }
  0x2b   : > { %508 = vmatpush.bf16.msra.mxu1 %v1033_v0 }
  0x2c   : > { %520 = vmatpush.bf16.msra.mxu2 %v1049_v5 }
  0x2d   : > { %496 = vmatmul.bf16.vlgmr.msra.gmra.mxu0 %v1444_v2 }
  0x2e   : > { %509 = vmatmul.bf16.vlgmr.msra.gmra.mxu1 %v1444_v2 }
  0x30   : > { %521 = vmatpush.bf16.msra.mxu2 %v1037_v8 }
  0x33   : > { %522 = vmatmul.bf16.vlgmr.msra.gmra.mxu2 %v1444_v2 }
  0x34   : > { %716 = vmatpush.bf16.msrb.mxu2 %v1193_v10 }
  0x38   : > { %717 = vmatpush.bf16.msrb.mxu2 %v1192_v25 }
  0xaa   : > { %v497_v13 = vpop.f32.mrf.mxu0 }
  0xab   : > { %v498_v14 = vadd.f32 %v497_v13, %v354_v11  ;;  %v510_v15 = vpop.f32.mrf.mxu1 }
  0xac   : > { %v511_v16 = vadd.f32 %v510_v15, %v355_v12 }
  0xae   : > { %v527_v17 = vpack.c.bf16 %v511_v16, %v498_v14 }
  0xb0   : > { %v537_v18 = vunpack.c.h.b16 %v527_v17  ;;  %v599_v23 = vunpack.c.l.b16 %v527_v17 }
  0xb2   : > { %v499_v19 = vpop.f32.mrf.mxu0  ;;  %v538_v20 = vpack.c.b16 %v537_v18, %v537_v18  ;;  %v600_v24 = vpack.c.b16 %v599_v23, %v599_v23 }
  0xb3   : > { %v512_v21 = vpop.f32.mrf.mxu1 }
  0xb4   : > { %817 = vrot.lane.b32.xlu2 %v538_v20, %s1243_s12  ;;  %603 = vrot.lane.b32.xlu1 %v538_v20, %s1244_s13  ;;  %v544_v22 = vsel %vm539_vm0, %v538_v20, 0 }
  0xb5   : > { %553 = vmatpush.bf16.xpose.msra.mxu3 %v544_v22 }
  0xb6   : > { %v523_v26 = vpop.f32.mrf.mxu2 }
  0xb7   : > { %v524_v28 = vadd.f32 %v523_v26, %v356_v27 }
  0xb9   : > { %v1477_v30 = vpack.c.bf16 %v524_v28, %v524_v28 }
  0xbb   : > { %v579_v31 = vsel %vm577_vm1, %v1477_v30, 0  ;;  %v639_v10 = vunpack.c.l.b16 %v1477_v30 }
  0xbc   : > { %725 = vrot.lane.b32.xlu2 %v538_v20, %s1245_s14  ;;  %601 = vrot.lane.b32.xlu1 %v600_v24, %s1244_s13 }
  0xbd   : > { %1122 = vmatmul.msk.bf16.vlgmr.msra.gmra.mxu3 %vm539_vm0, %v527_v17  ;;  %v640_v11 = vpack.c.b16 %v639_v10, %v639_v10 }
  0xbe   : > { %v525_v29 = vpop.f32.mrf.mxu2  ;;  %588 = vmatpush.bf16.msrb.mxu3 %v579_v31 }
  0xc4   : > { %723 = vrot.lane.b32.xlu1 %v600_v24, %s1245_s14 }
 0x10e   : > { %v818_v32 = vpop.permute.xlu2 %817 }
 0x10f   : > { %v823_v33 = vsel %vm539_vm0, %v818_v32, 0 }
 0x110   : > { %832 = vmatpush.bf16.xpose.msra.mxu2 %v823_v33 }
 0x116   : > { %v726_v54 = vpop.permute.xlu2 %725 }
 0x117   : > { %v731_v56 = vsel %vm539_vm0, %v726_v54, 0 }
 0x126   : > { %v604_v34 = vpop.permute.xlu1 %603 }
 0x127   : > { %v609_v35 = vsel %vm539_vm0, %v604_v34, 0 }
 0x128   : > { %618 = vmatpush.bf16.xpose.msra.mxu3 %v609_v35 }
 0x12e   : > { %v602_v57 = vpop.permute.xlu1 %601 }
 0x136   : > { %v724_v58 = vpop.permute.xlu1 %723 }
 0x140   : > { %v555_v40 = vpop.f32.mrf.mxu3 }
 0x141   : > { %v559_v42 = vmul.f32 0.17677669, %v555_v40  ;;  %v1195_v40 = vld [vmem:[%s1557_s3 + $0x18] sm:$0xff] }
 0x142   : > { %688 = vmatpush.bf16.msrb.mxu1 %v1195_v40 }
 0x143   : > { %v560_v43 = vadd.f32 %v559_v42, %v535_v41 }
 0x145   : > { %v562_v44 = vsel %vm561_vm3, %v560_v43, -inf }
 0x146   : > { %563 = vmax.xlane.f32.xlu0 %v562_v44 }
 0x148   : > { %v557_v45 = vpop.f32.mrf.mxu3 }
 0x1b9   : > { %v564_v46 = vpop.xlane.xlu0 %563 }
 0x1ba   : > { %v565_v47 = vsub.f32 %v560_v43, %v564_v46  ;;  %v1194_v43 = vld [vmem:[%s1557_s3 + $0x10] sm:$0xff] }
 0x1bb   : > { %689 = vmatpush.bf16.msrb.mxu1 %v1194_v43 }
 0x1bc   : > { %v566_v48 = vmul.f32 1.442695, %v565_v47 }
 0x1be   : > { %1215 = vpow2.f32 %v566_v48 }
 0x1c4   : > { %v1216_v49 = vpop.eup %1215 }
 0x1c5   : > { %v568_v50 = vsel %vm561_vm3, %v1216_v49, 0.0 }
 0x1c6   : > { %569 = vadd.xlane.f32.xlu0 %v568_v50 }
 0x1da   : > { %815 = vrot.lane.b32.xlu0 %v600_v24, %s1243_s12 }
 0x239   : > { %v570_v51 = vpop.xlane.xlu0 %569 }
 0x23a   : > { %1217 = vrcp.f32 %v570_v51 }
 0x240   : > { %v1218_v52 = vpop.eup %1217 }
 0x241   : > { %v572_v53 = vmul.f32 %v1218_v52, %v1216_v49 }
 0x243   : > { %v573_v55 = vpack.c.bf16 %v572_v53, %v572_v53 }
 0x245   : > { %1123 = vmatmul.msk.bf16.vlgmr.msrb.gmra.mxu3 %vm561_vm3, %v573_v55 }
 0x246   : > { %740 = vmatpush.bf16.xpose.msrb.mxu3 %v731_v56 }
 0x24c   : > { %v816_v0 = vpop.permute.xlu0 %815 }
 0x255   : > { %1124 = vmatmul.msk.bf16.vlgmr.msra.gmra.mxu3 %vm539_vm0, %v602_v57  ;;  %v1199_v57 = vld [vmem:[%s1557_s3 + $0x38] sm:$0xff] }
 0x265   : > { %1144 = vmatmul.msk.bf16.vlgmr.msrb.gmra.mxu3 %vm539_vm0, %v724_v58  ;;  %v1198_v58 = vld [vmem:[%s1557_s3 + $0x30] sm:$0xff] }
 0x2c8   : > { %v590_v59 = vpop.f32.mrf.mxu3 }
 0x2c9   : > { %v594_v60 = vpack.c.bf16 %v590_v59, %v590_v59  ;;  %v1197_v59 = vld [vmem:[%s1557_s3 + $0x28] sm:$0xff] }
 0x2ca   : > { %807 = vmatpush.bf16.msra.mxu1 %v1197_v59 }
 0x2cb   : > { %1143 = vmatmul.msk.bf16.vlgmr.msrb.gmra.mxu2 %vm539_vm0, %v594_v60  ;;  %v1196_v60 = vld [vmem:[%s1557_s3 + $0x20] sm:$0xff] }
 0x2ce   : > { %808 = vmatpush.bf16.msra.mxu1 %v1196_v60 }
 0x2d0   : > { %v592_v61 = vpop.f32.mrf.mxu3 }
 0x2d8   : > { %v620_v62 = vpop.f32.mrf.mxu3 }
 0x2d9   : > { %v624_v63 = vmul.f32 0.17677669, %v620_v62 }
 0x2db   : > { %1155 = vmatmul.msk.bf16.vlgmr.msra.gmra.mxu2 %vm539_vm0, %v816_v0  ;;  %v625_v1 = vadd.f32 %v624_v63, %v535_v41 }
 0x2dd   : > { %v626_v3 = vsel %vm561_vm3, %v625_v1, -inf }
 0x2de   : > { %627 = vmax.xlane.f32.xlu2 %v626_v3 }
 0x2e0   : > { %v622_v4 = vpop.f32.mrf.mxu3 }
 0x2e8   : > { %v742_v5 = vpop.f32.mrf.mxu3 }
 0x2e9   : > { %v746_v6 = vmul.f32 0.17677669, %v742_v5 }
 0x2eb   : > { %v747_v7 = vadd.f32 %v746_v6, %v535_v41 }
 0x2ed   : > { %v748_v8 = vsel %vm561_vm3, %v747_v7, -inf }
 0x2ee   : > { %749 = vmax.xlane.f32.xlu0 %v748_v8 }
 0x2f0   : > { %v744_v9 = vpop.f32.mrf.mxu3 }
 0x302   : > { %852 = vrot.lane.b32.xlu0 %v640_v11, %s1243_s12 }
 0x34e   : > { %v1500_v12 = vpop.f32.mrf.mxu2 }
 0x351   : > { %v628_v13 = vpop.xlane.xlu2 %627 }
 0x352   : > { %v629_v14 = vsub.f32 %v625_v1, %v628_v13 }
 0x354   : > { %v630_v15 = vmul.f32 1.442695, %v629_v14  ;;  %v912_v14 = vunpack.c.l.bf16 %v1444_v2 }
 0x356   : > { %1219 = vpow2.f32 %v630_v15  ;;  %v721_v16 = vpop.f32.mrf.mxu2 }
 0x35c   : > { %v1220_v17 = vpop.eup %1219 }
 0x35d   : > { %v632_v18 = vsel %vm561_vm3, %v1220_v17, 0.0 }
 0x35e   : > { %v834_v19 = vpop.f32.mrf.mxu2  ;;  %633 = vadd.xlane.f32.xlu2 %v632_v18  ;;  %v1246_v18 = vmov 128.0  }
 0x35f   : > { %v838_v20 = vmul.f32 0.17677669, %v834_v19 }
 0x361   : > { %v750_v21 = vpop.xlane.xlu0 %749  ;;  %v839_v22 = vadd.f32 %v838_v20, %v535_v41 }
 0x362   : > { %v751_v23 = vsub.f32 %v747_v7, %v750_v21 }
 0x363   : > { %v840_v24 = vsel %vm561_vm3, %v839_v22, -inf }
 0x364   : > { %v752_v25 = vmul.f32 1.442695, %v751_v23  ;;  %841 = vmax.xlane.f32.xlu1 %v840_v24 }
 0x366   : > { %1221 = vpow2.f32 %v752_v25  ;;  %v836_v26 = vpop.f32.mrf.mxu2 }
 0x36c   : > { %v1222_v27 = vpop.eup %1221 }
 0x36d   : > { %v754_v28 = vsel %vm561_vm3, %v1222_v27, 0.0 }
 0x36e   : > { %755 = vadd.xlane.f32.xlu1 %v754_v28 }
 0x374   : > { %v853_v29 = vpop.permute.xlu0 %852 }
 0x375   : > { %v858_v30 = vsel %vm577_vm1, %v853_v29, 0 }
 0x376   : > { %641 = vrot.lane.b32.xlu2 %v640_v11, %s1244_s13  ;;  %867 = vmatpush.bf16.msra.mxu3 %v858_v30 }
 0x3d1   : > { %v634_v31 = vpop.xlane.xlu2 %633 }
 0x3d2   : > { %1223 = vrcp.f32 %v634_v31 }
 0x3d7   : > { %v842_v32 = vpop.xlane.xlu1 %841 }
 0x3d8   : > { %v1224_v33 = vpop.eup %1223  ;;  %v843_v34 = vsub.f32 %v839_v22, %v842_v32 }
 0x3d9   : > { %v636_v35 = vmul.f32 %v1224_v33, %v1220_v17  ;;  %v642_v36 = vpop.permute.xlu2 %641 }
 0x3da   : > { %v844_v37 = vmul.f32 1.442695, %v843_v34  ;;  %v647_v38 = vsel %vm577_vm1, %v642_v36, 0  ;;  %v1213_v36 = vld [vmem:[%s1560_s6] ss:$0 sm:$0xff] }
 0x3db   : > { %656 = vmatpush.bf16.msrb.mxu0 %v647_v38  ;;  %v637_v39 = vpack.c.bf16 %v636_v35, %v636_v35  ;;  %v1214_v38 = vld [vmem:[%s1561_s7] ss:$0 sm:$0xff] }
 0x3dc   : > { %1225 = vpow2.f32 %v844_v37 }
 0x3de   : > { %1125 = vmatmul.msk.bf16.vlgmr.msrb.gmra.mxu0 %vm561_vm3, %v637_v39 }
 0x3e1   : > { %v756_v44 = vpop.xlane.xlu1 %755 }
 0x3e2   : > { %v1226_v41 = vpop.eup %1225 }
 0x3e3   : > { %v846_v42 = vsel %vm561_vm3, %v1226_v41, 0.0 }
 0x3e4   : > { %847 = vadd.xlane.f32.xlu1 %v846_v42 }
 0x3fd   : > { %760 = vrot.lane.b32.xlu1 %v640_v11, %s1245_s14  ;;  %v1212_v11 = vld [vmem:[%s1558_s4] ss:$0 sm:$0xff] }
 0x457   : > { %v848_v45 = vpop.xlane.xlu1 %847 }
 0x458   : > { %1227 = vrcp.f32 %v848_v45 }
 0x459   : > { %1229 = vrcp.f32 %v756_v44 }
 0x45a   : > { %1231 = vrcp.f32 %v1246_v18 }
 0x45b   : > { %v658_v46 = vpop.f32.mrf.mxu0 }
 0x45c   : > { %v662_v47 = vpack.c.bf16 %v658_v46, %v658_v46 }
 0x45e   : > { %v1228_v48 = vpop.eup %1227  ;;  %1134 = vmatmul.msk.bf16.vlgmr.msrb.gmra.mxu1 %vm539_vm0, %v662_v47 }
 0x45f   : > { %v850_v49 = vmul.f32 %v1228_v48, %v1226_v41  ;;  %v1230_v52 = vpop.eup %1229 }
 0x460   : > { %v758_v53 = vmul.f32 %v1230_v52, %v1222_v27  ;;  %v1232_v19 = vpop.eup %1231 }
 0x461   : > { %v851_v50 = vpack.c.bf16 %v850_v49, %v850_v49  ;;  %v917_v20 = vmul.f32 128.0, %v1232_v19  ;;  %vm921_vm4 = vweird.f32 %v1232_v19 }
 0x462   : > { %v759_v56 = vpack.c.bf16 %v758_v53, %v758_v53 }
 0x463   : > { %v660_v51 = vpop.f32.mrf.mxu0  ;;  %1156 = vmatmul.msk.bf16.vlgmr.msra.gmra.mxu3 %vm561_vm3, %v851_v50  ;;  %v918_v21 = vsub.f32 1.0, %v917_v20 }
 0x465   : > { %v919_v22 = vmul.f32 %v1232_v19, %v918_v21 }
 0x46f   : > { %v761_v54 = vpop.permute.xlu1 %760 }
 0x470   : > { %v766_v55 = vsel %vm577_vm1, %v761_v54, 0 }
 0x471   : > { %775 = vmatpush.bf16.msra.mxu0 %v766_v55 }
 0x474   : > { %1145 = vmatmul.msk.bf16.vlgmr.msra.gmra.mxu0 %vm561_vm3, %v759_v56 }
 0x475   : > { %899 = vmatpush.bf16.msrb.mxu0 %v1199_v57 }
 0x479   : > { %900 = vmatpush.bf16.msrb.mxu0 %v1198_v58 }
 0x4db   : > { %v691_v61 = vpop.f32.mrf.mxu1 }
 0x4dc   : > { %v720_v8 = vadd.f32 %v1500_v12, %v691_v61  ;;  %v920_v12 = vadd.f32 %v1232_v19, %v919_v22 }
 0x4de   : > { %v922_v23 = vsel %vm921_vm4, %v1232_v19, %v920_v12 }
 0x4e3   : > { %v693_v62 = vpop.f32.mrf.mxu1 }
 0x4e6   : > { %v869_v63 = vpop.f32.mrf.mxu3 }
 0x4e7   : > { %v873_v0 = vpack.c.bf16 %v869_v63, %v869_v63 }
 0x4e9   : > { %1165 = vmatmul.msk.bf16.vlgmr.msrb.gmra.mxu0 %vm539_vm0, %v873_v0 }
 0x4ee   : > { %v871_v1 = vpop.f32.mrf.mxu3 }
 0x4f1   : > { %v777_v3 = vpop.f32.mrf.mxu0 }
 0x4f2   : > { %v781_v4 = vpack.c.bf16 %v777_v3, %v777_v3 }
 0x4f4   : > { %1154 = vmatmul.msk.bf16.vlgmr.msra.gmra.mxu1 %vm539_vm0, %v781_v4 }
 0x4f9   : > { %v779_v5 = vpop.f32.mrf.mxu0 }
 0x566   : > { %v902_v6 = vpop.f32.mrf.mxu0 }
 0x56e   : > { %v904_v7 = vpop.f32.mrf.mxu0 }
 0x571   : > { %v810_v9 = vpop.f32.mrf.mxu1 }
 0x572   : > { %v814_v10 = vadd.f32 %v810_v9, %v720_v8 }
 0x574   : > { %v906_v13 = vadd.f32 %v902_v6, %v814_v10 }
 0x576   : > { %v911_v15 = vadd.f32 %v1212_v11, %v906_v13 }
 0x578   : > { %v913_v16 = vadd.f32 %v912_v14, %v911_v15 }
 0x579   : > { %v812_v17 = vpop.f32.mrf.mxu1 }
 0x57a   : > { %914 = vadd.xlane.f32.xlu2 %v913_v16 }
 0x5ed   : > { %v915_v24 = vpop.xlane.xlu2 %914 }
 0x5ee   : > { %v923_v25 = vmul.f32 %v922_v23, %v915_v24 }
 0x5f0   : > { %v924_v26 = vsub.f32 %v913_v16, %v923_v25 }
 0x5f2   : > { %v925_v27 = vmul.f32 %v924_v26, %v924_v26 }
 0x5f4   : > { %926 = vadd.xlane.f32.xlu0 %v925_v27 }
 0x667   : > { %v927_v28 = vpop.xlane.xlu0 %926 }
 0x668   : > { %v928_v2 = vmul.f32 %v927_v28, %v922_v23 }
 0x66a   : > { %v929_v29 = vadd.f32 1e-05, %v928_v2 }
 0x66c   : > { %1233 = vrsqrt.f32 %v929_v29  ;;  %vm936_vm6 = vweird.f32 %v929_v29 }
 0x672   : > { %v1234_v30 = vpop.eup %1233 }
 0x673   : > { %v931_v31 = vmul.f32 %v1234_v30, %v929_v29  ;;  %vm937_vm5 = vweird.f32 %v1234_v30 }
 0x674   : > { %vm938_vm7 = vmor %vm936_vm6, %vm937_vm5 }
 0x675   : > { %v932_v32 = vmul.f32 %v1234_v30, %v931_v31 }
 0x677   : > { %v933_v33 = vmul.f32 0.5, %v932_v32 }
 0x679   : > { %v934_v34 = vsub.f32 1.5, %v933_v33 }
 0x67b   : > { %v935_v35 = vmul.f32 %v1234_v30, %v934_v34 }
 0x67d   : > { %v939_v37 = vsel %vm938_vm7, %v1234_v30, %v935_v35 }
 0x67e   : > { %v940_v39 = vmul.f32 %v939_v37, %v924_v26 }
 0x680   : > { %v945_v40 = vmul.f32 %v1213_v36, %v940_v39 }
 0x682   : > { %v950_v41 = vadd.f32 %v1214_v38, %v945_v40 }
 0x684   : > { %v951_v42 = vpack.c.bf16 %v950_v41, %v950_v41 }
 0x686   : > { %952 = vst [vmem:[%s317_s22] sm:$0xf] %v951_v42 }
 0x687 PF: > { %s18_s27 = sadd.s32 1, %s1241_s27  }
 0x688   : > { %p15_p4 = scmp.ge.s32.totalorder %s18_s27, 4  }
 0x68a   :  { %17 = sbr.rel (!%p15_p4) target bundleno = 1 (0x1), region = 85 }

// kernel: transformer_forward.16
= control target key start
LH: loop header
LB: loop body
LE: loop exit
PB: predicated region body
PF: predicated region fallthrough
CT: control target
= control target key end

     0   :  { %s1430_s17 = smov 0   ;;  %s1674_s0 = inlined_call_operand.vmem [shape: bf16[2,8,128], index: 0, kind: input, shape index: {}]   ;;  %s1675_s1 = inlined_call_operand.vmem [shape: bf16[2,16,128], index: 1, kind: input, shape index: {}]   ;;  %s1676_s2 = inlined_call_operand.vmem [shape: bf16[128,128], index: 2, kind: input, shape index: {}]   ;;  %s1677_s3 = inlined_call_operand.vmem [shape: f32[1,128], index: 3, kind: input, shape index: {}]   ;;  %s1678_s4 = inlined_call_operand.vmem [shape: bf16[128,256], index: 4, kind: input, shape index: {}]   ;;  %s1679_s5 = inlined_call_operand.vmem [shape: f32[1,256], index: 5, kind: input, shape index: {}]   ;;  %s1680_s6 = inlined_call_operand.vmem [shape: bf16[128,128], index: 6, kind: input, shape index: {}]   ;;  %s1681_s7 = inlined_call_operand.vmem [shape: f32[1,128], index: 7, kind: input, shape index: {}]   ;;  %s1682_s8 = inlined_call_operand.vmem [shape: f32[2,8,16], index: 8, kind: input, shape index: {}]   ;;  %s1683_s9 = inlined_call_operand.vmem [shape: f32[1,128], index: 9, kind: input, shape index: {}]   ;;  %s1684_s10 = inlined_call_operand.vmem [shape: f32[1,128], index: 10, kind: input, shape index: {}]   ;;  %s1685_s11 = inlined_call_operand.vmem [shape: bf16[2,8,128], index: 11, kind: output, shape index: {}]  }
   0x1 LB: > { %s1132_s18 = sadd.s32 4294967295, %s1364_s17   ;;  %p1136_p0 = scmp.ge.s32.totalorder %s1364_s17, 1  ;;  %s1364_s17 = sphi %s1430_s17, %s21_s17  }
   0x2   : > { %p355_p1 = scmp.lt.s32.totalorder %s1364_s17, 3 }
   0x4   : > { %p356_p2 = pnand %p1136_p0, %p355_p1 }
   0x5   : > { %p402_p3 = scmp.lt.s32.totalorder (!%p356_p2), %s1132_s18, 1  ;;  %s1366_s29 = smov (!%p356_p2), 32  }
   0x6   : > { %359 = sbr.rel (%p356_p2) target bundleno = 1685 (0x695), region = 64  ;;  %s1368_s12 = smov (!%p356_p2), 64  }
   0xb   : > { %v1236_v0 = vld [vmem:[%s1678_s4 + $0x70] sm:$0xf]  ;;  %v1313_v1 = vld [vmem:[%s1678_s4 + $0x74] sm:$0xf0]  ;;  %v1312_v2 = vld [vmem:[%s1678_s4 + $0x74] sm:$0xf] }
   0xc   : > { %v1237_v3 = vor.u32 %v1313_v1, %v1236_v0  ;;  %v1238_v4 = vld [vmem:[%s1678_s4 + $0x78] sm:$0xf0]  ;;  %v1228_v5 = vld [vmem:[%s1678_s4 + $0x60] sm:$0xf]  ;;  %v1311_v6 = vld [vmem:[%s1678_s4 + $0x64] sm:$0xf0] }
   0xd   : > { %v1241_v7 = vor.u32 %v1312_v2, %v1238_v4  ;;  %v1310_v8 = vld [vmem:[%s1678_s4 + $0x64] sm:$0xf]  ;;  %v1230_v9 = vld [vmem:[%s1678_s4 + $0x68] sm:$0xf0]  ;;  %v1229_v10 = vor.u32 %v1311_v6, %v1228_v5  ;;  %v1220_v12 = vld [vmem:[%s1678_s4 + $0x50] sm:$0xf] }
   0xe   : > { %613 = vmatpush.bf16.msra.mxu1 %v1237_v3  ;;  %v1233_v11 = vor.u32 %v1310_v8, %v1230_v9  ;;  %v1309_v13 = vld [vmem:[%s1678_s4 + $0x54] sm:$0xf0]  ;;  %v1308_v14 = vld [vmem:[%s1678_s4 + $0x54] sm:$0xf]  ;;  %v1222_v15 = vld [vmem:[%s1678_s4 + $0x58] sm:$0xf0] }
   0xf   : > { %627 = vmatpush.bf16.msra.mxu2 %v1241_v7  ;;  %v1297_v16 = vld [vmem:[%s1676_s2 + $0x38] sm:$0xff]  ;;  %v1221_v17 = vor.u32 %v1309_v13, %v1220_v12  ;;  %v1225_v18 = vor.u32 %v1308_v14, %v1222_v15  ;;  %v1212_v19 = vld [vmem:[%s1678_s4 + $0x40] sm:$0xf]  ;;  %v1307_v20 = vld [vmem:[%s1678_s4 + $0x44] sm:$0xf0]  ;;  %s1687_s18 = smov (!%p402_p3, %s1132_s18), 1 }
  0x10   : > { %491 = vmatpush.bf16.msra.mxu0 %v1297_v16  ;;  %v1296_v21 = vld [vmem:[%s1676_s2 + $0x30] sm:$0xff]  ;;  %v1306_v22 = vld [vmem:[%s1678_s4 + $0x44] sm:$0xf]  ;;  %v1214_v23 = vld [vmem:[%s1678_s4 + $0x48] sm:$0xf0]  ;;  %v1213_v24 = vor.u32 %v1307_v20, %v1212_v19  ;;  %s1288_s21 = sshll.u32 %s1687_s18, 3 }
  0x11   : > { %v1217_v25 = vor.u32 %v1306_v22, %v1214_v23  ;;  %v1204_v26 = vld [vmem:[%s1678_s4 + $0x30] sm:$0xf]  ;;  %v1305_v27 = vld [vmem:[%s1678_s4 + $0x34] sm:$0xf0]  ;;  %v1295_v28 = vld [vmem:[%s1676_s2 + $0x28] sm:$0xff]  ;;  %s410_s30 = scalar_lea.vmem %s1675_s1, %s1288_s21  ;;  %s1137_s14 = sshll.u32 %s1687_s18, 2 }
  0x12   : > { %614 = vmatpush.bf16.msra.mxu1 %v1229_v10  ;;  %v1304_v29 = vld [vmem:[%s1678_s4 + $0x34] sm:$0xf]  ;;  %v1206_v30 = vld [vmem:[%s1678_s4 + $0x38] sm:$0xf0]  ;;  %v1205_v31 = vor.u32 %v1305_v27, %v1204_v26  ;;  %v1196_v33 = vld [vmem:[%s1678_s4 + $0x20] sm:$0xf]  ;;  %s405_s22 = scalar_lea.vmem %s1674_s0, %s1137_s14  ;;  %s414_s20 = scalar_lea.vmem %s1682_s8, %s1288_s21 }
  0x13   : > { %628 = vmatpush.bf16.msra.mxu2 %v1233_v11  ;;  %v1209_v32 = vor.u32 %v1304_v29, %v1206_v30  ;;  %v1303_v34 = vld [vmem:[%s1678_s4 + $0x24] sm:$0xf0]  ;;  %v1294_v35 = vld [vmem:[%s1676_s2 + $0x20] sm:$0xff]  ;;  %v1198_v37 = vld [vmem:[%s1678_s4 + $0x28] sm:$0xf0]  ;;  %vm649_vm0 = vcmask 261120   ;;  %s418_s25 = scalar_lea.vmem %s1685_s11, %s1137_s14 }
  0x14   : > { %492 = vmatpush.bf16.msra.mxu0 %v1296_v21  ;;  %v1302_v36 = vld [vmem:[%s1678_s4 + $0x24] sm:$0xf]  ;;  %v1197_v38 = vor.u32 %v1303_v34, %v1196_v33  ;;  %v1188_v40 = vld [vmem:[%s1678_s4 + $0x10] sm:$0xf]  ;;  %v1301_v41 = vld [vmem:[%s1678_s4 + $0x14] sm:$0xf0] }
  0x15   : > { %v1201_v39 = vor.u32 %v1302_v36, %v1198_v37  ;;  %v1293_v42 = vld [vmem:[%s1676_s2 + $0x18] sm:$0xff]  ;;  %v1300_v43 = vld [vmem:[%s1678_s4 + $0x14] sm:$0xf]  ;;  %v1189_v45 = vor.u32 %v1301_v41, %v1188_v40  ;;  %v1180_v47 = vld [vmem:[%s1678_s4] sm:$0xf]  ;;  %vm671_vm1 = vcmask 130048  }
  0x16   : > { %615 = vmatpush.bf16.msra.mxu1 %v1221_v17  ;;  %v1190_v44 = vld [vmem:[%s1678_s4 + $0x18] sm:$0xf0]  ;;  %v1299_v48 = vld [vmem:[%s1678_s4 + $0x4] sm:$0xf0]  ;;  %v1292_v49 = vld [vmem:[%s1676_s2 + $0x10] sm:$0xff] }
  0x17   : > { %629 = vmatpush.bf16.msra.mxu2 %v1225_v18  ;;  %v1193_v46 = vor.u32 %v1300_v43, %v1190_v44  ;;  %v1298_v50 = vld [vmem:[%s1678_s4 + $0x4] sm:$0xf]  ;;  %v1182_v51 = vld [vmem:[%s1678_s4 + $0x8] sm:$0xf0]  ;;  %v1181_v52 = vor.u32 %v1299_v48, %v1180_v47  ;;  %v1576_v57 = vld [vmem:[%s405_s22] sm:$0xf] }
  0x18   : > { %493 = vmatpush.bf16.msra.mxu0 %v1295_v28  ;;  %v1185_v53 = vor.u32 %v1298_v50, %v1182_v51  ;;  %v1291_v54 = vld [vmem:[%s1676_s2 + $0x8] sm:$0xff]  ;;  %v1289_v55 = vld [vmem:[%s410_s30] sm:$0xff]  ;;  %s1367_s30 = smov 96  }
  0x19   : > { %v1290_v56 = vld [vmem:[%s1676_s2] sm:$0xff]  ;;  %v1315_v0 = vld [vmem:[%s1680_s6 + $0x8] sm:$0xff] }
  0x1a   : > { %616 = vmatpush.bf16.msra.mxu1 %v1213_v24  ;;  %v521_v59 = vld [vmem:[%s1679_s5] sm:$0x3] }
  0x1b   : > { %630 = vmatpush.bf16.msra.mxu2 %v1217_v25  ;;  %v523_v62 = vperm.slane %v521_v59, 0  ;;  %v524_v63 = vperm.slane %v521_v59, 1  ;;  %v1334_v3 = vld [vmem:[%s1677_s3] ss:$0 sm:$0xff] }
  0x1c   : > { %494 = vmatpush.bf16.msra.mxu0 %v1294_v35  ;;  %v1314_v22 = vld [vmem:[%s1680_s6] sm:$0xff] }
  0x1d   : > { %v643_v28 = vld [vmem:[%s414_s20] sm:$0xff] }
  0x1e   : > { %617 = vmatpush.bf16.msra.mxu1 %v1205_v31 }
  0x1f   : > { %631 = vmatpush.bf16.msra.mxu2 %v1209_v32 }
  0x20   : > { %495 = vmatpush.bf16.msra.mxu0 %v1293_v42 }
  0x22   : > { %618 = vmatpush.bf16.msra.mxu1 %v1197_v38 }
  0x23   : > { %632 = vmatpush.bf16.msra.mxu2 %v1201_v39 }
  0x24   : > { %496 = vmatpush.bf16.msra.mxu0 %v1292_v49 }
  0x26   : > { %619 = vmatpush.bf16.msra.mxu1 %v1189_v45 }
  0x27   : > { %633 = vmatpush.bf16.msra.mxu2 %v1193_v46 }
  0x28   : > { %497 = vmatpush.bf16.msra.mxu0 %v1291_v54 }
  0x2a   : > { %620 = vmatpush.bf16.msra.mxu1 %v1181_v52 }
  0x2b   : > { %634 = vmatpush.bf16.msra.mxu2 %v1185_v53 }
  0x2c   : > { %498 = vmatpush.bf16.msra.mxu0 %v1290_v56 }
  0x2d   : > { %621 = vmatmul.bf16.vlgmr.msra.gmra.mxu1 %v1289_v55 }
  0x2e   : > { %635 = vmatmul.bf16.vlgmr.msra.gmra.mxu2 %v1289_v55 }
  0x2f   : > { %499 = vmatmul.bf16.vlgmr.msra.gmra.mxu0 %v1576_v57  ;;  %822 = vmatpush.bf16.msrb.mxu2 %v1315_v0 }
  0x33   : > { %823 = vmatpush.bf16.msrb.mxu2 %v1314_v22 }
  0xaa   : > { %v622_v58 = vpop.f32.mrf.mxu1 }
  0xab   : > { %v623_v1 = vadd.f32 %v622_v58, %v523_v62 }
  0xac   : > { %v500_v60 = vpop.f32.mrf.mxu0 }
  0xad   : > { %v501_v10 = vadd.f32 %v1334_v3, %v500_v60 }
  0xaf   : > { %v504_v15 = vpack.c.bf16 %v501_v10, %v501_v10 }
  0xb1   : > { %v636_v61 = vpop.f32.mrf.mxu2  ;;  %v710_v19 = vunpack.c.l.b16 %v504_v15 }
  0xb2   : > { %v637_v2 = vadd.f32 %v636_v61, %v524_v63  ;;  %v624_v4 = vpop.f32.mrf.mxu1 }
  0xb3   : > { %v625_v8 = vadd.f32 %v624_v4, %v523_v62  ;;  %v711_v21 = vpack.c.b16 %v710_v19, %v710_v19 }
  0xb4   : > { %v502_v5 = vpop.f32.mrf.mxu0  ;;  %v641_v7 = vpack.c.bf16 %v637_v2, %v623_v1 }
  0xb6   : > { %v646_v12 = vunpack.c.l.b16 %v641_v7  ;;  %v684_v16 = vunpack.c.h.b16 %v641_v7 }
  0xb9   : > { %v638_v6 = vpop.f32.mrf.mxu2 }
  0xba   : > { %v639_v9 = vadd.f32 %v638_v6, %v524_v63 }
  0xbc   : > { %v642_v11 = vpack.c.bf16 %v639_v9, %v625_v8 }
  0xbe   : > { %v647_v13 = vunpack.c.l.b16 %v642_v11  ;;  %v685_v14 = vunpack.c.h.b16 %v642_v11 }
  0xc0   : > { %v648_v17 = vpack.c.b16 %v647_v13, %v646_v12  ;;  %v1588_v18 = vpack.c.b16 %v685_v14, %v684_v16 }
  0xc2   : > { %921 = vrot.lane.b32.xlu2 %v648_v17, %s1366_s29  ;;  %714 = vrot.lane.b32.xlu1 %v648_v17, %s1367_s30  ;;  %v654_v20 = vsel %vm649_vm0, %v648_v17, 0 }
  0xc3   : > { %663 = vmatpush.bf16.xpose.msra.mxu3 %v654_v20 }
  0xca   : > { %831 = vrot.lane.b32.xlu2 %v648_v17, %s1368_s12  ;;  %712 = vrot.lane.b32.xlu1 %v711_v21, %s1367_s30 }
  0xcb   : > { %698 = vmatpush.bf16.msrb.mxu3 %v1588_v18 }
  0xcc   : > { %1242 = vmatmul.msk.bf16.vlgmr.msra.gmra.mxu3 %vm649_vm0, %v504_v15 }
  0xd2   : > { %829 = vrot.lane.b32.xlu1 %v711_v21, %s1368_s12 }
 0x11c   : > { %v922_v23 = vpop.permute.xlu2 %921 }
 0x11d   : > { %v927_v24 = vsel %vm649_vm0, %v922_v23, 0 }
 0x11e   : > { %936 = vmatpush.bf16.xpose.msra.mxu2 %v927_v24  ;;  %v1317_v24 = vld [vmem:[%s1680_s6 + $0x18] sm:$0xff] }
 0x11f   : > { %794 = vmatpush.bf16.msrb.mxu1 %v1317_v24 }
 0x124   : > { %v832_v41 = vpop.permute.xlu2 %831 }
 0x125   : > { %v837_v43 = vsel %vm649_vm0, %v832_v41, 0  ;;  %v1319_v41 = vld [vmem:[%s1680_s6 + $0x28] sm:$0xff] }
 0x134   : > { %v715_v25 = vpop.permute.xlu1 %714 }
 0x135   : > { %v720_v26 = vsel %vm649_vm0, %v715_v25, 0 }
 0x136   : > { %729 = vmatpush.bf16.xpose.msra.mxu3 %v720_v26 }
 0x13c   : > { %v713_v44 = vpop.permute.xlu1 %712 }
 0x144   : > { %v830_v45 = vpop.permute.xlu1 %829 }
 0x14f   : > { %v665_v27 = vpop.f32.mrf.mxu3 }
 0x150   : > { %v669_v29 = vmul.f32 0.17677669, %v665_v27  ;;  %v1316_v27 = vld [vmem:[%s1680_s6 + $0x10] sm:$0xff] }
 0x151   : > { %795 = vmatpush.bf16.msrb.mxu1 %v1316_v27 }
 0x152   : > { %v670_v30 = vadd.f32 %v669_v29, %v643_v28 }
 0x154   : > { %v672_v31 = vsel %vm671_vm1, %v670_v30, -inf }
 0x155   : > { %673 = vmax.xlane.f32.xlu0 %v672_v31  ;;  %911 = vmatpush.bf16.msra.mxu1 %v1319_v41 }
 0x157   : > { %v667_v32 = vpop.f32.mrf.mxu3 }
 0x1c8   : > { %v674_v33 = vpop.xlane.xlu0 %673 }
 0x1c9   : > { %v675_v34 = vsub.f32 %v670_v30, %v674_v33 }
 0x1cb   : > { %v676_v35 = vmul.f32 1.442695, %v675_v34 }
 0x1cd   : > { %1338 = vpow2.f32 %v676_v35 }
 0x1d3   : > { %v1339_v36 = vpop.eup %1338 }
 0x1d4   : > { %v678_v37 = vsel %vm671_vm1, %v1339_v36, 0.0 }
 0x1d5   : > { %679 = vadd.xlane.f32.xlu0 %v678_v37 }
 0x1e9   : > { %919 = vrot.lane.b32.xlu0 %v711_v21, %s1366_s29 }
 0x248   : > { %v680_v38 = vpop.xlane.xlu0 %679 }
 0x249   : > { %1340 = vrcp.f32 %v680_v38 }
 0x24f   : > { %v1341_v39 = vpop.eup %1340 }
 0x250   : > { %v682_v40 = vmul.f32 %v1341_v39, %v1339_v36  ;;  %v1321_v39 = vld [vmem:[%s1680_s6 + $0x38] sm:$0xff] }
 0x252   : > { %v683_v42 = vpack.c.bf16 %v682_v40, %v682_v40  ;;  %v1320_v40 = vld [vmem:[%s1680_s6 + $0x30] sm:$0xff] }
 0x254   : > { %1243 = vmatmul.msk.bf16.vlgmr.msrb.gmra.mxu3 %vm671_vm1, %v683_v42  ;;  %v1318_v42 = vld [vmem:[%s1680_s6 + $0x20] sm:$0xff] }
 0x255   : > { %846 = vmatpush.bf16.xpose.msrb.mxu3 %v837_v43  ;;  %912 = vmatpush.bf16.msra.mxu1 %v1318_v42 }
 0x25b   : > { %v920_v51 = vpop.permute.xlu0 %919 }
 0x264   : > { %1244 = vmatmul.msk.bf16.vlgmr.msra.gmra.mxu3 %vm649_vm0, %v713_v44 }
 0x274   : > { %1264 = vmatmul.msk.bf16.vlgmr.msrb.gmra.mxu3 %vm649_vm0, %v830_v45 }
 0x2d7   : > { %v700_v46 = vpop.f32.mrf.mxu3 }
 0x2d8   : > { %v704_v47 = vpack.c.bf16 %v700_v46, %v700_v46 }
 0x2da   : > { %1263 = vmatmul.msk.bf16.vlgmr.msrb.gmra.mxu2 %vm649_vm0, %v704_v47 }
 0x2df   : > { %v702_v48 = vpop.f32.mrf.mxu3 }
 0x2e7   : > { %v731_v49 = vpop.f32.mrf.mxu3 }
 0x2e8   : > { %v735_v50 = vmul.f32 0.17677669, %v731_v49 }
 0x2ea   : > { %1275 = vmatmul.msk.bf16.vlgmr.msra.gmra.mxu2 %vm649_vm0, %v920_v51  ;;  %v736_v52 = vadd.f32 %v735_v50, %v643_v28 }
 0x2ec   : > { %v737_v53 = vsel %vm671_vm1, %v736_v52, -inf }
 0x2ed   : > { %738 = vmax.xlane.f32.xlu2 %v737_v53 }
 0x2ef   : > { %v733_v54 = vpop.f32.mrf.mxu3 }
 0x2f7   : > { %v848_v55 = vpop.f32.mrf.mxu3 }
 0x2f8   : > { %v852_v56 = vmul.f32 0.17677669, %v848_v55 }
 0x2fa   : > { %v853_v58 = vadd.f32 %v852_v56, %v643_v28  ;;  %v1335_v56 = vld [vmem:[%s1681_s7] ss:$0 sm:$0xff] }
 0x2fc   : > { %v854_v59 = vsel %vm671_vm1, %v853_v58, -inf }
 0x2fd   : > { %855 = vmax.xlane.f32.xlu0 %v854_v59 }
 0x2ff   : > { %v850_v60 = vpop.f32.mrf.mxu3 }
 0x311   : > { %956 = vrot.lane.b32.xlu0 %v1588_v18, %s1366_s29 }
 0x35d   : > { %v1621_v61 = vpop.f32.mrf.mxu2 }
 0x360   : > { %v739_v62 = vpop.xlane.xlu2 %738 }
 0x361   : > { %v740_v63 = vsub.f32 %v736_v52, %v739_v62 }
 0x363   : > { %v741_v0 = vmul.f32 1.442695, %v740_v63 }
 0x365   : > { %1342 = vpow2.f32 %v741_v0  ;;  %v827_v1 = vpop.f32.mrf.mxu2  ;;  %v1369_v0 = vmov 128.0  }
 0x36b   : > { %v1343_v2 = vpop.eup %1342 }
 0x36c   : > { %v743_v3 = vsel %vm671_vm1, %v1343_v2, 0.0 }
 0x36d   : > { %v938_v4 = vpop.f32.mrf.mxu2  ;;  %744 = vadd.xlane.f32.xlu2 %v743_v3 }
 0x36e   : > { %v942_v5 = vmul.f32 0.17677669, %v938_v4 }
 0x370   : > { %v856_v6 = vpop.xlane.xlu0 %855  ;;  %v943_v7 = vadd.f32 %v942_v5, %v643_v28 }
 0x371   : > { %v857_v8 = vsub.f32 %v853_v58, %v856_v6  ;;  %v1014_v58 = vunpack.c.l.bf16 %v1576_v57 }
 0x372   : > { %v944_v9 = vsel %vm671_vm1, %v943_v7, -inf }
 0x373   : > { %v858_v10 = vmul.f32 1.442695, %v857_v8  ;;  %945 = vmax.xlane.f32.xlu1 %v944_v9 }
 0x375   : > { %1344 = vpow2.f32 %v858_v10  ;;  %v940_v11 = vpop.f32.mrf.mxu2 }
 0x37b   : > { %v1345_v12 = vpop.eup %1344 }
 0x37c   : > { %v860_v13 = vsel %vm671_vm1, %v1345_v12, 0.0 }
 0x37d   : > { %861 = vadd.xlane.f32.xlu1 %v860_v13 }
 0x383   : > { %v957_v14 = vpop.permute.xlu0 %956 }
 0x384   : > { %969 = vmatpush.bf16.msra.mxu3 %v957_v14 }
 0x385   : > { %749 = vrot.lane.b32.xlu2 %v1588_v18, %s1367_s30 }
 0x3e0   : > { %v745_v15 = vpop.xlane.xlu2 %744 }
 0x3e1   : > { %1346 = vrcp.f32 %v745_v15 }
 0x3e6   : > { %v946_v16 = vpop.xlane.xlu1 %945 }
 0x3e7   : > { %v1347_v17 = vpop.eup %1346  ;;  %v947_v19 = vsub.f32 %v943_v7, %v946_v16 }
 0x3e8   : > { %v747_v20 = vmul.f32 %v1347_v17, %v1343_v2  ;;  %v750_v21 = vpop.permute.xlu2 %749 }
 0x3e9   : > { %v948_v22 = vmul.f32 1.442695, %v947_v19  ;;  %762 = vmatpush.bf16.msrb.mxu0 %v750_v21  ;;  %v1336_v19 = vld [vmem:[%s1683_s9] ss:$0 sm:$0xff] }
 0x3ea   : > { %v748_v23 = vpack.c.bf16 %v747_v20, %v747_v20  ;;  %v1337_v21 = vld [vmem:[%s1684_s10] ss:$0 sm:$0xff] }
 0x3eb   : > { %1348 = vpow2.f32 %v948_v22 }
 0x3ec   : > { %1245 = vmatmul.msk.bf16.vlgmr.msrb.gmra.mxu0 %vm671_vm1, %v748_v23 }
 0x3f0   : > { %v862_v28 = vpop.xlane.xlu1 %861 }
 0x3f1   : > { %v1349_v25 = vpop.eup %1348 }
 0x3f2   : > { %v950_v26 = vsel %vm671_vm1, %v1349_v25, 0.0 }
 0x3f3   : > { %951 = vadd.xlane.f32.xlu1 %v950_v26 }
 0x40c   : > { %866 = vrot.lane.b32.xlu1 %v1588_v18, %s1368_s12 }
 0x466   : > { %v952_v29 = vpop.xlane.xlu1 %951 }
 0x467   : > { %1350 = vrcp.f32 %v952_v29 }
 0x468   : > { %1352 = vrcp.f32 %v862_v28 }
 0x469   : > { %v764_v30 = vpop.f32.mrf.mxu0  ;;  %1354 = vrcp.f32 %v1369_v0 }
 0x46a   : > { %v768_v31 = vpack.c.bf16 %v764_v30, %v764_v30 }
 0x46c   : > { %1254 = vmatmul.msk.bf16.vlgmr.msrb.gmra.mxu1 %vm649_vm0, %v768_v31 }
 0x46d   : > { %v1351_v32 = vpop.eup %1350 }
 0x46e   : > { %v954_v33 = vmul.f32 %v1351_v32, %v1349_v25  ;;  %v1353_v18 = vpop.eup %1352 }
 0x46f   : > { %v864_v36 = vmul.f32 %v1353_v18, %v1345_v12  ;;  %v1355_v1 = vpop.eup %1354 }
 0x470   : > { %v955_v34 = vpack.c.bf16 %v954_v33, %v954_v33  ;;  %v1019_v2 = vmul.f32 128.0, %v1355_v1  ;;  %vm1023_vm2 = vweird.f32 %v1355_v1 }
 0x471   : > { %v766_v35 = vpop.f32.mrf.mxu0  ;;  %v865_v38 = vpack.c.bf16 %v864_v36, %v864_v36 }
 0x472   : > { %1276 = vmatmul.msk.bf16.vlgmr.msra.gmra.mxu3 %vm671_vm1, %v955_v34  ;;  %v1020_v3 = vsub.f32 1.0, %v1019_v2 }
 0x474   : > { %v1021_v4 = vmul.f32 %v1355_v1, %v1020_v3 }
 0x47e   : > { %v867_v37 = vpop.permute.xlu1 %866 }
 0x47f   : > { %879 = vmatpush.bf16.msra.mxu0 %v867_v37 }
 0x482   : > { %1265 = vmatmul.msk.bf16.vlgmr.msra.gmra.mxu0 %vm671_vm1, %v865_v38 }
 0x483   : > { %1001 = vmatpush.bf16.msrb.mxu0 %v1321_v39 }
 0x487   : > { %1002 = vmatpush.bf16.msrb.mxu0 %v1320_v40 }
 0x4e9   : > { %v797_v43 = vpop.f32.mrf.mxu1 }
 0x4ea   : > { %v826_v53 = vadd.f32 %v1621_v61, %v797_v43  ;;  %v1022_v61 = vadd.f32 %v1355_v1, %v1021_v4 }
 0x4ec   : > { %v1024_v5 = vsel %vm1023_vm2, %v1355_v1, %v1022_v61 }
 0x4f1   : > { %v799_v44 = vpop.f32.mrf.mxu1 }
 0x4f5   : > { %v971_v45 = vpop.f32.mrf.mxu3 }
 0x4f6   : > { %v975_v46 = vpack.c.bf16 %v971_v45, %v971_v45 }
 0x4f8   : > { %1285 = vmatmul.msk.bf16.vlgmr.msrb.gmra.mxu0 %vm649_vm0, %v975_v46 }
 0x4fd   : > { %v973_v47 = vpop.f32.mrf.mxu3 }
 0x4ff   : > { %v881_v48 = vpop.f32.mrf.mxu0 }
 0x500   : > { %v885_v49 = vpack.c.bf16 %v881_v48, %v881_v48 }
 0x502   : > { %1274 = vmatmul.msk.bf16.vlgmr.msra.gmra.mxu1 %vm649_vm0, %v885_v49 }
 0x507   : > { %v883_v50 = vpop.f32.mrf.mxu0 }
 0x575   : > { %v1004_v51 = vpop.f32.mrf.mxu0 }
 0x57d   : > { %v1006_v52 = vpop.f32.mrf.mxu0 }
 0x57f   : > { %v914_v54 = vpop.f32.mrf.mxu1 }
 0x580   : > { %v918_v55 = vadd.f32 %v914_v54, %v826_v53 }
 0x582   : > { %v1008_v59 = vadd.f32 %v1004_v51, %v918_v55 }
 0x584   : > { %v1013_v60 = vadd.f32 %v1335_v56, %v1008_v59 }
 0x586   : > { %v1015_v62 = vadd.f32 %v1014_v58, %v1013_v60 }
 0x587   : > { %v916_v63 = vpop.f32.mrf.mxu1 }
 0x588   : > { %1016 = vadd.xlane.f32.xlu2 %v1015_v62 }
 0x5fb   : > { %v1017_v6 = vpop.xlane.xlu2 %1016 }
 0x5fc   : > { %v1025_v7 = vmul.f32 %v1024_v5, %v1017_v6 }
 0x5fe   : > { %v1026_v8 = vsub.f32 %v1015_v62, %v1025_v7 }
 0x600   : > { %v1027_v9 = vmul.f32 %v1026_v8, %v1026_v8 }
 0x602   : > { %1028 = vadd.xlane.f32.xlu0 %v1027_v9 }
 0x675   : > { %v1029_v57 = vpop.xlane.xlu0 %1028 }
 0x676   : > { %v1030_v10 = vmul.f32 %v1029_v57, %v1024_v5 }
 0x678   : > { %v1031_v11 = vadd.f32 1e-05, %v1030_v10 }
 0x67a   : > { %1356 = vrsqrt.f32 %v1031_v11  ;;  %vm1038_vm4 = vweird.f32 %v1031_v11 }
 0x680   : > { %v1357_v12 = vpop.eup %1356 }
 0x681   : > { %v1033_v13 = vmul.f32 %v1357_v12, %v1031_v11  ;;  %vm1039_vm3 = vweird.f32 %v1357_v12 }
 0x682   : > { %vm1040_vm5 = vmor %vm1038_vm4, %vm1039_vm3 }
 0x683   : > { %v1034_v14 = vmul.f32 %v1357_v12, %v1033_v13 }
 0x685   : > { %v1035_v15 = vmul.f32 0.5, %v1034_v14 }
 0x687   : > { %v1036_v16 = vsub.f32 1.5, %v1035_v15 }
 0x689   : > { %v1037_v17 = vmul.f32 %v1357_v12, %v1036_v16 }
 0x68b   : > { %v1041_v20 = vsel %vm1040_vm5, %v1357_v12, %v1037_v17 }
 0x68c   : > { %v1042_v22 = vmul.f32 %v1041_v20, %v1026_v8 }
 0x68e   : > { %v1047_v23 = vmul.f32 %v1336_v19, %v1042_v22 }
 0x690   : > { %v1052_v24 = vadd.f32 %v1337_v21, %v1047_v23 }
 0x692   : > { %v1053_v25 = vpack.c.bf16 %v1052_v24, %v1052_v24 }
 0x694   : > { %1054 = vst [vmem:[%s418_s25] sm:$0xf] %v1053_v25 }
 0x695 PF: > { %s21_s17 = sadd.s32 1, %s1364_s17  }
 0x696   : > { %p18_p4 = scmp.ge.s32.totalorder %s21_s17, 4  }
 0x698   :  { %20 = sbr.rel (!%p18_p4) target bundleno = 1 (0x1), region = 100 }

// kernel: transformer_forward.21
= control target key start
LH: loop header
LB: loop body
LE: loop exit
PB: predicated region body
PF: predicated region fallthrough
CT: control target
= control target key end

     0   :  { %s519_s12 = smov 0   ;;  %s521_s13 = smov 0   ;;  %s579_s0 = inlined_call_operand.vmem [shape: bf16[16,128], index: 0, kind: input, shape index: {}]   ;;  %s580_s1 = inlined_call_operand.vmem [shape: bf16[128,128], index: 1, kind: input, shape index: {}]   ;;  %s581_s2 = inlined_call_operand.vmem [shape: f32[1,128], index: 2, kind: input, shape index: {}]   ;;  %s582_s3 = inlined_call_operand.vmem [shape: f32[16,128], index: 3, kind: output, shape index: {}]  }
   0x1   :  { %s523_s14 = smov 0  }
   0x2 LB: > { %s25_s15 = sadd.s32 1, %s493_s13  ;;  %p405_p0 = scmp.ge.s32.totalorder %s497_s14, 1  ;;  %s497_s14 = sphi %s523_s14, %s13_s14   ;;  %s493_s13 = sphi %s521_s13, %s584_s13   ;;  %s489_s12 = sphi %s519_s12, %s583_s12  }
   0x3   : > { %p27_p1 = scmp.ge.s32.totalorder %s25_s15, 2  ;;  %p167_p2 = scmp.lt.s32.totalorder %s497_s14, 3 }
   0x5   : > { %s586_s15 = smov (%p27_p1, %s25_s15), 0  ;;  %p168_p3 = pnand %p405_p0, %p167_p2 }
   0x6   : > { %p199_p4 = scmp.lt.s32.totalorder (!%p168_p3), %s489_s12, 1 }
   0x7   : > { %171 = sbr.rel (%p168_p3) target bundleno = 178 (0xb2), region = 32 }
   0xc   : > { %v449_v0 = vld [vmem:[%s580_s1 + $0x38] sm:$0xff]  ;;  %v448_v1 = vld [vmem:[%s580_s1 + $0x30] sm:$0xff]  ;;  %v447_v2 = vld [vmem:[%s580_s1 + $0x28] sm:$0xff]  ;;  %s588_s12 = smov (!%p199_p4, %s489_s12), 1 }
   0xd   : > { %286 = vmatpush.bf16.msra.mxu0 %v449_v0  ;;  %v446_v3 = vld [vmem:[%s580_s1 + $0x20] sm:$0xff]  ;;  %v445_v4 = vld [vmem:[%s580_s1 + $0x18] sm:$0xff]  ;;  %v444_v5 = vld [vmem:[%s580_s1 + $0x10] sm:$0xff]  ;;  %s406_s30 = sshll.u32 %s588_s12, 2  ;;  %s407_s9 = sshll.u32 %s588_s12, 3 }
   0xe   : > { %v443_v6 = vld [vmem:[%s580_s1 + $0x8] sm:$0xff]  ;;  %v442_v7 = vld [vmem:[%s580_s1] sm:$0xff]  ;;  %s202_s8 = scalar_lea.vmem %s579_s0, %s406_s30  ;;  %s216_s18 = scalar_lea.vmem %s582_s3, %s407_s9 }
   0xf   : > { %v217_v8 = vld [vmem:[%s202_s8] sm:$0xf] }
  0x10   : > { %v474_v9 = vld [vmem:[%s581_s2] ss:$0 sm:$0xff] }
  0x11   : > { %287 = vmatpush.bf16.msra.mxu0 %v448_v1 }
  0x15   : > { %288 = vmatpush.bf16.msra.mxu0 %v447_v2 }
  0x19   : > { %289 = vmatpush.bf16.msra.mxu0 %v446_v3 }
  0x1d   : > { %290 = vmatpush.bf16.msra.mxu0 %v445_v4 }
  0x21   : > { %291 = vmatpush.bf16.msra.mxu0 %v444_v5 }
  0x25   : > { %292 = vmatpush.bf16.msra.mxu0 %v443_v6 }
  0x29   : > { %293 = vmatpush.bf16.msra.mxu0 %v442_v7 }
  0x2c   : > { %294 = vmatmul.bf16.vlgmr.msra.gmra.mxu0 %v217_v8 }
  0xa9   : > { %v295_v10 = vpop.f32.mrf.mxu0 }
  0xaa   : > { %v296_v11 = vadd.f32 %v474_v9, %v295_v10 }
  0xac   : > { %299 = vst [vmem:[%s216_s18] sm:$0xff] %v296_v11 }
  0xb1   : > { %v297_v12 = vpop.f32.mrf.mxu0 }
  0xb2 PF: > { %s13_s14 = sadd.s32 1, %s497_s14   ;;  %s583_s12 = smov %s493_s13 }
  0xb3   : > { %p10_p5 = scmp.ge.s32.totalorder %s13_s14, 4   ;;  %s584_s13 = smov %s586_s15 }
  0xb5   :  { %12 = sbr.rel (!%p10_p5) target bundleno = 2 (0x2), region = 68 }

// kernel: transformer_forward.17
= control target key start
LH: loop header
LB: loop body
LE: loop exit
PB: predicated region body
PF: predicated region fallthrough
CT: control target
= control target key end

     0   :  { %s893_s24 = smov 0   ;;  %s1077_s0 = inlined_call_operand.vmem [shape: bf16[16,128], index: 0, kind: input, shape index: {}]   ;;  %s1078_s1 = inlined_call_operand.vmem [shape: bf16[128,256], index: 1, kind: input, shape index: {}]   ;;  %s1079_s2 = inlined_call_operand.vmem [shape: f32[1,256], index: 2, kind: input, shape index: {}]   ;;  %s1080_s3 = inlined_call_operand.vmem [shape: bf16[256,128], index: 3, kind: input, shape index: {}]   ;;  %s1081_s4 = inlined_call_operand.vmem [shape: f32[1,128], index: 4, kind: input, shape index: {}]   ;;  %s1082_s5 = inlined_call_operand.vmem [shape: f32[1,128], index: 5, kind: input, shape index: {}]   ;;  %s1083_s6 = inlined_call_operand.vmem [shape: f32[1,128], index: 6, kind: input, shape index: {}]   ;;  %s1084_s7 = inlined_call_operand.vmem [shape: bf16[16,128], index: 7, kind: output, shape index: {}]  }
   0x1 LB: > { %s659_s25 = sadd.s32 4294967295, %s850_s24   ;;  %p663_p0 = scmp.ge.s32.totalorder %s850_s24, 1  ;;  %s850_s24 = sphi %s893_s24, %s17_s24  }
   0x2   : > { %p236_p1 = scmp.lt.s32.totalorder %s850_s24, 3 }
   0x4   : > { %p237_p2 = pnand %p663_p0, %p236_p1 }
   0x5   : > { %p266_p3 = scmp.lt.s32.totalorder (!%p237_p2), %s659_s25, 1 }
   0x6   : > { %240 = sbr.rel (%p237_p2) target bundleno = 584 (0x248), region = 48 }
   0xb   : > { %v724_v0 = vld [vmem:[%s1078_s1 + $0x70] sm:$0xf]  ;;  %v811_v1 = vld [vmem:[%s1078_s1 + $0x74] sm:$0xf0]  ;;  %v810_v2 = vld [vmem:[%s1078_s1 + $0x74] sm:$0xf] }
   0xc   : > { %v725_v3 = vor.u32 %v811_v1, %v724_v0  ;;  %v726_v4 = vld [vmem:[%s1078_s1 + $0x78] sm:$0xf0]  ;;  %v716_v5 = vld [vmem:[%s1078_s1 + $0x60] sm:$0xf]  ;;  %v809_v6 = vld [vmem:[%s1078_s1 + $0x64] sm:$0xf0] }
   0xd   : > { %v729_v7 = vor.u32 %v810_v2, %v726_v4  ;;  %v808_v8 = vld [vmem:[%s1078_s1 + $0x64] sm:$0xf]  ;;  %v718_v9 = vld [vmem:[%s1078_s1 + $0x68] sm:$0xf0]  ;;  %v717_v10 = vor.u32 %v809_v6, %v716_v5  ;;  %v708_v12 = vld [vmem:[%s1078_s1 + $0x50] sm:$0xf] }
   0xe   : > { %377 = vmatpush.bf16.msra.mxu0 %v725_v3  ;;  %v721_v11 = vor.u32 %v808_v8, %v718_v9  ;;  %v807_v13 = vld [vmem:[%s1078_s1 + $0x54] sm:$0xf0]  ;;  %v806_v14 = vld [vmem:[%s1078_s1 + $0x54] sm:$0xf]  ;;  %v710_v15 = vld [vmem:[%s1078_s1 + $0x58] sm:$0xf0] }
   0xf   : > { %390 = vmatpush.bf16.msra.mxu1 %v729_v7  ;;  %v709_v16 = vor.u32 %v807_v13, %v708_v12  ;;  %v713_v17 = vor.u32 %v806_v14, %v710_v15  ;;  %v700_v18 = vld [vmem:[%s1078_s1 + $0x40] sm:$0xf]  ;;  %v805_v19 = vld [vmem:[%s1078_s1 + $0x44] sm:$0xf0]  ;;  %v804_v20 = vld [vmem:[%s1078_s1 + $0x44] sm:$0xf] }
  0x10   : > { %v702_v21 = vld [vmem:[%s1078_s1 + $0x48] sm:$0xf0]  ;;  %v819_v22 = vld [vmem:[%s1080_s3 + $0x38] sm:$0xff]  ;;  %v701_v23 = vor.u32 %v805_v19, %v700_v18  ;;  %v692_v26 = vld [vmem:[%s1078_s1 + $0x30] sm:$0xf]  ;;  %s1086_s25 = smov (!%p266_p3, %s659_s25), 1 }
  0x11   : > { %v827_v24 = vld [vmem:[%s1080_s3 + $0x78] sm:$0xff]  ;;  %v705_v25 = vor.u32 %v804_v20, %v702_v21  ;;  %539 = vmatpush.bf16.msra.mxu2 %v819_v22  ;;  %v818_v28 = vld [vmem:[%s1080_s3 + $0x30] sm:$0xff]  ;;  %v684_v33 = vld [vmem:[%s1078_s1 + $0x20] sm:$0xf]  ;;  %s664_s22 = sshll.u32 %s1086_s25, 2 }
  0x12   : > { %378 = vmatpush.bf16.msra.mxu0 %v717_v10  ;;  %v803_v27 = vld [vmem:[%s1078_s1 + $0x34] sm:$0xf0]  ;;  %v802_v29 = vld [vmem:[%s1078_s1 + $0x34] sm:$0xf]  ;;  %v694_v30 = vld [vmem:[%s1078_s1 + $0x38] sm:$0xf0]  ;;  %552 = vmatpush.bf16.msra.mxu3 %v827_v24  ;;  %s269_s29 = scalar_lea.vmem %s1077_s0, %s664_s22  ;;  %s273_s9 = scalar_lea.vmem %s1084_s7, %s664_s22 }
  0x13   : > { %391 = vmatpush.bf16.msra.mxu1 %v721_v11  ;;  %v826_v31 = vld [vmem:[%s1080_s3 + $0x70] sm:$0xff]  ;;  %v693_v32 = vor.u32 %v803_v27, %v692_v26  ;;  %v697_v34 = vor.u32 %v802_v29, %v694_v30  ;;  %v801_v35 = vld [vmem:[%s1078_s1 + $0x24] sm:$0xf0]  ;;  %v800_v37 = vld [vmem:[%s1078_s1 + $0x24] sm:$0xf] }
  0x14   : > { %v817_v36 = vld [vmem:[%s1080_s3 + $0x28] sm:$0xff]  ;;  %v685_v40 = vor.u32 %v801_v35, %v684_v33  ;;  %v676_v42 = vld [vmem:[%s1078_s1 + $0x10] sm:$0xf]  ;;  %v799_v43 = vld [vmem:[%s1078_s1 + $0x14] sm:$0xf0] }
  0x15   : > { %540 = vmatpush.bf16.msra.mxu2 %v818_v28  ;;  %v686_v38 = vld [vmem:[%s1078_s1 + $0x28] sm:$0xf0]  ;;  %v816_v44 = vld [vmem:[%s1080_s3 + $0x20] sm:$0xff]  ;;  %v798_v45 = vld [vmem:[%s1078_s1 + $0x14] sm:$0xf]  ;;  %v677_v48 = vor.u32 %v799_v43, %v676_v42 }
  0x16   : > { %379 = vmatpush.bf16.msra.mxu0 %v709_v16  ;;  %553 = vmatpush.bf16.msra.mxu3 %v826_v31  ;;  %v825_v39 = vld [vmem:[%s1080_s3 + $0x68] sm:$0xff]  ;;  %v689_v41 = vor.u32 %v800_v37, %v686_v38  ;;  %v678_v46 = vld [vmem:[%s1078_s1 + $0x18] sm:$0xf0]  ;;  %v824_v47 = vld [vmem:[%s1080_s3 + $0x60] sm:$0xff] }
  0x17   : > { %392 = vmatpush.bf16.msra.mxu1 %v713_v17  ;;  %v681_v49 = vor.u32 %v798_v45, %v678_v46  ;;  %v668_v50 = vld [vmem:[%s1078_s1] sm:$0xf]  ;;  %v797_v51 = vld [vmem:[%s1078_s1 + $0x4] sm:$0xf0]  ;;  %v815_v52 = vld [vmem:[%s1080_s3 + $0x18] sm:$0xff] }
  0x18   : > { %v796_v53 = vld [vmem:[%s1078_s1 + $0x4] sm:$0xf]  ;;  %v670_v54 = vld [vmem:[%s1078_s1 + $0x8] sm:$0xf0]  ;;  %v823_v55 = vld [vmem:[%s1080_s3 + $0x58] sm:$0xff]  ;;  %v669_v56 = vor.u32 %v797_v51, %v668_v50 }
  0x19   : > { %541 = vmatpush.bf16.msra.mxu2 %v817_v36  ;;  %v673_v57 = vor.u32 %v796_v53, %v670_v54  ;;  %v814_v58 = vld [vmem:[%s1080_s3 + $0x10] sm:$0xff]  ;;  %v274_v60 = vld [vmem:[%s269_s29] sm:$0xf]  ;;  %v813_v61 = vld [vmem:[%s1080_s3 + $0x8] sm:$0xff] }
  0x1a   : > { %380 = vmatpush.bf16.msra.mxu0 %v701_v23  ;;  %554 = vmatpush.bf16.msra.mxu3 %v825_v39  ;;  %v822_v59 = vld [vmem:[%s1080_s3 + $0x50] sm:$0xff]  ;;  %v821_v62 = vld [vmem:[%s1080_s3 + $0x48] sm:$0xff]  ;;  %v812_v63 = vld [vmem:[%s1080_s3] sm:$0xff]  ;;  %v565_v18 = vunpack.c.l.bf16 %v274_v60  ;;  %v852_v23 = vmov 128.0  }
  0x1b   : > { %393 = vmatpush.bf16.msra.mxu1 %v705_v25  ;;  %v820_v0 = vld [vmem:[%s1080_s3 + $0x40] sm:$0xff]  ;;  %840 = vrcp.f32 %v852_v23 }
  0x1c   : > { %v291_v1 = vld [vmem:[%s1079_s2] sm:$0x3] }
  0x1d   : > { %542 = vmatpush.bf16.msra.mxu2 %v816_v44  ;;  %v293_v2 = vperm.slane %v291_v1, 0  ;;  %v294_v3 = vperm.slane %v291_v1, 1  ;;  %v837_v14 = vld [vmem:[%s1081_s4] ss:$0 sm:$0xff] }
  0x1e   : > { %381 = vmatpush.bf16.msra.mxu0 %v693_v32  ;;  %555 = vmatpush.bf16.msra.mxu3 %v824_v47  ;;  %v838_v43 = vld [vmem:[%s1082_s5] ss:$0 sm:$0xff] }
  0x1f   : > { %394 = vmatpush.bf16.msra.mxu1 %v697_v34  ;;  %v839_v45 = vld [vmem:[%s1083_s6] ss:$0 sm:$0xff] }
  0x21   : > { %543 = vmatpush.bf16.msra.mxu2 %v815_v52  ;;  %v841_v24 = vpop.eup %840 }
  0x22   : > { %382 = vmatpush.bf16.msra.mxu0 %v685_v40  ;;  %556 = vmatpush.bf16.msra.mxu3 %v823_v55  ;;  %v570_v25 = vmul.f32 128.0, %v841_v24  ;;  %vm574_vm0 = vweird.f32 %v841_v24 }
  0x23   : > { %395 = vmatpush.bf16.msra.mxu1 %v689_v41 }
  0x24   : > { %v571_v26 = vsub.f32 1.0, %v570_v25 }
  0x25   : > { %544 = vmatpush.bf16.msra.mxu2 %v814_v58 }
  0x26   : > { %383 = vmatpush.bf16.msra.mxu0 %v677_v48  ;;  %557 = vmatpush.bf16.msra.mxu3 %v822_v59  ;;  %v572_v27 = vmul.f32 %v841_v24, %v571_v26 }
  0x27   : > { %396 = vmatpush.bf16.msra.mxu1 %v681_v49 }
  0x28   : > { %v573_v28 = vadd.f32 %v841_v24, %v572_v27 }
  0x29   : > { %545 = vmatpush.bf16.msra.mxu2 %v813_v61 }
  0x2a   : > { %384 = vmatpush.bf16.msra.mxu0 %v669_v56  ;;  %558 = vmatpush.bf16.msra.mxu3 %v821_v62  ;;  %v575_v29 = vsel %vm574_vm0, %v841_v24, %v573_v28 }
  0x2b   : > { %397 = vmatpush.bf16.msra.mxu1 %v673_v57 }
  0x2d   : > { %385 = vmatmul.bf16.vlgmr.msra.gmra.mxu0 %v274_v60  ;;  %546 = vmatpush.bf16.msra.mxu2 %v812_v63 }
  0x2e   : > { %398 = vmatmul.bf16.vlgmr.msra.gmra.mxu1 %v274_v60  ;;  %559 = vmatpush.bf16.msra.mxu3 %v820_v0 }
  0xaa   : > { %v386_v4 = vpop.f32.mrf.mxu0 }
  0xab   : > { %v387_v5 = vadd.f32 %v386_v4, %v293_v2  ;;  %v399_v6 = vpop.f32.mrf.mxu1 }
  0xac   : > { %v400_v7 = vadd.f32 %v399_v6, %v294_v3 }
  0xad   : > { %v403_v8 = vmax.f32 %v387_v5, 0.0 }
  0xae   : > { %v404_v9 = vmax.f32 %v400_v7, 0.0 }
  0xaf   : > { %v405_v10 = vpack.c.bf16 %v403_v8, %v403_v8 }
  0xb0   : > { %v406_v11 = vpack.c.bf16 %v404_v9, %v404_v9 }
  0xb1   : > { %547 = vmatmul.bf16.vlgmr.msra.gmra.mxu2 %v405_v10 }
  0xb2   : > { %560 = vmatmul.bf16.vlgmr.msra.gmra.mxu3 %v406_v11  ;;  %v388_v12 = vpop.f32.mrf.mxu0 }
  0xb3   : > { %v401_v13 = vpop.f32.mrf.mxu1 }
 0x134   : > { %v548_v15 = vpop.f32.mrf.mxu2 }
 0x135   : > { %v549_v16 = vadd.f32 %v837_v14, %v548_v15  ;;  %v561_v17 = vpop.f32.mrf.mxu3 }
 0x137   : > { %v562_v19 = vadd.f32 %v561_v17, %v549_v16 }
 0x139   : > { %v566_v20 = vadd.f32 %v565_v18, %v562_v19 }
 0x13b   : > { %567 = vadd.xlane.f32.xlu0 %v566_v20 }
 0x13c   : > { %v550_v21 = vpop.f32.mrf.mxu2 }
 0x13d   : > { %v563_v22 = vpop.f32.mrf.mxu3 }
 0x1ae   : > { %v568_v30 = vpop.xlane.xlu0 %567 }
 0x1af   : > { %v576_v31 = vmul.f32 %v575_v29, %v568_v30 }
 0x1b1   : > { %v577_v32 = vsub.f32 %v566_v20, %v576_v31 }
 0x1b3   : > { %v578_v33 = vmul.f32 %v577_v32, %v577_v32 }
 0x1b5   : > { %579 = vadd.xlane.f32.xlu0 %v578_v33 }
 0x228   : > { %v580_v34 = vpop.xlane.xlu0 %579 }
 0x229   : > { %v581_v35 = vmul.f32 %v580_v34, %v575_v29 }
 0x22b   : > { %v582_v36 = vadd.f32 1e-05, %v581_v35 }
 0x22d   : > { %842 = vrsqrt.f32 %v582_v36  ;;  %vm589_vm2 = vweird.f32 %v582_v36 }
 0x233   : > { %v843_v37 = vpop.eup %842 }
 0x234   : > { %v584_v38 = vmul.f32 %v843_v37, %v582_v36  ;;  %vm590_vm1 = vweird.f32 %v843_v37 }
 0x235   : > { %vm591_vm3 = vmor %vm589_vm2, %vm590_vm1 }
 0x236   : > { %v585_v39 = vmul.f32 %v843_v37, %v584_v38 }
 0x238   : > { %v586_v40 = vmul.f32 0.5, %v585_v39 }
 0x23a   : > { %v587_v41 = vsub.f32 1.5, %v586_v40 }
 0x23c   : > { %v588_v42 = vmul.f32 %v843_v37, %v587_v41 }
 0x23e   : > { %v592_v44 = vsel %vm591_vm3, %v843_v37, %v588_v42 }
 0x23f   : > { %v593_v46 = vmul.f32 %v592_v44, %v577_v32 }
 0x241   : > { %v598_v47 = vmul.f32 %v838_v43, %v593_v46 }
 0x243   : > { %v603_v48 = vadd.f32 %v839_v45, %v598_v47 }
 0x245   : > { %v604_v49 = vpack.c.bf16 %v603_v48, %v603_v48 }
 0x247   : > { %605 = vst [vmem:[%s273_s9] sm:$0xf] %v604_v49 }
 0x248 PF: > { %s17_s24 = sadd.s32 1, %s850_s24  }
 0x249   : > { %p14_p4 = scmp.ge.s32.totalorder %s17_s24, 4  }
 0x24b   :  { %16 = sbr.rel (!%p14_p4) target bundleno = 1 (0x1), region = 78 }

</bundles_post_ra>
